<compile_context>
chip_gen: v6e
topology: v6e:2x2x1
jax: 0.10.0
libtpu: 0.0.40
codegen_flags: <defaults>
</compile_context>

<pallas_src>
import functools
import math

import jax
import jax.numpy as jnp
from jax.experimental import pallas as pl
from jax.experimental.pallas import tpu as pltpu


# --------------------------------------------------------------------------
# Kernel 1: fused QKV projection -> head-major bf16 q/k/v, scale folded into q
# --------------------------------------------------------------------------
def _qkv_proj_kernel(x_ref, wqkv_ref, q_ref, k_ref, v_ref, *,
                     heads, dim_head, scale):
    # x_ref:    (1, tn, D)  f32
    # wqkv_ref: (D, 3*inner) bf16
    # q/k/v_ref: (1, H, tn, dh) bf16
    inner = heads * dim_head
    x = x_ref[0].astype(jnp.bfloat16)
    qkv = jnp.dot(x, wqkv_ref[...],
                  preferred_element_type=jnp.float32)      # (tn, 3*inner) f32

    # Static per-head split (once per tile, outside the attention hot loop).
    for h in range(heads):
        lo = h * dim_head
        q_ref[0, h] = (qkv[:, lo:lo + dim_head] * scale).astype(jnp.bfloat16)
        k_ref[0, h] = qkv[:, inner + lo:inner + lo + dim_head].astype(jnp.bfloat16)
        v_ref[0, h] = qkv[:, 2 * inner + lo:2 * inner + lo + dim_head].astype(jnp.bfloat16)


# --------------------------------------------------------------------------
# Kernel 2: flash attention (online softmax over KV blocks) + fused to_out
# --------------------------------------------------------------------------
def _flash_attn_kernel(q_ref, k_ref, v_ref, *rest,
                       heads, dim_head, out_dim, project_out):
    if project_out:
        wout_ref, bout_ref, out_ref, m_sc, l_sc, acc_sc = rest
    else:
        out_ref, m_sc, l_sc, acc_sc = rest

    ki = pl.program_id(2)
    nk = pl.num_programs(2)

    @pl.when(ki == 0)
    def _init():
        m_sc[...] = jnp.full(m_sc.shape, -jnp.inf, jnp.float32)
        l_sc[...] = jnp.zeros(l_sc.shape, jnp.float32)
        acc_sc[...] = jnp.zeros(acc_sc.shape, jnp.float32)

    q = q_ref[0]                       # (H, tq, dh) bf16, scale pre-folded
    k = k_ref[0]                       # (H, tk, dh) bf16
    v = v_ref[0]                       # (H, tk, dh) bf16

    # Batched over heads; contraction over dh, K consumed in natural layout.
    s = jnp.einsum('hqd,hkd->hqk', q, k,
                   preferred_element_type=jnp.float32)      # (H, tq, tk) f32

    m_prev = m_sc[...]
    m_new = jnp.maximum(m_prev, jnp.max(s, axis=-1, keepdims=True))
    alpha = jnp.exp(m_prev - m_new)
    p = jnp.exp(s - m_new)
    l_sc[...] = alpha * l_sc[...] + jnp.sum(p, axis=-1, keepdims=True)
    acc_sc[...] = alpha * acc_sc[...] + jnp.einsum(
        'hqk,hkd->hqd', p.astype(jnp.bfloat16), v,
        preferred_element_type=jnp.float32)
    m_sc[...] = m_new

    @pl.when(ki == nk - 1)
    def _finalize():
        inv_l = pl.reciprocal(l_sc[...], approx=True)        # (H, tq, 1)
        if project_out:
            tq = q_ref.shape[2]
            acc_out = jnp.zeros((tq, out_dim), jnp.float32)
            # sum_h (o_h @ Wout[h]) == concat_h(o_h) @ Wout  (head merge fused
            # into the projection; avoids an in-kernel transpose / HBM bounce).
            for h in range(heads):
                o_h = (acc_sc[h] * inv_l[h]).astype(jnp.bfloat16)   # (tq, dh)
                acc_out = acc_out + jnp.dot(
                    o_h, wout_ref[h], preferred_element_type=jnp.float32)
            out_ref[0] = (acc_out + bout_ref[...]).astype(out_ref.dtype)
        else:
            # project_out == False  =>  heads == 1 and dim_head == dim
            out_ref[0] = (acc_sc[0] * inv_l[0]).astype(out_ref.dtype)


# --------------------------------------------------------------------------
# Wrapper
# --------------------------------------------------------------------------
def pallas_attention(x, wqkv, wout=None, bout=None, *,
                     heads, dim_head, seq_block=128, q_block=128, kv_block=128):
    """x: (B, N, D) f32. wqkv: (D, 3*heads*dim_head). wout: (heads*dim_head, D).

    Weights are stored (in_features, out_features), i.e. pre-transposed
    relative to torch.nn.Linear.weight.
    """
    B, N, D = x.shape
    inner = heads * dim_head
    project_out = not (heads == 1 and dim_head == D)
    scale = dim_head ** -0.5

    # v5e note: keep tq/tk at 128-256; larger tiles are fine on v6e/v7x.
    tn = min(seq_block, N)
    tq = min(q_block, N)
    tk = min(kv_block, N)
    assert N % tn == 0 and N % tq == 0 and N % tk == 0, "N must divide the tiles"
    assert tn % 8 == 0 and tq % 8 == 0 and tk % 8 == 0, "tiles must be multiples of 8"

    wqkv_b = wqkv.astype(jnp.bfloat16)

    # ---- Kernel 1: QKV projection -------------------------------------------
    qkv_kernel = functools.partial(
        _qkv_proj_kernel, heads=heads, dim_head=dim_head, scale=scale)
    hmajor = jax.ShapeDtypeStruct((B, heads, N, dim_head), jnp.bfloat16)
    hmajor_spec = pl.BlockSpec((1, heads, tn, dim_head), lambda b, n: (b, 0, n, 0))

    q, k, v = pl.pallas_call(
        qkv_kernel,
        out_shape=(hmajor, hmajor, hmajor),
        grid=(B, N // tn),
        in_specs=[
            pl.BlockSpec((1, tn, D), lambda b, n: (b, n, 0)),
            pl.BlockSpec((D, 3 * inner), lambda b, n: (0, 0)),
        ],
        out_specs=(hmajor_spec, hmajor_spec, hmajor_spec),
        compiler_params=pltpu.CompilerParams(
            dimension_semantics=("parallel", "parallel")),
    )(x, wqkv_b)

    # ---- Kernel 2: flash attention + output projection -----------------------
    flash_kernel = functools.partial(
        _flash_attn_kernel, heads=heads, dim_head=dim_head, out_dim=D,
        project_out=project_out)

    q_spec = pl.BlockSpec((1, heads, tq, dim_head), lambda b, qi, ki: (b, 0, qi, 0))
    kv_spec = pl.BlockSpec((1, heads, tk, dim_head), lambda b, qi, ki: (b, 0, ki, 0))

    in_specs = [q_spec, kv_spec, kv_spec]
    args = [q, k, v]
    if project_out:
        wout_r = wout.astype(jnp.bfloat16).reshape(heads, dim_head, D)
        bout_r = bout.reshape(1, D).astype(jnp.float32)
        in_specs += [
            pl.BlockSpec((heads, dim_head, D), lambda b, qi, ki: (0, 0, 0)),
            pl.BlockSpec((1, D), lambda b, qi, ki: (0, 0)),
        ]
        args += [wout_r, bout_r]

    out = pl.pallas_call(
        flash_kernel,
        out_shape=jax.ShapeDtypeStruct((B, N, D), x.dtype),
        grid=(B, N // tq, N // tk),
        in_specs=in_specs,
        out_specs=pl.BlockSpec((1, tq, D), lambda b, qi, ki: (b, qi, 0)),
        scratch_shapes=[
            pltpu.VMEM((heads, tq, 1), jnp.float32),        # running max
            pltpu.VMEM((heads, tq, 1), jnp.float32),        # running denom
            pltpu.VMEM((heads, tq, dim_head), jnp.float32),  # context accum
        ],
        compiler_params=pltpu.CompilerParams(
            dimension_semantics=("parallel", "parallel", "arbitrary")),
    )(*args)
    return out


# --------------------------------------------------------------------------
# Demo / self-check
# --------------------------------------------------------------------------
if __name__ == "__main__":
    # Lane-friendly small shapes: dim and N multiples of 128, module-default
    # heads/dim_head (heads=8, dim_head=64 -> inner=512, project_out=True).
    B, N = 2, 128
    dim, heads, dim_head = 128, 8, 64
    inner = heads * dim_head

    key = jax.random.PRNGKey(0)
    kx, kq, ko, kb = jax.random.split(key, 4)
    x = jax.random.normal(kx, (B, N, dim), jnp.float32)

    def uniform(k, shape, fan_in):
        bound = 1.0 / math.sqrt(fan_in)
        return jax.random.uniform(k, shape, jnp.float32, -bound, bound)

    # Weights stored as (in, out); PyTorch-style U(-1/sqrt(fan_in), ...) init.
    wqkv = uniform(kq, (dim, 3 * inner), dim)   # to_qkv (bias=False)
    wout = uniform(ko, (inner, dim), inner)     # to_out Linear weight
    bout = uniform(kb, (dim,), inner)           # to_out Linear bias

    out = pallas_attention(x, wqkv, wout, bout, heads=heads, dim_head=dim_head)
    out = jax.block_until_ready(out)
    assert out.shape == (B, N, dim)

    # Pure-JAX f32 reference of the PyTorch forward (bf16 MXU => loose tol).
    def ref_attention(x, wqkv, wout, bout):
        qkv = x @ wqkv
        qr, kr, vr = jnp.split(qkv, 3, axis=-1)
        def split_heads(t):
            return t.reshape(B, N, heads, dim_head).transpose(0, 2, 1, 3)
        qr, kr, vr = map(split_heads, (qr, kr, vr))
        dots = jnp.einsum('bhqd,bhkd->bhqk', qr, kr) * (dim_head ** -0.5)
        attn = jax.nn.softmax(dots, axis=-1)
        o = jnp.einsum('bhqk,bhkd->bhqd', attn, vr)
        o = o.transpose(0, 2, 1, 3).reshape(B, N, inner)
        return o @ wout + bout

    ref = ref_attention(x, wqkv, wout, bout)
    max_err = float(jnp.max(jnp.abs(out - ref)))
    assert jnp.allclose(out, ref, atol=5e-2, rtol=5e-2), max_err

    print("KERNEL_OK")
</pallas_src>

<mosaic_0001>
module attributes {stable_mosaic.version = 11 : i64} {
  func.func @_qkv_proj_kernel(%arg0: i32, %arg1: i32, %arg2: memref<1x128x128xf32, #tpu.memory_space<vmem>>, %arg3: memref<128x1536xbf16, #tpu.memory_space<vmem>>, %arg4: memref<1x8x128x64xbf16, #tpu.memory_space<vmem>>, %arg5: memref<1x8x128x64xbf16, #tpu.memory_space<vmem>>, %arg6: memref<1x8x128x64xbf16, #tpu.memory_space<vmem>>) attributes {dimension_semantics = [#tpu.dimension_semantics<parallel>, #tpu.dimension_semantics<parallel>], iteration_bounds = array<i64: 2, 1>, scalar_prefetch = 0 : i64, scratch_operands = 0 : i64, tpu.core_type = #tpu.core_type<tc>, window_params = [{transform_indices = @transform_0, window_bounds = array<i64: 1, 128, 128>}, {pipeline_mode = #tpu.pipeline_mode<synchronous>, transform_indices = @transform_1, window_bounds = array<i64: 128, 1536>}, {transform_indices = @transform_2, window_bounds = array<i64: 1, 8, 128, 64>}, {transform_indices = @transform_3, window_bounds = array<i64: 1, 8, 128, 64>}, {transform_indices = @transform_4, window_bounds = array<i64: 1, 8, 128, 64>}]} {
    %c0 = arith.constant 0 : index
    %c0_0 = arith.constant 0 : index
    %c0_1 = arith.constant 0 : index
    %0 = vector.load %arg2[%c0, %c0_0, %c0_1] : memref<1x128x128xf32, #tpu.memory_space<vmem>>, vector<1x128x128xf32>
    %1 = vector.shape_cast %0 : vector<1x128x128xf32> to vector<128x128xf32>
    %2 = arith.truncf %1 : vector<128x128xf32> to vector<128x128xbf16>
    %c0_2 = arith.constant 0 : index
    %c0_3 = arith.constant 0 : index
    %3 = vector.load %arg3[%c0_2, %c0_3] : memref<128x1536xbf16, #tpu.memory_space<vmem>>, vector<128x1536xbf16>
    %cst = arith.constant dense<0.000000e+00> : vector<128x1536xf32>
    %4 = tpu.matmul %2, %3, %cst {dimension_numbers = #tpu.dot_dimension_numbers<[1], [0], [0], [1], [0, 0, 1, 1], [], []>} : vector<128x128xbf16>, vector<128x1536xbf16>, vector<128x1536xf32> -> vector<128x1536xf32>
    %5 = vector.extract_strided_slice %4 {offsets = [0, 0], sizes = [128, 64], strides = [1, 1]} : vector<128x1536xf32> to vector<128x64xf32>
    %cst_4 = arith.constant 1.250000e-01 : f32
    %6 = vector.broadcast %cst_4 : f32 to vector<128x64xf32>
    %7 = arith.mulf %5, %6 : vector<128x64xf32>
    %8 = arith.truncf %7 : vector<128x64xf32> to vector<128x64xbf16>
    %c0_5 = arith.constant 0 : index
    %c0_6 = arith.constant 0 : index
    %c0_7 = arith.constant 0 : index
    %c0_8 = arith.constant 0 : index
    %9 = vector.load %arg4[%c0_5, %c0_6, %c0_7, %c0_8] : memref<1x8x128x64xbf16, #tpu.memory_space<vmem>>, vector<1x1x128x64xbf16>
    %10 = vector.shape_cast %9 : vector<1x1x128x64xbf16> to vector<128x64xbf16>
    %11 = vector.shape_cast %8 : vector<128x64xbf16> to vector<1x1x128x64xbf16>
    tpu.vector_store %arg4[%c0_5, %c0_6, %c0_7, %c0_8], %11 {strides = array<i32>} : memref<1x8x128x64xbf16, #tpu.memory_space<vmem>>, vector<1x1x128x64xbf16>,
    %12 = vector.extract_strided_slice %4 {offsets = [0, 512], sizes = [128, 64], strides = [1, 1]} : vector<128x1536xf32> to vector<128x64xf32>
    %13 = arith.truncf %12 : vector<128x64xf32> to vector<128x64xbf16>
    %c0_9 = arith.constant 0 : index
    %c0_10 = arith.constant 0 : index
    %c0_11 = arith.constant 0 : index
    %c0_12 = arith.constant 0 : index
    %14 = vector.load %arg5[%c0_9, %c0_10, %c0_11, %c0_12] : memref<1x8x128x64xbf16, #tpu.memory_space<vmem>>, vector<1x1x128x64xbf16>
    %15 = vector.shape_cast %14 : vector<1x1x128x64xbf16> to vector<128x64xbf16>
    %16 = vector.shape_cast %13 : vector<128x64xbf16> to vector<1x1x128x64xbf16>
    tpu.vector_store %arg5[%c0_9, %c0_10, %c0_11, %c0_12], %16 {strides = array<i32>} : memref<1x8x128x64xbf16, #tpu.memory_space<vmem>>, vector<1x1x128x64xbf16>,
    %17 = vector.extract_strided_slice %4 {offsets = [0, 1024], sizes = [128, 64], strides = [1, 1]} : vector<128x1536xf32> to vector<128x64xf32>
    %18 = arith.truncf %17 : vector<128x64xf32> to vector<128x64xbf16>
    %c0_13 = arith.constant 0 : index
    %c0_14 = arith.constant 0 : index
    %c0_15 = arith.constant 0 : index
    %c0_16 = arith.constant 0 : index
    %19 = vector.load %arg6[%c0_13, %c0_14, %c0_15, %c0_16] : memref<1x8x128x64xbf16, #tpu.memory_space<vmem>>, vector<1x1x128x64xbf16>
    %20 = vector.shape_cast %19 : vector<1x1x128x64xbf16> to vector<128x64xbf16>
    %21 = vector.shape_cast %18 : vector<128x64xbf16> to vector<1x1x128x64xbf16>
    tpu.vector_store %arg6[%c0_13, %c0_14, %c0_15, %c0_16], %21 {strides = array<i32>} : memref<1x8x128x64xbf16, #tpu.memory_space<vmem>>, vector<1x1x128x64xbf16>,
    %22 = vector.extract_strided_slice %4 {offsets = [0, 64], sizes = [128, 64], strides = [1, 1]} : vector<128x1536xf32> to vector<128x64xf32>
    %cst_17 = arith.constant 1.250000e-01 : f32
    %23 = vector.broadcast %cst_17 : f32 to vector<128x64xf32>
    %24 = arith.mulf %22, %23 : vector<128x64xf32>
    %25 = arith.truncf %24 : vector<128x64xf32> to vector<128x64xbf16>
    %c0_18 = arith.constant 0 : index
    %c1 = arith.constant 1 : index
    %c0_19 = arith.constant 0 : index
    %c0_20 = arith.constant 0 : index
    %26 = vector.load %arg4[%c0_18, %c1, %c0_19, %c0_20] : memref<1x8x128x64xbf16, #tpu.memory_space<vmem>>, vector<1x1x128x64xbf16>
    %27 = vector.shape_cast %26 : vector<1x1x128x64xbf16> to vector<128x64xbf16>
    %28 = vector.shape_cast %25 : vector<128x64xbf16> to vector<1x1x128x64xbf16>
    tpu.vector_store %arg4[%c0_18, %c1, %c0_19, %c0_20], %28 {strides = array<i32>} : memref<1x8x128x64xbf16, #tpu.memory_space<vmem>>, vector<1x1x128x64xbf16>,
    %29 = vector.extract_strided_slice %4 {offsets = [0, 576], sizes = [128, 64], strides = [1, 1]} : vector<128x1536xf32> to vector<128x64xf32>
    %30 = arith.truncf %29 : vector<128x64xf32> to vector<128x64xbf16>
    %c0_21 = arith.constant 0 : index
    %c1_22 = arith.constant 1 : index
    %c0_23 = arith.constant 0 : index
    %c0_24 = arith.constant 0 : index
    %31 = vector.load %arg5[%c0_21, %c1_22, %c0_23, %c0_24] : memref<1x8x128x64xbf16, #tpu.memory_space<vmem>>, vector<1x1x128x64xbf16>
    %32 = vector.shape_cast %31 : vector<1x1x128x64xbf16> to vector<128x64xbf16>
    %33 = vector.shape_cast %30 : vector<128x64xbf16> to vector<1x1x128x64xbf16>
    tpu.vector_store %arg5[%c0_21, %c1_22, %c0_23, %c0_24], %33 {strides = array<i32>} : memref<1x8x128x64xbf16, #tpu.memory_space<vmem>>, vector<1x1x128x64xbf16>,
    %34 = vector.extract_strided_slice %4 {offsets = [0, 1088], sizes = [128, 64], strides = [1, 1]} : vector<128x1536xf32> to vector<128x64xf32>
    %35 = arith.truncf %34 : vector<128x64xf32> to vector<128x64xbf16>
    %c0_25 = arith.constant 0 : index
    %c1_26 = arith.constant 1 : index
    %c0_27 = arith.constant 0 : index
    %c0_28 = arith.constant 0 : index
    %36 = vector.load %arg6[%c0_25, %c1_26, %c0_27, %c0_28] : memref<1x8x128x64xbf16, #tpu.memory_space<vmem>>, vector<1x1x128x64xbf16>
    %37 = vector.shape_cast %36 : vector<1x1x128x64xbf16> to vector<128x64xbf16>
    %38 = vector.shape_cast %35 : vector<128x64xbf16> to vector<1x1x128x64xbf16>
    tpu.vector_store %arg6[%c0_25, %c1_26, %c0_27, %c0_28], %38 {strides = array<i32>} : memref<1x8x128x64xbf16, #tpu.memory_space<vmem>>, vector<1x1x128x64xbf16>,
    %39 = vector.extract_strided_slice %4 {offsets = [0, 128], sizes = [128, 64], strides = [1, 1]} : vector<128x1536xf32> to vector<128x64xf32>
    %cst_29 = arith.constant 1.250000e-01 : f32
    %40 = vector.broadcast %cst_29 : f32 to vector<128x64xf32>
    %41 = arith.mulf %39, %40 : vector<128x64xf32>
    %42 = arith.truncf %41 : vector<128x64xf32> to vector<128x64xbf16>
    %c0_30 = arith.constant 0 : index
    %c2 = arith.constant 2 : index
    %c0_31 = arith.constant 0 : index
    %c0_32 = arith.constant 0 : index
    %43 = vector.load %arg4[%c0_30, %c2, %c0_31, %c0_32] : memref<1x8x128x64xbf16, #tpu.memory_space<vmem>>, vector<1x1x128x64xbf16>
    %44 = vector.shape_cast %43 : vector<1x1x128x64xbf16> to vector<128x64xbf16>
    %45 = vector.shape_cast %42 : vector<128x64xbf16> to vector<1x1x128x64xbf16>
    tpu.vector_store %arg4[%c0_30, %c2, %c0_31, %c0_32], %45 {strides = array<i32>} : memref<1x8x128x64xbf16, #tpu.memory_space<vmem>>, vector<1x1x128x64xbf16>,
    %46 = vector.extract_strided_slice %4 {offsets = [0, 640], sizes = [128, 64], strides = [1, 1]} : vector<128x1536xf32> to vector<128x64xf32>
    %47 = arith.truncf %46 : vector<128x64xf32> to vector<128x64xbf16>
    %c0_33 = arith.constant 0 : index
    %c2_34 = arith.constant 2 : index
    %c0_35 = arith.constant 0 : index
    %c0_36 = arith.constant 0 : index
    %48 = vector.load %arg5[%c0_33, %c2_34, %c0_35, %c0_36] : memref<1x8x128x64xbf16, #tpu.memory_space<vmem>>, vector<1x1x128x64xbf16>
    %49 = vector.shape_cast %48 : vector<1x1x128x64xbf16> to vector<128x64xbf16>
    %50 = vector.shape_cast %47 : vector<128x64xbf16> to vector<1x1x128x64xbf16>
    tpu.vector_store %arg5[%c0_33, %c2_34, %c0_35, %c0_36], %50 {strides = array<i32>} : memref<1x8x128x64xbf16, #tpu.memory_space<vmem>>, vector<1x1x128x64xbf16>,
    %51 = vector.extract_strided_slice %4 {offsets = [0, 1152], sizes = [128, 64], strides = [1, 1]} : vector<128x1536xf32> to vector<128x64xf32>
    %52 = arith.truncf %51 : vector<128x64xf32> to vector<128x64xbf16>
    %c0_37 = arith.constant 0 : index
    %c2_38 = arith.constant 2 : index
    %c0_39 = arith.constant 0 : index
    %c0_40 = arith.constant 0 : index
    %53 = vector.load %arg6[%c0_37, %c2_38, %c0_39, %c0_40] : memref<1x8x128x64xbf16, #tpu.memory_space<vmem>>, vector<1x1x128x64xbf16>
    %54 = vector.shape_cast %53 : vector<1x1x128x64xbf16> to vector<128x64xbf16>
    %55 = vector.shape_cast %52 : vector<128x64xbf16> to vector<1x1x128x64xbf16>
    tpu.vector_store %arg6[%c0_37, %c2_38, %c0_39, %c0_40], %55 {strides = array<i32>} : memref<1x8x128x64xbf16, #tpu.memory_space<vmem>>, vector<1x1x128x64xbf16>,
    %56 = vector.extract_strided_slice %4 {offsets = [0, 192], sizes = [128, 64], strides = [1, 1]} : vector<128x1536xf32> to vector<128x64xf32>
    %cst_41 = arith.constant 1.250000e-01 : f32
    %57 = vector.broadcast %cst_41 : f32 to vector<128x64xf32>
    %58 = arith.mulf %56, %57 : vector<128x64xf32>
    %59 = arith.truncf %58 : vector<128x64xf32> to vector<128x64xbf16>
    %c0_42 = arith.constant 0 : index
    %c3 = arith.constant 3 : index
    %c0_43 = arith.constant 0 : index
    %c0_44 = arith.constant 0 : index
    %60 = vector.load %arg4[%c0_42, %c3, %c0_43, %c0_44] : memref<1x8x128x64xbf16, #tpu.memory_space<vmem>>, vector<1x1x128x64xbf16>
    %61 = vector.shape_cast %60 : vector<1x1x128x64xbf16> to vector<128x64xbf16>
    %62 = vector.shape_cast %59 : vector<128x64xbf16> to vector<1x1x128x64xbf16>
    tpu.vector_store %arg4[%c0_42, %c3, %c0_43, %c0_44], %62 {strides = array<i32>} : memref<1x8x128x64xbf16, #tpu.memory_space<vmem>>, vector<1x1x128x64xbf16>,
    %63 = vector.extract_strided_slice %4 {offsets = [0, 704], sizes = [128, 64], strides = [1, 1]} : vector<128x1536xf32> to vector<128x64xf32>
    %64 = arith.truncf %63 : vector<128x64xf32> to vector<128x64xbf16>
    %c0_45 = arith.constant 0 : index
    %c3_46 = arith.constant 3 : index
    %c0_47 = arith.constant 0 : index
    %c0_48 = arith.constant 0 : index
    %65 = vector.load %arg5[%c0_45, %c3_46, %c0_47, %c0_48] : memref<1x8x128x64xbf16, #tpu.memory_space<vmem>>, vector<1x1x128x64xbf16>
    %66 = vector.shape_cast %65 : vector<1x1x128x64xbf16> to vector<128x64xbf16>
    %67 = vector.shape_cast %64 : vector<128x64xbf16> to vector<1x1x128x64xbf16>
    tpu.vector_store %arg5[%c0_45, %c3_46, %c0_47, %c0_48], %67 {strides = array<i32>} : memref<1x8x128x64xbf16, #tpu.memory_space<vmem>>, vector<1x1x128x64xbf16>,
    %68 = vector.extract_strided_slice %4 {offsets = [0, 1216], sizes = [128, 64], strides = [1, 1]} : vector<128x1536xf32> to vector<128x64xf32>
    %69 = arith.truncf %68 : vector<128x64xf32> to vector<128x64xbf16>
    %c0_49 = arith.constant 0 : index
    %c3_50 = arith.constant 3 : index
    %c0_51 = arith.constant 0 : index
    %c0_52 = arith.constant 0 : index
    %70 = vector.load %arg6[%c0_49, %c3_50, %c0_51, %c0_52] : memref<1x8x128x64xbf16, #tpu.memory_space<vmem>>, vector<1x1x128x64xbf16>
    %71 = vector.shape_cast %70 : vector<1x1x128x64xbf16> to vector<128x64xbf16>
    %72 = vector.shape_cast %69 : vector<128x64xbf16> to vector<1x1x128x64xbf16>
    tpu.vector_store %arg6[%c0_49, %c3_50, %c0_51, %c0_52], %72 {strides = array<i32>} : memref<1x8x128x64xbf16, #tpu.memory_space<vmem>>, vector<1x1x128x64xbf16>,
    %73 = vector.extract_strided_slice %4 {offsets = [0, 256], sizes = [128, 64], strides = [1, 1]} : vector<128x1536xf32> to vector<128x64xf32>
    %cst_53 = arith.constant 1.250000e-01 : f32
    %74 = vector.broadcast %cst_53 : f32 to vector<128x64xf32>
    %75 = arith.mulf %73, %74 : vector<128x64xf32>
    %76 = arith.truncf %75 : vector<128x64xf32> to vector<128x64xbf16>
    %c0_54 = arith.constant 0 : index
    %c4 = arith.constant 4 : index
    %c0_55 = arith.constant 0 : index
    %c0_56 = arith.constant 0 : index
    %77 = vector.load %arg4[%c0_54, %c4, %c0_55, %c0_56] : memref<1x8x128x64xbf16, #tpu.memory_space<vmem>>, vector<1x1x128x64xbf16>
    %78 = vector.shape_cast %77 : vector<1x1x128x64xbf16> to vector<128x64xbf16>
    %79 = vector.shape_cast %76 : vector<128x64xbf16> to vector<1x1x128x64xbf16>
    tpu.vector_store %arg4[%c0_54, %c4, %c0_55, %c0_56], %79 {strides = array<i32>} : memref<1x8x128x64xbf16, #tpu.memory_space<vmem>>, vector<1x1x128x64xbf16>,
    %80 = vector.extract_strided_slice %4 {offsets = [0, 768], sizes = [128, 64], strides = [1, 1]} : vector<128x1536xf32> to vector<128x64xf32>
    %81 = arith.truncf %80 : vector<128x64xf32> to vector<128x64xbf16>
    %c0_57 = arith.constant 0 : index
    %c4_58 = arith.constant 4 : index
    %c0_59 = arith.constant 0 : index
    %c0_60 = arith.constant 0 : index
    %82 = vector.load %arg5[%c0_57, %c4_58, %c0_59, %c0_60] : memref<1x8x128x64xbf16, #tpu.memory_space<vmem>>, vector<1x1x128x64xbf16>
    %83 = vector.shape_cast %82 : vector<1x1x128x64xbf16> to vector<128x64xbf16>
    %84 = vector.shape_cast %81 : vector<128x64xbf16> to vector<1x1x128x64xbf16>
    tpu.vector_store %arg5[%c0_57, %c4_58, %c0_59, %c0_60], %84 {strides = array<i32>} : memref<1x8x128x64xbf16, #tpu.memory_space<vmem>>, vector<1x1x128x64xbf16>,
    %85 = vector.extract_strided_slice %4 {offsets = [0, 1280], sizes = [128, 64], strides = [1, 1]} : vector<128x1536xf32> to vector<128x64xf32>
    %86 = arith.truncf %85 : vector<128x64xf32> to vector<128x64xbf16>
    %c0_61 = arith.constant 0 : index
    %c4_62 = arith.constant 4 : index
    %c0_63 = arith.constant 0 : index
    %c0_64 = arith.constant 0 : index
    %87 = vector.load %arg6[%c0_61, %c4_62, %c0_63, %c0_64] : memref<1x8x128x64xbf16, #tpu.memory_space<vmem>>, vector<1x1x128x64xbf16>
    %88 = vector.shape_cast %87 : vector<1x1x128x64xbf16> to vector<128x64xbf16>
    %89 = vector.shape_cast %86 : vector<128x64xbf16> to vector<1x1x128x64xbf16>
    tpu.vector_store %arg6[%c0_61, %c4_62, %c0_63, %c0_64], %89 {strides = array<i32>} : memref<1x8x128x64xbf16, #tpu.memory_space<vmem>>, vector<1x1x128x64xbf16>,
    %90 = vector.extract_strided_slice %4 {offsets = [0, 320], sizes = [128, 64], strides = [1, 1]} : vector<128x1536xf32> to vector<128x64xf32>
    %cst_65 = arith.constant 1.250000e-01 : f32
    %91 = vector.broadcast %cst_65 : f32 to vector<128x64xf32>
    %92 = arith.mulf %90, %91 : vector<128x64xf32>
    %93 = arith.truncf %92 : vector<128x64xf32> to vector<128x64xbf16>
    %c0_66 = arith.constant 0 : index
    %c5 = arith.constant 5 : index
    %c0_67 = arith.constant 0 : index
    %c0_68 = arith.constant 0 : index
    %94 = vector.load %arg4[%c0_66, %c5, %c0_67, %c0_68] : memref<1x8x128x64xbf16, #tpu.memory_space<vmem>>, vector<1x1x128x64xbf16>
    %95 = vector.shape_cast %94 : vector<1x1x128x64xbf16> to vector<128x64xbf16>
    %96 = vector.shape_cast %93 : vector<128x64xbf16> to vector<1x1x128x64xbf16>
    tpu.vector_store %arg4[%c0_66, %c5, %c0_67, %c0_68], %96 {strides = array<i32>} : memref<1x8x128x64xbf16, #tpu.memory_space<vmem>>, vector<1x1x128x64xbf16>,
    %97 = vector.extract_strided_slice %4 {offsets = [0, 832], sizes = [128, 64], strides = [1, 1]} : vector<128x1536xf32> to vector<128x64xf32>
    %98 = arith.truncf %97 : vector<128x64xf32> to vector<128x64xbf16>
    %c0_69 = arith.constant 0 : index
    %c5_70 = arith.constant 5 : index
    %c0_71 = arith.constant 0 : index
    %c0_72 = arith.constant 0 : index
    %99 = vector.load %arg5[%c0_69, %c5_70, %c0_71, %c0_72] : memref<1x8x128x64xbf16, #tpu.memory_space<vmem>>, vector<1x1x128x64xbf16>
    %100 = vector.shape_cast %99 : vector<1x1x128x64xbf16> to vector<128x64xbf16>
    %101 = vector.shape_cast %98 : vector<128x64xbf16> to vector<1x1x128x64xbf16>
    tpu.vector_store %arg5[%c0_69, %c5_70, %c0_71, %c0_72], %101 {strides = array<i32>} : memref<1x8x128x64xbf16, #tpu.memory_space<vmem>>, vector<1x1x128x64xbf16>,
    %102 = vector.extract_strided_slice %4 {offsets = [0, 1344], sizes = [128, 64], strides = [1, 1]} : vector<128x1536xf32> to vector<128x64xf32>
    %103 = arith.truncf %102 : vector<128x64xf32> to vector<128x64xbf16>
    %c0_73 = arith.constant 0 : index
    %c5_74 = arith.constant 5 : index
    %c0_75 = arith.constant 0 : index
    %c0_76 = arith.constant 0 : index
    %104 = vector.load %arg6[%c0_73, %c5_74, %c0_75, %c0_76] : memref<1x8x128x64xbf16, #tpu.memory_space<vmem>>, vector<1x1x128x64xbf16>
    %105 = vector.shape_cast %104 : vector<1x1x128x64xbf16> to vector<128x64xbf16>
    %106 = vector.shape_cast %103 : vector<128x64xbf16> to vector<1x1x128x64xbf16>
    tpu.vector_store %arg6[%c0_73, %c5_74, %c0_75, %c0_76], %106 {strides = array<i32>} : memref<1x8x128x64xbf16, #tpu.memory_space<vmem>>, vector<1x1x128x64xbf16>,
    %107 = vector.extract_strided_slice %4 {offsets = [0, 384], sizes = [128, 64], strides = [1, 1]} : vector<128x1536xf32> to vector<128x64xf32>
    %cst_77 = arith.constant 1.250000e-01 : f32
    %108 = vector.broadcast %cst_77 : f32 to vector<128x64xf32>
    %109 = arith.mulf %107, %108 : vector<128x64xf32>
    %110 = arith.truncf %109 : vector<128x64xf32> to vector<128x64xbf16>
    %c0_78 = arith.constant 0 : index
    %c6 = arith.constant 6 : index
    %c0_79 = arith.constant 0 : index
    %c0_80 = arith.constant 0 : index
    %111 = vector.load %arg4[%c0_78, %c6, %c0_79, %c0_80] : memref<1x8x128x64xbf16, #tpu.memory_space<vmem>>, vector<1x1x128x64xbf16>
    %112 = vector.shape_cast %111 : vector<1x1x128x64xbf16> to vector<128x64xbf16>
    %113 = vector.shape_cast %110 : vector<128x64xbf16> to vector<1x1x128x64xbf16>
    tpu.vector_store %arg4[%c0_78, %c6, %c0_79, %c0_80], %113 {strides = array<i32>} : memref<1x8x128x64xbf16, #tpu.memory_space<vmem>>, vector<1x1x128x64xbf16>,
    %114 = vector.extract_strided_slice %4 {offsets = [0, 896], sizes = [128, 64], strides = [1, 1]} : vector<128x1536xf32> to vector<128x64xf32>
    %115 = arith.truncf %114 : vector<128x64xf32> to vector<128x64xbf16>
    %c0_81 = arith.constant 0 : index
    %c6_82 = arith.constant 6 : index
    %c0_83 = arith.constant 0 : index
    %c0_84 = arith.constant 0 : index
    %116 = vector.load %arg5[%c0_81, %c6_82, %c0_83, %c0_84] : memref<1x8x128x64xbf16, #tpu.memory_space<vmem>>, vector<1x1x128x64xbf16>
    %117 = vector.shape_cast %116 : vector<1x1x128x64xbf16> to vector<128x64xbf16>
    %118 = vector.shape_cast %115 : vector<128x64xbf16> to vector<1x1x128x64xbf16>
    tpu.vector_store %arg5[%c0_81, %c6_82, %c0_83, %c0_84], %118 {strides = array<i32>} : memref<1x8x128x64xbf16, #tpu.memory_space<vmem>>, vector<1x1x128x64xbf16>,
    %119 = vector.extract_strided_slice %4 {offsets = [0, 1408], sizes = [128, 64], strides = [1, 1]} : vector<128x1536xf32> to vector<128x64xf32>
    %120 = arith.truncf %119 : vector<128x64xf32> to vector<128x64xbf16>
    %c0_85 = arith.constant 0 : index
    %c6_86 = arith.constant 6 : index
    %c0_87 = arith.constant 0 : index
    %c0_88 = arith.constant 0 : index
    %121 = vector.load %arg6[%c0_85, %c6_86, %c0_87, %c0_88] : memref<1x8x128x64xbf16, #tpu.memory_space<vmem>>, vector<1x1x128x64xbf16>
    %122 = vector.shape_cast %121 : vector<1x1x128x64xbf16> to vector<128x64xbf16>
    %123 = vector.shape_cast %120 : vector<128x64xbf16> to vector<1x1x128x64xbf16>
    tpu.vector_store %arg6[%c0_85, %c6_86, %c0_87, %c0_88], %123 {strides = array<i32>} : memref<1x8x128x64xbf16, #tpu.memory_space<vmem>>, vector<1x1x128x64xbf16>,
    %124 = vector.extract_strided_slice %4 {offsets = [0, 448], sizes = [128, 64], strides = [1, 1]} : vector<128x1536xf32> to vector<128x64xf32>
    %cst_89 = arith.constant 1.250000e-01 : f32
    %125 = vector.broadcast %cst_89 : f32 to vector<128x64xf32>
    %126 = arith.mulf %124, %125 : vector<128x64xf32>
    %127 = arith.truncf %126 : vector<128x64xf32> to vector<128x64xbf16>
    %c0_90 = arith.constant 0 : index
    %c7 = arith.constant 7 : index
    %c0_91 = arith.constant 0 : index
    %c0_92 = arith.constant 0 : index
    %128 = vector.load %arg4[%c0_90, %c7, %c0_91, %c0_92] : memref<1x8x128x64xbf16, #tpu.memory_space<vmem>>, vector<1x1x128x64xbf16>
    %129 = vector.shape_cast %128 : vector<1x1x128x64xbf16> to vector<128x64xbf16>
    %130 = vector.shape_cast %127 : vector<128x64xbf16> to vector<1x1x128x64xbf16>
    tpu.vector_store %arg4[%c0_90, %c7, %c0_91, %c0_92], %130 {strides = array<i32>} : memref<1x8x128x64xbf16, #tpu.memory_space<vmem>>, vector<1x1x128x64xbf16>,
    %131 = vector.extract_strided_slice %4 {offsets = [0, 960], sizes = [128, 64], strides = [1, 1]} : vector<128x1536xf32> to vector<128x64xf32>
    %132 = arith.truncf %131 : vector<128x64xf32> to vector<128x64xbf16>
    %c0_93 = arith.constant 0 : index
    %c7_94 = arith.constant 7 : index
    %c0_95 = arith.constant 0 : index
    %c0_96 = arith.constant 0 : index
    %133 = vector.load %arg5[%c0_93, %c7_94, %c0_95, %c0_96] : memref<1x8x128x64xbf16, #tpu.memory_space<vmem>>, vector<1x1x128x64xbf16>
    %134 = vector.shape_cast %133 : vector<1x1x128x64xbf16> to vector<128x64xbf16>
    %135 = vector.shape_cast %132 : vector<128x64xbf16> to vector<1x1x128x64xbf16>
    tpu.vector_store %arg5[%c0_93, %c7_94, %c0_95, %c0_96], %135 {strides = array<i32>} : memref<1x8x128x64xbf16, #tpu.memory_space<vmem>>, vector<1x1x128x64xbf16>,
    %136 = vector.extract_strided_slice %4 {offsets = [0, 1472], sizes = [128, 64], strides = [1, 1]} : vector<128x1536xf32> to vector<128x64xf32>
    %137 = arith.truncf %136 : vector<128x64xf32> to vector<128x64xbf16>
    %c0_97 = arith.constant 0 : index
    %c7_98 = arith.constant 7 : index
    %c0_99 = arith.constant 0 : index
    %c0_100 = arith.constant 0 : index
    %138 = vector.load %arg6[%c0_97, %c7_98, %c0_99, %c0_100] : memref<1x8x128x64xbf16, #tpu.memory_space<vmem>>, vector<1x1x128x64xbf16>
    %139 = vector.shape_cast %138 : vector<1x1x128x64xbf16> to vector<128x64xbf16>
    %140 = vector.shape_cast %137 : vector<128x64xbf16> to vector<1x1x128x64xbf16>
    tpu.vector_store %arg6[%c0_97, %c7_98, %c0_99, %c0_100], %140 {strides = array<i32>} : memref<1x8x128x64xbf16, #tpu.memory_space<vmem>>, vector<1x1x128x64xbf16>,
    return
  }
  func.func @transform_0(%arg0: i32, %arg1: i32) -> (i32, i32, i32) {
    %c0_i32 = arith.constant 0 : i32
    %c0_i32_0 = arith.constant 0 : i32
    return %arg0, %arg1, %c0_i32 : i32, i32, i32
  }
  func.func @transform_1(%arg0: i32, %arg1: i32) -> (i32, i32) {
    %c0_i32 = arith.constant 0 : i32
    %c0_i32_0 = arith.constant 0 : i32
    %c0_i32_1 = arith.constant 0 : i32
    return %c0_i32, %c0_i32_0 : i32, i32
  }
  func.func @transform_2(%arg0: i32, %arg1: i32) -> (i32, i32, i32, i32) {
    %c0_i32 = arith.constant 0 : i32
    %c0_i32_0 = arith.constant 0 : i32
    %c0_i32_1 = arith.constant 0 : i32
    return %arg0, %c0_i32, %arg1, %c0_i32_0 : i32, i32, i32, i32
  }
  func.func @transform_3(%arg0: i32, %arg1: i32) -> (i32, i32, i32, i32) {
    %c0_i32 = arith.constant 0 : i32
    %c0_i32_0 = arith.constant 0 : i32
    %c0_i32_1 = arith.constant 0 : i32
    return %arg0, %c0_i32, %arg1, %c0_i32_0 : i32, i32, i32, i32
  }
  func.func @transform_4(%arg0: i32, %arg1: i32) -> (i32, i32, i32, i32) {
    %c0_i32 = arith.constant 0 : i32
    %c0_i32_0 = arith.constant 0 : i32
    %c0_i32_1 = arith.constant 0 : i32
    return %arg0, %c0_i32, %arg1, %c0_i32_0 : i32, i32, i32, i32
  }
}

</mosaic_0001>

<bundles_post_ra>
// kernel: tpu_custom_call.1
= control target key start
LH: loop header
LB: loop body
LE: loop exit
PB: predicated region body
PF: predicated region fallthrough
CT: control target
= control target key end

     0   :  { %10 = vsyncpa [#allocation3], 0  ;;  %s6752_s0 = inlined_call_operand.hbm [shape: f32[2,128,128], index: 0, kind: input, shape index: {}]   ;;  %s6753_s1 = inlined_call_operand.hbm [shape: bf16[128,1536], index: 1, kind: input, shape index: {}]   ;;  %s6754_s2 = inlined_call_operand.vmem [shape: bf16[2,8,128,64], index: 2, kind: output, shape index: {0}]   ;;  %s6755_s3 = inlined_call_operand.vmem [shape: bf16[2,8,128,64], index: 3, kind: output, shape index: {1}]   ;;  %s6756_s4 = inlined_call_operand.vmem [shape: bf16[2,8,128,64], index: 4, kind: output, shape index: {2}]  }
   0x1   :  { %12 = vsyncpa [#allocation3 + $0x1], 0 }
   0x2   :  { %13 = vsyncpa [#allocation5], 0  ;;  %s4804_s15 = smov 0   ;;  %s4806_s16 = smov 0  }
   0x3   :  { %s4808_s17 = smov 0   ;;  %s4810_s18 = smov 0  }
   0x4   :  { %s4812_s19 = smov 0   ;;  %s4814_s20 = smov 0  }
   0x5 LB: > { %s3606_s21 = sadd.s32 4294967295, %s4769_s20   ;;  %p53_p0 = scmp.ne.s32.totalorder %s4753_s16, %s4749_s15  ;;  %s4769_s20 = sphi %s4814_s20, %s19_s20   ;;  %s4765_s19 = sphi %s4812_s19, %s6826_s19   ;;  %s4761_s18 = sphi %s4810_s18, %s6825_s18   ;;  %s4757_s17 = sphi %s4808_s17, %s6824_s17   ;;  %s4753_s16 = sphi %s4806_s16, %s6823_s16   ;;  %s4749_s15 = sphi %s4804_s15, %s6822_s15  }
   0x6   : > { %p4834_p1 = scmp.eq.s32.totalorder %s3606_s21, 0  ;;  %p3608_p2 = scmp.ge.s32.totalorder %s4769_s20, 1 }
   0x7   : > { %p169_p3 = scmp.lt.s32.totalorder %s4769_s20, 3  ;;  %s4771_s25 = smov [#allocation4]  }
   0x8   : > { %p4842_p4 = por %p4834_p1, %p53_p0  ;;  %s181_s26 = sshll.u32 %s4771_s25, 4  ;;  %s182_s26 = int_to_ptr.vmem [resolvable:$true] %s181_s26 }
   0x9   : > { %p4846_p5 = pnand %p3608_p2, %p169_p3  ;;  %s31_s28 = sadd.s32 1, %s4765_s19 }
   0xa   : > { %s4672_s29 = scalar_lea.vmem %s182_s26, 12288  ;;  %p4680_p12 = scmp.lt.s32.totalorder %s182_s26, %s182_s26 }
   0xb   : > { %p4451_p6 = pneg %p4846_p5  ;;  %p4673_p9 = scmp.ne.s32.totalorder %s182_s26, %s4672_s29 }
   0xc   : > { %p4681_p13 = scmp.lt.s32.totalorder %s4672_s29, %s4672_s29 }
   0xd   : > { %p4854_p7 = pnand %p4451_p6, %p4834_p1 }
   0xe   : > { %p4682_p0 = por %p4681_p13, %p4680_p12 }
   0xf   : > { %p4663_p8 = pneg %p4854_p7 }
  0x11   : > { %p4675_p10 = pnand %p4673_p9, %p4663_p8 }
  0x13   : > { %p4676_p11 = pneg %p4675_p10 }
  0x15   : > { %p4683_p2 = pnand %p4682_p0, %p4676_p11 }
  0x17   : > { %4686 = shalt.err (!%p4683_p2)
}
  0x18   : > { %s4772_s30 = smov 768   ;;  %s4773_s5 = smov 48  }
  0x19   : > { %4454 = dma.hbm_to_vmem [thread:$0]  (!%p4854_p7), %s6753_s1, 12288, %s182_s26, [#allocation5], %s4772_s30, %s4772_s30, %s4773_s5  }
  0x1a   : > { %p33_p3 = scmp.ge.s32.totalorder %s31_s28, 2  ;;  %s40_s8 = sadd.s32 1, %s4757_s17 }
  0x1b   : > { %p47_p6 = scmp.ne.s32.totalorder %s4757_s17, %s4753_s16  ;;  %p48_p8 = scmp.eq.s32.totalorder %s4769_s20, 0 }
  0x1c   : > { %s6828_s28 = smov (%p33_p3, %s31_s28), 0  ;;  %p4460_p10 = scmp.lt.s32.totalorder %s4769_s20, 2 }
  0x1d   : > { %p49_p9 = por %p48_p8, %p47_p6  ;;  %s35_s9 = ssub.s32 %s4765_s19, %s6828_s28 }
  0x1e   : > { %s195_s10 = sand.u32 1, %s4757_s17   ;;  %p38_p11 = scmp.eq.s32.totalorder %s35_s9, 0 }
  0x1f   : > { %s3611_s11 = sshll.u32 %s195_s10, 7  ;;  %s4249_s12 = sshll.u32 %s4765_s19, 11 }
  0x20   : > { %s4878_s13 = scalar_select %p38_p11, %s4757_s17, %s40_s8  }
  0x21   : > { %s207_s21 = scalar_lea.hbm %s6752_s0, %s4249_s12  ;;  %s199_s25 = scalar_lea.vmem [#allocation2], %s3611_s11 }
  0x22   : > { %s208_s26 = sshll.u32 %s199_s25, 4  ;;  %p4883_p7 = pnand %p4460_p10, %p49_p9  ;;  %s209_s26 = int_to_ptr.vmem [resolvable:$true] %s208_s26 }
  0x23   : > { %s196_s29 = scalar_lea.sflag [#allocation3], %s195_s10  ;;  %s4700_s30 = scalar_lea.vmem %s209_s26, 2048 }
  0x24   : > { %p4689_p12 = pneg %p4883_p7  ;;  %p4701_p13 = scmp.ne.s32.totalorder %s209_s26, %s4700_s30 }
  0x25   : > { %s4774_s5 = smov [#allocation2]  }
  0x26   : > { %p4703_p0 = pnand %p4701_p13, %p4689_p12  ;;  %s4705_s6 = sshll.u32 %s4774_s5, 4  ;;  %s4706_s6 = int_to_ptr.vmem [resolvable:$false] %s4705_s6 }
  0x27   : > { %s4707_s7 = scalar_lea.vmem %s4706_s6, 4096  ;;  %p4708_p3 = scmp.lt.s32.totalorder %s209_s26, %s4706_s6 }
  0x28   : > { %p4704_p2 = pneg %p4703_p0  ;;  %p4709_p6 = scmp.lt.s32.totalorder %s4707_s7, %s4700_s30 }
  0x2a   : > { %p4710_p8 = por %p4709_p6, %p4708_p3 }
  0x2c   : > { %p4711_p9 = pnand %p4710_p8, %p4704_p2 }
  0x2e   : > { %4714 = shalt.err (!%p4711_p9)
}
  0x2f   : > { %s4775_s8 = smov 128   ;;  %s4776_s9 = smov 8  }
  0x30   : > { %4458 = dma.hbm_to_vmem [thread:$0]  (!%p4883_p7), %s207_s21, 2048, %s209_s26, %s196_s29, %s4775_s8, %s4775_s8, %s4776_s9  }
  0x31   : > { %220 = sbr.rel (%p4846_p5) target bundleno = 791 (0x317), region = 28 }
  0x36   : > { %s222_s10 = sand.u32 1, %s4753_s16  }
  0x37   : > { %s3615_s11 = sshll.u32 %s222_s10, 7  ;;  %s223_s12 = scalar_lea.sflag [#allocation3], %s222_s10 }
  0x38   : > { %s4894_s14 = scalar_lea.vmem [#allocation2], %s3615_s11 }
  0x39   : > { %4740 = dma.done.wait (%p4842_p4), %s223_s12, 2048  }
  0x3a   : > { %4742 = vsyncadd (%p4842_p4), %s223_s12, 4294965248 }
  0x3b   : > { %4744 = dma.done.wait (%p4834_p1), [#allocation5], 12288  }
  0x3c   : > { %4746 = vsyncadd (%p4834_p1), [#allocation5], 4294955008  ;;  %v4777_v0 = vmov 0   ;;  %v4517_v1 = vld [vmem:[#allocation4 + $0x2a4] ss:$48 sps:$4 sm:$0xff]   ;;  %v310_v34 = vld [vmem:[%s4894_s14 + $0x8] sm:$0xff] }
  0x3d   : > { %941 = vmatprep.mubr.bf16.mxu0 %v4777_v0  ;;  %1054 = vmatprep.mubr.bf16.mxu1 %v4777_v0  ;;  %v4519_v2 = vld [vmem:[#allocation4 + $0x2ac] ss:$48 sps:$4 sm:$0xff]   ;;  %v4521_v3 = vld [vmem:[#allocation4 + $0x2a0] ss:$48 sps:$4 sm:$0xff]   ;;  %v4522_v4 = vld [vmem:[#allocation4 + $0x2a8] ss:$48 sps:$4 sm:$0xff]  }
  0x3e   : > { %909 = vmatprep.subr.bf16.mxu0 %v4517_v1  ;;  %1022 = vmatprep.subr.bf16.mxu1 %v4519_v2  ;;  %v4523_v5 = vld [vmem:[#allocation4 + $0x244] ss:$48 sps:$4 sm:$0xff]   ;;  %v4525_v6 = vld [vmem:[#allocation4 + $0x24c] ss:$48 sps:$4 sm:$0xff]   ;;  %v4527_v7 = vld [vmem:[#allocation4 + $0x240] ss:$48 sps:$4 sm:$0xff]  }
  0x3f   : > { %910 = vmatpush1.bf16.msra.mxu0 %v4521_v3  ;;  %1023 = vmatpush1.bf16.msra.mxu1 %v4522_v4  ;;  %v4528_v8 = vld [vmem:[#allocation4 + $0x248] ss:$48 sps:$4 sm:$0xff]   ;;  %v4529_v9 = vld [vmem:[#allocation4 + $0x1e4] ss:$48 sps:$4 sm:$0xff]   ;;  %v4531_v10 = vld [vmem:[#allocation4 + $0x1ec] ss:$48 sps:$4 sm:$0xff]  }
  0x40   : > { %911 = vmatprep.subr.bf16.mxu0 %v4523_v5  ;;  %1024 = vmatprep.subr.bf16.mxu1 %v4525_v6  ;;  %v4533_v11 = vld [vmem:[#allocation4 + $0x1e0] ss:$48 sps:$4 sm:$0xff]   ;;  %v4534_v12 = vld [vmem:[#allocation4 + $0x1e8] ss:$48 sps:$4 sm:$0xff]   ;;  %v4535_v13 = vld [vmem:[#allocation4 + $0x184] ss:$48 sps:$4 sm:$0xff]  }
  0x41   : > { %v4537_v14 = vld [vmem:[#allocation4 + $0x18c] ss:$48 sps:$4 sm:$0xff]   ;;  %v4539_v15 = vld [vmem:[#allocation4 + $0x180] ss:$48 sps:$4 sm:$0xff]   ;;  %v4540_v16 = vld [vmem:[#allocation4 + $0x188] ss:$48 sps:$4 sm:$0xff]  }
  0x42   : > { %v4541_v17 = vld [vmem:[#allocation4 + $0x124] ss:$48 sps:$4 sm:$0xff]   ;;  %v4543_v18 = vld [vmem:[#allocation4 + $0x12c] ss:$48 sps:$4 sm:$0xff]   ;;  %v4545_v19 = vld [vmem:[#allocation4 + $0x120] ss:$48 sps:$4 sm:$0xff]  }
  0x43   : > { %912 = vmatpush1.bf16.msra.mxu0 %v4527_v7  ;;  %1025 = vmatpush1.bf16.msra.mxu1 %v4528_v8  ;;  %v4546_v20 = vld [vmem:[#allocation4 + $0x128] ss:$48 sps:$4 sm:$0xff]   ;;  %v4547_v21 = vld [vmem:[#allocation4 + $0xc4] ss:$48 sps:$4 sm:$0xff]   ;;  %v4549_v22 = vld [vmem:[#allocation4 + $0xcc] ss:$48 sps:$4 sm:$0xff]  }
  0x44   : > { %913 = vmatprep.subr.bf16.mxu0 %v4529_v9  ;;  %1026 = vmatprep.subr.bf16.mxu1 %v4531_v10  ;;  %v4551_v23 = vld [vmem:[#allocation4 + $0xc0] ss:$48 sps:$4 sm:$0xff]   ;;  %v4552_v24 = vld [vmem:[#allocation4 + $0xc8] ss:$48 sps:$4 sm:$0xff]   ;;  %v4553_v25 = vld [vmem:[#allocation4 + $0x64] ss:$48 sps:$4 sm:$0xff]  }
  0x45   : > { %v4555_v26 = vld [vmem:[#allocation4 + $0x6c] ss:$48 sps:$4 sm:$0xff]   ;;  %v4557_v27 = vld [vmem:[#allocation4 + $0x60] ss:$48 sps:$4 sm:$0xff]   ;;  %v4558_v28 = vld [vmem:[#allocation4 + $0x68] ss:$48 sps:$4 sm:$0xff]  }
  0x46   : > { %v4559_v29 = vld [vmem:[#allocation4 + $0x4] ss:$48 sps:$4 sm:$0xff]   ;;  %v4561_v30 = vld [vmem:[#allocation4 + $0xc] ss:$48 sps:$4 sm:$0xff]   ;;  %v4563_v31 = vld [vmem:[#allocation4] ss:$48 sps:$4 sm:$0xff]  }
  0x47   : > { %914 = vmatpush1.bf16.msra.mxu0 %v4533_v11  ;;  %1027 = vmatpush1.bf16.msra.mxu1 %v4534_v12  ;;  %v4564_v32 = vld [vmem:[#allocation4 + $0x8] ss:$48 sps:$4 sm:$0xff]   ;;  %v309_v33 = vld [vmem:[%s4894_s14] sm:$0xff]  ;;  %v4570_v36 = vld [vmem:[#allocation4 + $0x2bc] ss:$48 sps:$4 sm:$0xff]   ;;  %p279_p1 = scmp.lt.s32.totalorder %s4761_s18, 1 }
  0x48   : > { %915 = vmatprep.subr.bf16.mxu0 %v4535_v13  ;;  %1028 = vmatprep.subr.bf16.mxu1 %v4537_v14  ;;  %v4567_v35 = vld [vmem:[#allocation4 + $0x2b4] ss:$48 sps:$4 sm:$0xff]   ;;  %v4908_v37 = vpack.c.bf16 %v310_v34, %v309_v33  ;;  %v4565_v38 = vld [vmem:[#allocation4 + $0x2b0] ss:$48 sps:$4 sm:$0xff]   ;;  %v4568_v39 = vld [vmem:[#allocation4 + $0x2b8] ss:$48 sps:$4 sm:$0xff]  }
  0x49   : > { %v4573_v40 = vld [vmem:[#allocation4 + $0x254] ss:$48 sps:$4 sm:$0xff]   ;;  %v4576_v41 = vld [vmem:[#allocation4 + $0x25c] ss:$48 sps:$4 sm:$0xff]   ;;  %v4571_v44 = vld [vmem:[#allocation4 + $0x250] ss:$48 sps:$4 sm:$0xff]  }
  0x4a   : > { %v311_v42 = vld [vmem:[%s4894_s14 + $0x10] sm:$0xff]  ;;  %v312_v43 = vld [vmem:[%s4894_s14 + $0x18] sm:$0xff]  ;;  %v313_v53 = vld [vmem:[%s4894_s14 + $0x20] sm:$0xff]  ;;  %s6830_s18 = smov (!%p279_p1, %s4761_s18), 1  ;;  %vm1667_vm0 = vcmask 519168  }
  0x4b   : > { %916 = vmatpush1.bf16.msra.mxu0 %v4539_v15  ;;  %1029 = vmatpush1.bf16.msra.mxu1 %v4540_v16  ;;  %v4574_v45 = vld [vmem:[#allocation4 + $0x258] ss:$48 sps:$4 sm:$0xff]   ;;  %v4579_v46 = vld [vmem:[#allocation4 + $0x1f4] ss:$48 sps:$4 sm:$0xff]   ;;  %v4582_v47 = vld [vmem:[#allocation4 + $0x1fc] ss:$48 sps:$4 sm:$0xff]   ;;  %v4916_v48 = vpack.c.bf16 %v312_v43, %v311_v42 }
  0x4c   : > { %917 = vmatprep.subr.bf16.mxu0 %v4541_v17  ;;  %1030 = vmatprep.subr.bf16.mxu1 %v4543_v18  ;;  %v4577_v49 = vld [vmem:[#allocation4 + $0x1f0] ss:$48 sps:$4 sm:$0xff]   ;;  %v4580_v50 = vld [vmem:[#allocation4 + $0x1f8] ss:$48 sps:$4 sm:$0xff]   ;;  %v4585_v51 = vld [vmem:[#allocation4 + $0x194] ss:$48 sps:$4 sm:$0xff]  }
  0x4d   : > { %v4588_v52 = vld [vmem:[#allocation4 + $0x19c] ss:$48 sps:$4 sm:$0xff]   ;;  %v4583_v55 = vld [vmem:[#allocation4 + $0x190] ss:$48 sps:$4 sm:$0xff]   ;;  %v4586_v56 = vld [vmem:[#allocation4 + $0x198] ss:$48 sps:$4 sm:$0xff]  }
  0x4e   : > { %v314_v54 = vld [vmem:[%s4894_s14 + $0x28] sm:$0xff]  ;;  %v4591_v57 = vld [vmem:[#allocation4 + $0x134] ss:$48 sps:$4 sm:$0xff]   ;;  %v4589_v60 = vld [vmem:[#allocation4 + $0x130] ss:$48 sps:$4 sm:$0xff]   ;;  %s5034_s22 = sshll.u32 %s6830_s18, 9 }
  0x4f   : > { %918 = vmatpush1.bf16.msra.mxu0 %v4545_v19  ;;  %1031 = vmatpush1.bf16.msra.mxu1 %v4546_v20  ;;  %v4594_v58 = vld [vmem:[#allocation4 + $0x13c] ss:$48 sps:$4 sm:$0xff]   ;;  %v4924_v59 = vpack.c.bf16 %v314_v54, %v313_v53  ;;  %v4592_v61 = vld [vmem:[#allocation4 + $0x138] ss:$48 sps:$4 sm:$0xff]   ;;  %v4597_v62 = vld [vmem:[#allocation4 + $0xd4] ss:$48 sps:$4 sm:$0xff]   ;;  %s5040_s15 = scalar_lea.vmem %s6754_s2, %s5034_s22  ;;  %s5360_s26 = scalar_lea.vmem %s6755_s3, %s5034_s22 }
  0x50   : > { %919 = vmatprep.subr.bf16.mxu0 %v4547_v21  ;;  %1032 = vmatprep.subr.bf16.mxu1 %v4549_v22  ;;  %v4600_v63 = vld [vmem:[#allocation4 + $0xdc] ss:$48 sps:$4 sm:$0xff]   ;;  %v315_v1 = vld [vmem:[%s4894_s14 + $0x30] sm:$0xff]  ;;  %v4598_v4 = vld [vmem:[#allocation4 + $0xd8] ss:$48 sps:$4 sm:$0xff]   ;;  %s4778_s18 = smov 64   ;;  %s5770_s30 = scalar_lea.vmem %s6756_s4, %s5034_s22 }
  0x51   : > { %v316_v2 = vld [vmem:[%s4894_s14 + $0x38] sm:$0xff]  ;;  %v4595_v3 = vld [vmem:[#allocation4 + $0xd0] ss:$48 sps:$4 sm:$0xff]   ;;  %v4603_v5 = vld [vmem:[#allocation4 + $0x74] ss:$48 sps:$4 sm:$0xff]  }
  0x52   : > { %v4606_v6 = vld [vmem:[#allocation4 + $0x7c] ss:$48 sps:$4 sm:$0xff]   ;;  %v4932_v7 = vpack.c.bf16 %v316_v2, %v315_v1  ;;  %v4601_v8 = vld [vmem:[#allocation4 + $0x70] ss:$48 sps:$4 sm:$0xff]   ;;  %v4604_v9 = vld [vmem:[#allocation4 + $0x78] ss:$48 sps:$4 sm:$0xff]  }
  0x53   : > { %920 = vmatpush1.bf16.msra.mxu0 %v4551_v23  ;;  %1033 = vmatpush1.bf16.msra.mxu1 %v4552_v24  ;;  %v4609_v10 = vld [vmem:[#allocation4 + $0x14] ss:$48 sps:$4 sm:$0xff]   ;;  %v4612_v11 = vld [vmem:[#allocation4 + $0x1c] ss:$48 sps:$4 sm:$0xff]   ;;  %v4607_v14 = vld [vmem:[#allocation4 + $0x10] ss:$48 sps:$4 sm:$0xff]  }
  0x54   : > { %921 = vmatprep.subr.bf16.mxu0 %v4553_v25  ;;  %1034 = vmatprep.subr.bf16.mxu1 %v4555_v26  ;;  %v317_v12 = vld [vmem:[%s4894_s14 + $0x40] sm:$0xff]  ;;  %v318_v13 = vld [vmem:[%s4894_s14 + $0x48] sm:$0xff]  ;;  %v319_v17 = vld [vmem:[%s4894_s14 + $0x50] sm:$0xff] }
  0x55   : > { %v4610_v15 = vld [vmem:[#allocation4 + $0x18] ss:$48 sps:$4 sm:$0xff]   ;;  %v4940_v16 = vpack.c.bf16 %v318_v13, %v317_v12  ;;  %v321_v20 = vld [vmem:[%s4894_s14 + $0x60] sm:$0xff]  ;;  %v323_v23 = vld [vmem:[%s4894_s14 + $0x70] sm:$0xff] }
  0x56   : > { %v320_v18 = vld [vmem:[%s4894_s14 + $0x58] sm:$0xff]  ;;  %v322_v21 = vld [vmem:[%s4894_s14 + $0x68] sm:$0xff]  ;;  %v4615_v26 = vld [vmem:[#allocation4 + $0x2c4] ss:$48 sps:$4 sm:$0xff]  }
  0x57   : > { %922 = vmatpush1.bf16.msra.mxu0 %v4557_v27  ;;  %1035 = vmatpush1.bf16.msra.mxu1 %v4558_v28  ;;  %v4948_v19 = vpack.c.bf16 %v320_v18, %v319_v17  ;;  %v4956_v22 = vpack.c.bf16 %v322_v21, %v321_v20  ;;  %v324_v24 = vld [vmem:[%s4894_s14 + $0x78] sm:$0xff]  ;;  %v4613_v27 = vld [vmem:[#allocation4 + $0x2c0] ss:$48 sps:$4 sm:$0xff]   ;;  %v4639_v43 = vld [vmem:[#allocation4 + $0x144] ss:$48 sps:$4 sm:$0xff]  }
  0x58   : > { %923 = vmatprep.subr.bf16.mxu0 %v4559_v29  ;;  %1036 = vmatprep.subr.bf16.mxu1 %v4561_v30  ;;  %v4964_v25 = vpack.c.bf16 %v324_v24, %v323_v23  ;;  %v4616_v28 = vld [vmem:[#allocation4 + $0x2c8] ss:$48 sps:$4 sm:$0xff]   ;;  %v4618_v29 = vld [vmem:[#allocation4 + $0x2cc] ss:$48 sps:$4 sm:$0xff]   ;;  %v4619_v30 = vld [vmem:[#allocation4 + $0x260] ss:$48 sps:$4 sm:$0xff]  }
  0x59   : > { %v4624_v33 = vld [vmem:[#allocation4 + $0x26c] ss:$48 sps:$4 sm:$0xff]   ;;  %v4625_v34 = vld [vmem:[#allocation4 + $0x200] ss:$48 sps:$4 sm:$0xff]   ;;  %v4652_v54 = vld [vmem:[#allocation4 + $0x88] ss:$48 sps:$4 sm:$0xff]  }
  0x5a   : > { %v4636_v42 = vld [vmem:[#allocation4 + $0x1ac] ss:$48 sps:$4 sm:$0xff]   ;;  %v4649_v53 = vld [vmem:[#allocation4 + $0x80] ss:$48 sps:$4 sm:$0xff]  }
  0x5b   : > { %924 = vmatpush1.bf16.msra.mxu0 %v4563_v31  ;;  %1037 = vmatpush1.bf16.msra.mxu1 %v4564_v32  ;;  %v4621_v31 = vld [vmem:[#allocation4 + $0x264] ss:$48 sps:$4 sm:$0xff]   ;;  %v4622_v32 = vld [vmem:[#allocation4 + $0x268] ss:$48 sps:$4 sm:$0xff]  }
  0x5c   : > { %1135 = vmatprep.subr.bf16.mxu0 %v4567_v35  ;;  %1248 = vmatprep.subr.bf16.mxu1 %v4570_v36  ;;  %v4627_v35 = vld [vmem:[#allocation4 + $0x204] ss:$48 sps:$4 sm:$0xff]   ;;  %v4628_v36 = vld [vmem:[#allocation4 + $0x208] ss:$48 sps:$4 sm:$0xff]  }
  0x5e   : > { %942 = vmatmul.mubr.bf16.vlgmr.msra.gmra.mxu0 %v4908_v37  ;;  %1055 = vmatmul.mubr.bf16.vlgmr.msra.gmra.mxu1 %v4908_v37 }
  0x5f   : > { %951 = vmatprep.mubr.bf16.mxu0 %v4777_v0  ;;  %1064 = vmatprep.mubr.bf16.mxu1 %v4777_v0 }
  0x60   : > { %1136 = vmatpush1.bf16.msra.mxu0 %v4565_v38  ;;  %1249 = vmatpush1.bf16.msra.mxu1 %v4568_v39  ;;  %v4630_v38 = vld [vmem:[#allocation4 + $0x20c] ss:$48 sps:$4 sm:$0xff]   ;;  %v4633_v39 = vld [vmem:[#allocation4 + $0x1a4] ss:$48 sps:$4 sm:$0xff]  }
  0x61   : > { %1137 = vmatprep.subr.bf16.mxu0 %v4573_v40  ;;  %1250 = vmatprep.subr.bf16.mxu1 %v4576_v41  ;;  %v4631_v40 = vld [vmem:[#allocation4 + $0x1a0] ss:$48 sps:$4 sm:$0xff]   ;;  %v4634_v41 = vld [vmem:[#allocation4 + $0x1a8] ss:$48 sps:$4 sm:$0xff]  }
  0x64   : > { %1138 = vmatpush1.bf16.msra.mxu0 %v4571_v44  ;;  %1251 = vmatpush1.bf16.msra.mxu1 %v4574_v45  ;;  %v4637_v44 = vld [vmem:[#allocation4 + $0x140] ss:$48 sps:$4 sm:$0xff]   ;;  %v4640_v45 = vld [vmem:[#allocation4 + $0x148] ss:$48 sps:$4 sm:$0xff]  }
  0x65   : > { %1139 = vmatprep.subr.bf16.mxu0 %v4579_v46  ;;  %1252 = vmatprep.subr.bf16.mxu1 %v4582_v47  ;;  %v4642_v46 = vld [vmem:[#allocation4 + $0x14c] ss:$48 sps:$4 sm:$0xff]   ;;  %v4645_v47 = vld [vmem:[#allocation4 + $0xe4] ss:$48 sps:$4 sm:$0xff]  }
  0x66   : > { %952 = vmatmul.mubr.bf16.gmra.mxu0 %v4916_v48  ;;  %1065 = vmatmul.mubr.bf16.gmra.mxu1 %v4916_v48 }
  0x67   : > { %961 = vmatprep.mubr.bf16.mxu0 %v4777_v0  ;;  %1074 = vmatprep.mubr.bf16.mxu1 %v4777_v0 }
  0x68   : > { %1140 = vmatpush1.bf16.msra.mxu0 %v4577_v49  ;;  %1253 = vmatpush1.bf16.msra.mxu1 %v4580_v50  ;;  %v4643_v49 = vld [vmem:[#allocation4 + $0xe0] ss:$48 sps:$4 sm:$0xff]   ;;  %v4646_v50 = vld [vmem:[#allocation4 + $0xe8] ss:$48 sps:$4 sm:$0xff]  }
  0x69   : > { %1141 = vmatprep.subr.bf16.mxu0 %v4585_v51  ;;  %1254 = vmatprep.subr.bf16.mxu1 %v4588_v52  ;;  %v4648_v51 = vld [vmem:[#allocation4 + $0xec] ss:$48 sps:$4 sm:$0xff]   ;;  %v4651_v52 = vld [vmem:[#allocation4 + $0x84] ss:$48 sps:$4 sm:$0xff]  }
  0x6c   : > { %1142 = vmatpush1.bf16.msra.mxu0 %v4583_v55  ;;  %1255 = vmatpush1.bf16.msra.mxu1 %v4586_v56  ;;  %v4654_v55 = vld [vmem:[#allocation4 + $0x8c] ss:$48 sps:$4 sm:$0xff]   ;;  %v4655_v56 = vld [vmem:[#allocation4 + $0x20] ss:$48 sps:$4 sm:$0xff]  }
  0x6d   : > { %1143 = vmatprep.subr.bf16.mxu0 %v4591_v57  ;;  %1256 = vmatprep.subr.bf16.mxu1 %v4594_v58  ;;  %v4657_v57 = vld [vmem:[#allocation4 + $0x24] ss:$48 sps:$4 sm:$0xff]   ;;  %v4658_v58 = vld [vmem:[#allocation4 + $0x28] ss:$48 sps:$4 sm:$0xff]  }
  0x6e   : > { %962 = vmatmul.mubr.bf16.gmra.mxu0 %v4924_v59  ;;  %1075 = vmatmul.mubr.bf16.gmra.mxu1 %v4924_v59 }
  0x6f   : > { %971 = vmatprep.mubr.bf16.mxu0 %v4777_v0  ;;  %1084 = vmatprep.mubr.bf16.mxu1 %v4777_v0 }
  0x70   : > { %1144 = vmatpush1.bf16.msra.mxu0 %v4589_v60  ;;  %1257 = vmatpush1.bf16.msra.mxu1 %v4592_v61  ;;  %v4660_v60 = vld [vmem:[#allocation4 + $0x2c] ss:$48 sps:$4 sm:$0xff]  }
  0x71   : > { %1145 = vmatprep.subr.bf16.mxu0 %v4597_v62  ;;  %1258 = vmatprep.subr.bf16.mxu1 %v4600_v63 }
  0x74   : > { %1146 = vmatpush1.bf16.msra.mxu0 %v4595_v3  ;;  %1259 = vmatpush1.bf16.msra.mxu1 %v4598_v4 }
  0x75   : > { %1147 = vmatprep.subr.bf16.mxu0 %v4603_v5  ;;  %1260 = vmatprep.subr.bf16.mxu1 %v4606_v6 }
  0x76   : > { %972 = vmatmul.mubr.bf16.gmra.mxu0 %v4932_v7  ;;  %1085 = vmatmul.mubr.bf16.gmra.mxu1 %v4932_v7 }
  0x77   : > { %981 = vmatprep.mubr.bf16.mxu0 %v4777_v0  ;;  %1094 = vmatprep.mubr.bf16.mxu1 %v4777_v0 }
  0x78   : > { %1148 = vmatpush1.bf16.msra.mxu0 %v4601_v8  ;;  %1261 = vmatpush1.bf16.msra.mxu1 %v4604_v9 }
  0x79   : > { %1149 = vmatprep.subr.bf16.mxu0 %v4609_v10  ;;  %1262 = vmatprep.subr.bf16.mxu1 %v4612_v11 }
  0x7c   : > { %1150 = vmatpush1.bf16.msra.mxu0 %v4607_v14  ;;  %1263 = vmatpush1.bf16.msra.mxu1 %v4610_v15 }
  0x7d   : > { %1361 = vmatprep.subr.bf16.mxu0 %v4615_v26  ;;  %1474 = vmatprep.subr.bf16.mxu1 %v4618_v29 }
  0x7e   : > { %982 = vmatmul.mubr.bf16.gmra.mxu0 %v4940_v16  ;;  %1095 = vmatmul.mubr.bf16.gmra.mxu1 %v4940_v16 }
  0x7f   : > { %991 = vmatprep.mubr.bf16.mxu0 %v4777_v0  ;;  %1104 = vmatprep.mubr.bf16.mxu1 %v4777_v0 }
  0x86   : > { %992 = vmatmul.mubr.bf16.gmra.mxu0 %v4948_v19  ;;  %1105 = vmatmul.mubr.bf16.gmra.mxu1 %v4948_v19 }
  0x87   : > { %1001 = vmatprep.mubr.bf16.mxu0 %v4777_v0  ;;  %1114 = vmatprep.mubr.bf16.mxu1 %v4777_v0 }
  0x8e   : > { %1002 = vmatmul.mubr.bf16.gmra.mxu0 %v4956_v22  ;;  %1115 = vmatmul.mubr.bf16.gmra.mxu1 %v4956_v22 }
  0x8f   : > { %1011 = vmatprep.mubr.bf16.mxu0 %v4777_v0  ;;  %1124 = vmatprep.mubr.bf16.mxu1 %v4777_v0 }
  0x96   : > { %1012 = vmatmul.mubr.bf16.gmra.mxu0 %v4964_v25  ;;  %1125 = vmatmul.mubr.bf16.gmra.mxu1 %v4964_v25 }
  0x97   : > { %1167 = vmatprep.mubr.bf16.mxu0 %v4777_v0  ;;  %1280 = vmatprep.mubr.bf16.mxu1 %v4777_v0 }
  0x9e   : > { %1168 = vmatmul.mubr.bf16.vlgmr.msra.gmra.mxu0 %v4908_v37  ;;  %1281 = vmatmul.mubr.bf16.vlgmr.msra.gmra.mxu1 %v4908_v37 }
  0x9f   : > { %1177 = vmatprep.mubr.bf16.mxu0 %v4777_v0  ;;  %1290 = vmatprep.mubr.bf16.mxu1 %v4777_v0 }
  0xa0   : > { %1362 = vmatpush1.bf16.msra.mxu0 %v4613_v27  ;;  %1475 = vmatpush1.bf16.msra.mxu1 %v4616_v28 }
  0xa1   : > { %1363 = vmatprep.subr.bf16.mxu0 %v4621_v31  ;;  %1476 = vmatprep.subr.bf16.mxu1 %v4624_v33 }
  0xa4   : > { %1364 = vmatpush1.bf16.msra.mxu0 %v4619_v30  ;;  %1477 = vmatpush1.bf16.msra.mxu1 %v4622_v32 }
  0xa5   : > { %1365 = vmatprep.subr.bf16.mxu0 %v4627_v35  ;;  %1478 = vmatprep.subr.bf16.mxu1 %v4630_v38 }
  0xa6   : > { %1178 = vmatmul.mubr.bf16.gmra.mxu0 %v4916_v48  ;;  %1291 = vmatmul.mubr.bf16.gmra.mxu1 %v4916_v48 }
  0xa7   : > { %1187 = vmatprep.mubr.bf16.mxu0 %v4777_v0  ;;  %1300 = vmatprep.mubr.bf16.mxu1 %v4777_v0 }
  0xa8   : > { %1366 = vmatpush1.bf16.msra.mxu0 %v4625_v34  ;;  %1479 = vmatpush1.bf16.msra.mxu1 %v4628_v36 }
  0xa9   : > { %1367 = vmatprep.subr.bf16.mxu0 %v4633_v39  ;;  %1480 = vmatprep.subr.bf16.mxu1 %v4636_v42 }
  0xac   : > { %1368 = vmatpush1.bf16.msra.mxu0 %v4631_v40  ;;  %1481 = vmatpush1.bf16.msra.mxu1 %v4634_v41 }
  0xad   : > { %1369 = vmatprep.subr.bf16.mxu0 %v4639_v43  ;;  %1482 = vmatprep.subr.bf16.mxu1 %v4642_v46 }
  0xae   : > { %1188 = vmatmul.mubr.bf16.gmra.mxu0 %v4924_v59  ;;  %1301 = vmatmul.mubr.bf16.gmra.mxu1 %v4924_v59 }
  0xaf   : > { %1197 = vmatprep.mubr.bf16.mxu0 %v4777_v0  ;;  %1310 = vmatprep.mubr.bf16.mxu1 %v4777_v0 }
  0xb0   : > { %1370 = vmatpush1.bf16.msra.mxu0 %v4637_v44  ;;  %1483 = vmatpush1.bf16.msra.mxu1 %v4640_v45 }
  0xb1   : > { %1371 = vmatprep.subr.bf16.mxu0 %v4645_v47  ;;  %1484 = vmatprep.subr.bf16.mxu1 %v4648_v51 }
  0xb4   : > { %1372 = vmatpush1.bf16.msra.mxu0 %v4643_v49  ;;  %1485 = vmatpush1.bf16.msra.mxu1 %v4646_v50 }
  0xb5   : > { %1373 = vmatprep.subr.bf16.mxu0 %v4651_v52  ;;  %1486 = vmatprep.subr.bf16.mxu1 %v4654_v55 }
  0xb6   : > { %1198 = vmatmul.mubr.bf16.gmra.mxu0 %v4932_v7  ;;  %1311 = vmatmul.mubr.bf16.gmra.mxu1 %v4932_v7 }
  0xb7   : > { %1207 = vmatprep.mubr.bf16.mxu0 %v4777_v0  ;;  %1320 = vmatprep.mubr.bf16.mxu1 %v4777_v0 }
  0xb8   : > { %1374 = vmatpush1.bf16.msra.mxu0 %v4649_v53  ;;  %1487 = vmatpush1.bf16.msra.mxu1 %v4652_v54 }
  0xb9   : > { %1375 = vmatprep.subr.bf16.mxu0 %v4657_v57  ;;  %1488 = vmatprep.subr.bf16.mxu1 %v4660_v60 }
  0xbc   : > { %1376 = vmatpush1.bf16.msra.mxu0 %v4655_v56  ;;  %1489 = vmatpush1.bf16.msra.mxu1 %v4658_v58 }
  0xbe   : > { %1208 = vmatmul.mubr.bf16.gmra.mxu0 %v4940_v16  ;;  %1321 = vmatmul.mubr.bf16.gmra.mxu1 %v4940_v16 }
  0xbf   : > { %1217 = vmatprep.mubr.bf16.mxu0 %v4777_v0  ;;  %1330 = vmatprep.mubr.bf16.mxu1 %v4777_v0 }
  0xc6   : > { %1218 = vmatmul.mubr.bf16.gmra.mxu0 %v4948_v19  ;;  %1331 = vmatmul.mubr.bf16.gmra.mxu1 %v4948_v19 }
  0xc7   : > { %1227 = vmatprep.mubr.bf16.mxu0 %v4777_v0  ;;  %1340 = vmatprep.mubr.bf16.mxu1 %v4777_v0 }
  0xce   : > { %1228 = vmatmul.mubr.bf16.gmra.mxu0 %v4956_v22  ;;  %1341 = vmatmul.mubr.bf16.gmra.mxu1 %v4956_v22 }
  0xcf   : > { %1237 = vmatprep.mubr.bf16.mxu0 %v4777_v0  ;;  %1350 = vmatprep.mubr.bf16.mxu1 %v4777_v0 }
  0xd6   : > { %1238 = vmatmul.mubr.bf16.gmra.mxu0 %v4964_v25  ;;  %1351 = vmatmul.mubr.bf16.gmra.mxu1 %v4964_v25 }
  0xd7   : > { %1393 = vmatprep.mubr.bf16.mxu0 %v4777_v0  ;;  %1506 = vmatprep.mubr.bf16.mxu1 %v4777_v0 }
  0xde   : > { %1394 = vmatmul.mubr.bf16.vlgmr.msra.gmra.mxu0 %v4908_v37  ;;  %1507 = vmatmul.mubr.bf16.vlgmr.msra.gmra.mxu1 %v4908_v37 }
  0xdf   : > { %1403 = vmatprep.mubr.bf16.mxu0 %v4777_v0  ;;  %1516 = vmatprep.mubr.bf16.mxu1 %v4777_v0 }
  0xe6   : > { %1404 = vmatmul.mubr.bf16.gmra.mxu0 %v4916_v48  ;;  %1517 = vmatmul.mubr.bf16.gmra.mxu1 %v4916_v48 }
  0xe7   : > { %1413 = vmatprep.mubr.bf16.mxu0 %v4777_v0  ;;  %1526 = vmatprep.mubr.bf16.mxu1 %v4777_v0 }
  0xee   : > { %1414 = vmatmul.mubr.bf16.gmra.mxu0 %v4924_v59  ;;  %1527 = vmatmul.mubr.bf16.gmra.mxu1 %v4924_v59 }
  0xef   : > { %1423 = vmatprep.mubr.bf16.mxu0 %v4777_v0  ;;  %1536 = vmatprep.mubr.bf16.mxu1 %v4777_v0 }
  0xf6   : > { %1424 = vmatmul.mubr.bf16.gmra.mxu0 %v4932_v7  ;;  %1537 = vmatmul.mubr.bf16.gmra.mxu1 %v4932_v7 }
  0xf7   : > { %1433 = vmatprep.mubr.bf16.mxu0 %v4777_v0  ;;  %1546 = vmatprep.mubr.bf16.mxu1 %v4777_v0 }
  0xfe   : > { %1434 = vmatmul.mubr.bf16.gmra.mxu0 %v4940_v16  ;;  %1547 = vmatmul.mubr.bf16.gmra.mxu1 %v4940_v16 }
  0xff   : > { %1443 = vmatprep.mubr.bf16.mxu0 %v4777_v0  ;;  %1556 = vmatprep.mubr.bf16.mxu1 %v4777_v0 }
 0x106   : > { %1444 = vmatmul.mubr.bf16.gmra.mxu0 %v4948_v19  ;;  %1557 = vmatmul.mubr.bf16.gmra.mxu1 %v4948_v19 }
 0x107   : > { %1453 = vmatprep.mubr.bf16.mxu0 %v4777_v0  ;;  %1566 = vmatprep.mubr.bf16.mxu1 %v4777_v0 }
 0x10e   : > { %1454 = vmatmul.mubr.bf16.gmra.mxu0 %v4956_v22  ;;  %1567 = vmatmul.mubr.bf16.gmra.mxu1 %v4956_v22 }
 0x10f   : > { %1463 = vmatprep.mubr.bf16.mxu0 %v4777_v0  ;;  %1576 = vmatprep.mubr.bf16.mxu1 %v4777_v0 }
 0x116   : > { %1464 = vmatmul.mubr.bf16.gmra.mxu0 %v4964_v25  ;;  %1577 = vmatmul.mubr.bf16.gmra.mxu1 %v4964_v25 }
 0x11e   : > { %v943_v37 = vpop.f32.mrf.mxu0  ;;  %v1056_v48 = vpop.f32.mrf.mxu1 }
 0x11f   : > { %v1587_v59 = vmul.f32 0.125, %v943_v37  ;;  %v2493_v61 = vmul.f32 0.125, %v1056_v48 }
 0x120   : > { %v945_v0 = vpop.f32.mrf.mxu0  ;;  %v1058_v62 = vpop.f32.mrf.mxu1 }
 0x121   : > { %v4253_v63 = vpack.c.bf16 %v1587_v59, %v1587_v59  ;;  %v4349_v1 = vpack.c.bf16 %v2493_v61, %v2493_v61  ;;  %v2039_v2 = vmul.f32 0.125, %v945_v0  ;;  %v2947_v3 = vmul.f32 0.125, %v1058_v62 }
 0x122   : > { %v947_v4 = vpop.f32.mrf.mxu0  ;;  %v1060_v5 = vpop.f32.mrf.mxu1 }
 0x123   : > { %1668 = vst.msk [vmem:[%s5040_s15] sm:$0xf] %vm1667_vm0, %v4253_v63  ;;  %3975 = vst.msk [vmem:[%s5040_s15 + $0x100] sm:$0xf] %vm1667_vm0, %v4349_v1  ;;  %v4301_v6 = vpack.c.bf16 %v2039_v2, %v2039_v2  ;;  %v4397_v7 = vpack.c.bf16 %v2947_v3, %v2947_v3  ;;  %v1588_v8 = vmul.f32 0.125, %v947_v4  ;;  %v2494_v9 = vmul.f32 0.125, %v1060_v5  ;;  %1844 = vrot.lane.b32.xlu0 %v4253_v63, %s4778_s18 }
 0x124   : > { %v949_v10 = vpop.f32.mrf.mxu0  ;;  %v1062_v11 = vpop.f32.mrf.mxu1 }
 0x125   : > { %3831 = vst.msk [vmem:[%s5040_s15 + $0x80] sm:$0xf] %vm1667_vm0, %v4301_v6  ;;  %4119 = vst.msk [vmem:[%s5040_s15 + $0x180] sm:$0xf] %vm1667_vm0, %v4397_v7  ;;  %v4254_v12 = vpack.c.bf16 %v1588_v8, %v1588_v8  ;;  %v4350_v13 = vpack.c.bf16 %v2494_v9, %v2494_v9  ;;  %v2040_v14 = vmul.f32 0.125, %v949_v10  ;;  %v2948_v15 = vmul.f32 0.125, %v1062_v11 }
 0x126   : > { %v953_v16 = vpop.f32.mrf.mxu0  ;;  %v1066_v17 = vpop.f32.mrf.mxu1 }
 0x127   : > { %1669 = vst.msk [vmem:[%s5040_s15 + $0x4] sm:$0xf] %vm1667_vm0, %v4254_v12  ;;  %3976 = vst.msk [vmem:[%s5040_s15 + $0x104] sm:$0xf] %vm1667_vm0, %v4350_v13  ;;  %v4302_v18 = vpack.c.bf16 %v2040_v14, %v2040_v14  ;;  %v4398_v19 = vpack.c.bf16 %v2948_v15, %v2948_v15  ;;  %2754 = vrot.lane.b32.xlu1 %v4350_v13, %s4778_s18  ;;  %2752 = vrot.lane.b32.xlu0 %v4349_v1, %s4778_s18  ;;  %v1589_v20 = vmul.f32 0.125, %v953_v16 }
 0x128   : > { %v2495_v21 = vmul.f32 0.125, %v1066_v17  ;;  %v955_v22 = vpop.f32.mrf.mxu0  ;;  %v1068_v23 = vpop.f32.mrf.mxu1 }
 0x129   : > { %3832 = vst.msk [vmem:[%s5040_s15 + $0x84] sm:$0xf] %vm1667_vm0, %v4302_v18  ;;  %4120 = vst.msk [vmem:[%s5040_s15 + $0x184] sm:$0xf] %vm1667_vm0, %v4398_v19  ;;  %v4255_v24 = vpack.c.bf16 %v1589_v20, %v1589_v20  ;;  %v2041_v25 = vmul.f32 0.125, %v955_v22  ;;  %v2949_v27 = vmul.f32 0.125, %v1068_v23 }
 0x12a   : > { %v4351_v26 = vpack.c.bf16 %v2495_v21, %v2495_v21  ;;  %v957_v28 = vpop.f32.mrf.mxu0  ;;  %v1070_v29 = vpop.f32.mrf.mxu1 }
 0x12b   : > { %1670 = vst.msk [vmem:[%s5040_s15 + $0x8] sm:$0xf] %vm1667_vm0, %v4255_v24  ;;  %v5063_v30 = vpack.c.bf16 %v2041_v25, %v2041_v25  ;;  %2298 = vrot.lane.b32.xlu0 %v4301_v6, %s4778_s18  ;;  %2300 = vrot.lane.b32.xlu1 %v4302_v18, %s4778_s18  ;;  %v1590_v31 = vmul.f32 0.125, %v957_v28  ;;  %v5069_v32 = vpack.c.bf16 %v2949_v27, %v2949_v27  ;;  %v2496_v33 = vmul.f32 0.125, %v1070_v29 }
 0x12c   : > { %3977 = vst.msk [vmem:[%s5040_s15 + $0x108] sm:$0xf] %vm1667_vm0, %v4351_v26  ;;  %v959_v34 = vpop.f32.mrf.mxu0  ;;  %v1072_v35 = vpop.f32.mrf.mxu1 }
 0x12d   : > { %3833 = vst.msk [vmem:[%s5040_s15 + $0x88] sm:$0xf] %vm1667_vm0, %v5063_v30  ;;  %v4256_v36 = vpack.c.bf16 %v1590_v31, %v1590_v31  ;;  %v2042_v38 = vmul.f32 0.125, %v959_v34  ;;  %4121 = vst.msk [vmem:[%s5040_s15 + $0x188] sm:$0xf] %vm1667_vm0, %v5069_v32  ;;  %v4352_v39 = vpack.c.bf16 %v2496_v33, %v2496_v33  ;;  %v2950_v40 = vmul.f32 0.125, %v1072_v35 }
 0x12e   : > { %v963_v41 = vpop.f32.mrf.mxu0  ;;  %v1076_v42 = vpop.f32.mrf.mxu1 }
 0x12f   : > { %1671 = vst.msk [vmem:[%s5040_s15 + $0xc] sm:$0xf] %vm1667_vm0, %v4256_v36  ;;  %v5079_v43 = vpack.c.bf16 %v2042_v38, %v2042_v38  ;;  %3206 = vrot.lane.b32.xlu0 %v4397_v7, %s4778_s18  ;;  %3208 = vrot.lane.b32.xlu1 %v4398_v19, %s4778_s18  ;;  %3978 = vst.msk [vmem:[%s5040_s15 + $0x10c] sm:$0xf] %vm1667_vm0, %v4352_v39  ;;  %v5085_v44 = vpack.c.bf16 %v2950_v40, %v2950_v40  ;;  %v1591_v45 = vmul.f32 0.125, %v963_v41 }
 0x130   : > { %v2497_v46 = vmul.f32 0.125, %v1076_v42  ;;  %v965_v47 = vpop.f32.mrf.mxu0  ;;  %v1078_v49 = vpop.f32.mrf.mxu1 }
 0x131   : > { %3834 = vst.msk [vmem:[%s5040_s15 + $0x8c] sm:$0xf] %vm1667_vm0, %v5079_v43  ;;  %4122 = vst.msk [vmem:[%s5040_s15 + $0x18c] sm:$0xf] %vm1667_vm0, %v5085_v44  ;;  %v5093_v50 = vpack.c.bf16 %v1591_v45, %v1591_v45  ;;  %v2043_v51 = vmul.f32 0.125, %v965_v47  ;;  %v2951_v53 = vmul.f32 0.125, %v1078_v49 }
 0x132   : > { %v5095_v52 = vpack.c.bf16 %v2497_v46, %v2497_v46  ;;  %v967_v54 = vpop.f32.mrf.mxu0  ;;  %v1080_v55 = vpop.f32.mrf.mxu1 }
 0x133   : > { %1846 = vrot.lane.b32.xlu0 %v4254_v12, %s4778_s18  ;;  %1848 = vrot.lane.b32.xlu1 %v4255_v24, %s4778_s18  ;;  %1672 = vst.msk [vmem:[%s5040_s15 + $0x10] sm:$0xf] %vm1667_vm0, %v5093_v50  ;;  %v5102_v56 = vpack.c.bf16 %v2043_v51, %v2043_v51  ;;  %v1592_v57 = vmul.f32 0.125, %v967_v54  ;;  %v5107_v58 = vpack.c.bf16 %v2951_v53, %v2951_v53  ;;  %v2498_v60 = vmul.f32 0.125, %v1080_v55 }
 0x134   : > { %3979 = vst.msk [vmem:[%s5040_s15 + $0x110] sm:$0xf] %vm1667_vm0, %v5095_v52  ;;  %v969_v37 = vpop.f32.mrf.mxu0  ;;  %v1082_v48 = vpop.f32.mrf.mxu1 }
 0x135   : > { %3835 = vst.msk [vmem:[%s5040_s15 + $0x90] sm:$0xf] %vm1667_vm0, %v5102_v56  ;;  %v5112_v59 = vpack.c.bf16 %v1592_v57, %v1592_v57  ;;  %v2044_v61 = vmul.f32 0.125, %v969_v37  ;;  %4123 = vst.msk [vmem:[%s5040_s15 + $0x190] sm:$0xf] %vm1667_vm0, %v5107_v58  ;;  %v5117_v0 = vpack.c.bf16 %v2498_v60, %v2498_v60  ;;  %v2952_v62 = vmul.f32 0.125, %v1082_v48 }
 0x136   : > { %v973_v63 = vpop.f32.mrf.mxu0  ;;  %v1086_v1 = vpop.f32.mrf.mxu1 }
 0x137   : > { %2756 = vrot.lane.b32.xlu0 %v4351_v26, %s4778_s18  ;;  %1850 = vrot.lane.b32.xlu1 %v4256_v36, %s4778_s18  ;;  %1673 = vst.msk [vmem:[%s5040_s15 + $0x14] sm:$0xf] %vm1667_vm0, %v5112_v59  ;;  %v5124_v2 = vpack.c.bf16 %v2044_v61, %v2044_v61  ;;  %3980 = vst.msk [vmem:[%s5040_s15 + $0x114] sm:$0xf] %vm1667_vm0, %v5117_v0  ;;  %v5129_v3 = vpack.c.bf16 %v2952_v62, %v2952_v62  ;;  %v1593_v4 = vmul.f32 0.125, %v973_v63 }
 0x138   : > { %v2499_v5 = vmul.f32 0.125, %v1086_v1  ;;  %v975_v6 = vpop.f32.mrf.mxu0  ;;  %v1088_v7 = vpop.f32.mrf.mxu1 }
 0x139   : > { %3836 = vst.msk [vmem:[%s5040_s15 + $0x94] sm:$0xf] %vm1667_vm0, %v5124_v2  ;;  %4124 = vst.msk [vmem:[%s5040_s15 + $0x194] sm:$0xf] %vm1667_vm0, %v5129_v3  ;;  %v5137_v8 = vpack.c.bf16 %v1593_v4, %v1593_v4  ;;  %v2045_v9 = vmul.f32 0.125, %v975_v6  ;;  %v2953_v11 = vmul.f32 0.125, %v1088_v7 }
 0x13a   : > { %v5139_v10 = vpack.c.bf16 %v2499_v5, %v2499_v5  ;;  %v977_v12 = vpop.f32.mrf.mxu0  ;;  %v1090_v13 = vpop.f32.mrf.mxu1 }
 0x13b   : > { %2302 = vrot.lane.b32.xlu0 %v5063_v30, %s4778_s18  ;;  %2758 = vrot.lane.b32.xlu1 %v4352_v39, %s4778_s18  ;;  %1674 = vst.msk [vmem:[%s5040_s15 + $0x18] sm:$0xf] %vm1667_vm0, %v5137_v8  ;;  %v5147_v14 = vpack.c.bf16 %v2045_v9, %v2045_v9  ;;  %v1594_v15 = vmul.f32 0.125, %v977_v12  ;;  %v5152_v16 = vpack.c.bf16 %v2953_v11, %v2953_v11  ;;  %v2500_v17 = vmul.f32 0.125, %v1090_v13 }
 0x13c   : > { %3981 = vst.msk [vmem:[%s5040_s15 + $0x118] sm:$0xf] %vm1667_vm0, %v5139_v10  ;;  %v979_v18 = vpop.f32.mrf.mxu0  ;;  %v1092_v19 = vpop.f32.mrf.mxu1 }
 0x13d   : > { %3837 = vst.msk [vmem:[%s5040_s15 + $0x98] sm:$0xf] %vm1667_vm0, %v5147_v14  ;;  %v5157_v20 = vpack.c.bf16 %v1594_v15, %v1594_v15  ;;  %v2046_v21 = vmul.f32 0.125, %v979_v18  ;;  %4125 = vst.msk [vmem:[%s5040_s15 + $0x198] sm:$0xf] %vm1667_vm0, %v5152_v16  ;;  %v5162_v22 = vpack.c.bf16 %v2500_v17, %v2500_v17  ;;  %v2954_v23 = vmul.f32 0.125, %v1092_v19 }
 0x13e   : > { %v983_v24 = vpop.f32.mrf.mxu0  ;;  %v1096_v25 = vpop.f32.mrf.mxu1 }
 0x13f   : > { %3210 = vrot.lane.b32.xlu0 %v5069_v32, %s4778_s18  ;;  %2304 = vrot.lane.b32.xlu1 %v5079_v43, %s4778_s18  ;;  %1675 = vst.msk [vmem:[%s5040_s15 + $0x1c] sm:$0xf] %vm1667_vm0, %v5157_v20  ;;  %v5171_v26 = vpack.c.bf16 %v2046_v21, %v2046_v21  ;;  %3982 = vst.msk [vmem:[%s5040_s15 + $0x11c] sm:$0xf] %vm1667_vm0, %v5162_v22  ;;  %v5176_v27 = vpack.c.bf16 %v2954_v23, %v2954_v23  ;;  %v1595_v28 = vmul.f32 0.125, %v983_v24 }
 0x140   : > { %v2501_v29 = vmul.f32 0.125, %v1096_v25  ;;  %v985_v30 = vpop.f32.mrf.mxu0  ;;  %v1098_v31 = vpop.f32.mrf.mxu1 }
 0x141   : > { %3838 = vst.msk [vmem:[%s5040_s15 + $0x9c] sm:$0xf] %vm1667_vm0, %v5171_v26  ;;  %4126 = vst.msk [vmem:[%s5040_s15 + $0x19c] sm:$0xf] %vm1667_vm0, %v5176_v27  ;;  %v5184_v32 = vpack.c.bf16 %v1595_v28, %v1595_v28  ;;  %v2047_v33 = vmul.f32 0.125, %v985_v30  ;;  %v2955_v35 = vmul.f32 0.125, %v1098_v31 }
 0x142   : > { %v5186_v34 = vpack.c.bf16 %v2501_v29, %v2501_v29  ;;  %v987_v36 = vpop.f32.mrf.mxu0  ;;  %v1100_v38 = vpop.f32.mrf.mxu1 }
 0x143   : > { %3212 = vrot.lane.b32.xlu1 %v5085_v44, %s4778_s18  ;;  %1852 = vrot.lane.b32.xlu0 %v5093_v50, %s4778_s18  ;;  %1676 = vst.msk [vmem:[%s5040_s15 + $0x20] sm:$0xf] %vm1667_vm0, %v5184_v32  ;;  %v5195_v39 = vpack.c.bf16 %v2047_v33, %v2047_v33  ;;  %v1596_v40 = vmul.f32 0.125, %v987_v36  ;;  %v5200_v41 = vpack.c.bf16 %v2955_v35, %v2955_v35  ;;  %v2502_v42 = vmul.f32 0.125, %v1100_v38 }
 0x144   : > { %3983 = vst.msk [vmem:[%s5040_s15 + $0x120] sm:$0xf] %vm1667_vm0, %v5186_v34  ;;  %v989_v43 = vpop.f32.mrf.mxu0  ;;  %v1102_v45 = vpop.f32.mrf.mxu1 }
 0x145   : > { %3839 = vst.msk [vmem:[%s5040_s15 + $0xa0] sm:$0xf] %vm1667_vm0, %v5195_v39  ;;  %v5205_v44 = vpack.c.bf16 %v1596_v40, %v1596_v40  ;;  %v2048_v46 = vmul.f32 0.125, %v989_v43  ;;  %4127 = vst.msk [vmem:[%s5040_s15 + $0x1a0] sm:$0xf] %vm1667_vm0, %v5200_v41  ;;  %v5210_v47 = vpack.c.bf16 %v2502_v42, %v2502_v42  ;;  %v2956_v49 = vmul.f32 0.125, %v1102_v45 }
 0x146   : > { %v993_v50 = vpop.f32.mrf.mxu0  ;;  %v1106_v51 = vpop.f32.mrf.mxu1 }
 0x147   : > { %2760 = vrot.lane.b32.xlu0 %v5095_v52, %s4778_s18  ;;  %1854 = vrot.lane.b32.xlu1 %v5112_v59, %s4778_s18  ;;  %1677 = vst.msk [vmem:[%s5040_s15 + $0x24] sm:$0xf] %vm1667_vm0, %v5205_v44  ;;  %v5219_v53 = vpack.c.bf16 %v2048_v46, %v2048_v46  ;;  %3984 = vst.msk [vmem:[%s5040_s15 + $0x124] sm:$0xf] %vm1667_vm0, %v5210_v47  ;;  %v5224_v54 = vpack.c.bf16 %v2956_v49, %v2956_v49  ;;  %v1597_v55 = vmul.f32 0.125, %v993_v50 }
 0x148   : > { %v2503_v57 = vmul.f32 0.125, %v1106_v51  ;;  %v995_v60 = vpop.f32.mrf.mxu0  ;;  %v1108_v37 = vpop.f32.mrf.mxu1 }
 0x149   : > { %3840 = vst.msk [vmem:[%s5040_s15 + $0xa4] sm:$0xf] %vm1667_vm0, %v5219_v53  ;;  %4128 = vst.msk [vmem:[%s5040_s15 + $0x1a4] sm:$0xf] %vm1667_vm0, %v5224_v54  ;;  %v5232_v52 = vpack.c.bf16 %v1597_v55, %v1597_v55  ;;  %v2049_v48 = vmul.f32 0.125, %v995_v60  ;;  %v2957_v61 = vmul.f32 0.125, %v1108_v37 }
 0x14a   : > { %v5234_v59 = vpack.c.bf16 %v2503_v57, %v2503_v57  ;;  %v997_v62 = vpop.f32.mrf.mxu0  ;;  %v1110_v63 = vpop.f32.mrf.mxu1 }
 0x14b   : > { %2306 = vrot.lane.b32.xlu0 %v5102_v56, %s4778_s18  ;;  %2762 = vrot.lane.b32.xlu1 %v5117_v0, %s4778_s18  ;;  %1678 = vst.msk [vmem:[%s5040_s15 + $0x28] sm:$0xf] %vm1667_vm0, %v5232_v52  ;;  %v5243_v1 = vpack.c.bf16 %v2049_v48, %v2049_v48  ;;  %v1598_v4 = vmul.f32 0.125, %v997_v62  ;;  %v5248_v5 = vpack.c.bf16 %v2957_v61, %v2957_v61  ;;  %v2504_v6 = vmul.f32 0.125, %v1110_v63 }
 0x14c   : > { %3985 = vst.msk [vmem:[%s5040_s15 + $0x128] sm:$0xf] %vm1667_vm0, %v5234_v59  ;;  %v999_v7 = vpop.f32.mrf.mxu0  ;;  %v1112_v9 = vpop.f32.mrf.mxu1 }
 0x14d   : > { %3841 = vst.msk [vmem:[%s5040_s15 + $0xa8] sm:$0xf] %vm1667_vm0, %v5243_v1  ;;  %v5253_v56 = vpack.c.bf16 %v1598_v4, %v1598_v4  ;;  %v2050_v0 = vmul.f32 0.125, %v999_v7  ;;  %4129 = vst.msk [vmem:[%s5040_s15 + $0x1a8] sm:$0xf] %vm1667_vm0, %v5248_v5  ;;  %v5258_v11 = vpack.c.bf16 %v2504_v6, %v2504_v6  ;;  %v2958_v12 = vmul.f32 0.125, %v1112_v9 }
 0x14e   : > { %v1003_v13 = vpop.f32.mrf.mxu0  ;;  %v1116_v15 = vpop.f32.mrf.mxu1 }
 0x14f   : > { %3214 = vrot.lane.b32.xlu0 %v5107_v58, %s4778_s18  ;;  %2308 = vrot.lane.b32.xlu1 %v5124_v2, %s4778_s18  ;;  %1679 = vst.msk [vmem:[%s5040_s15 + $0x2c] sm:$0xf] %vm1667_vm0, %v5253_v56  ;;  %v5267_v17 = vpack.c.bf16 %v2050_v0, %v2050_v0  ;;  %3986 = vst.msk [vmem:[%s5040_s15 + $0x12c] sm:$0xf] %vm1667_vm0, %v5258_v11  ;;  %v5272_v18 = vpack.c.bf16 %v2958_v12, %v2958_v12  ;;  %v1599_v19 = vmul.f32 0.125, %v1003_v13 }
 0x150   : > { %v2505_v21 = vmul.f32 0.125, %v1116_v15  ;;  %v1005_v23 = vpop.f32.mrf.mxu0  ;;  %v1118_v24 = vpop.f32.mrf.mxu1 }
 0x151   : > { %3842 = vst.msk [vmem:[%s5040_s15 + $0xac] sm:$0xf] %vm1667_vm0, %v5267_v17  ;;  %4130 = vst.msk [vmem:[%s5040_s15 + $0x1ac] sm:$0xf] %vm1667_vm0, %v5272_v18  ;;  %v5280_v58 = vpack.c.bf16 %v1599_v19, %v1599_v19  ;;  %v2051_v2 = vmul.f32 0.125, %v1005_v23  ;;  %v2959_v28 = vmul.f32 0.125, %v1118_v24 }
 0x152   : > { %v5282_v25 = vpack.c.bf16 %v2505_v21, %v2505_v21  ;;  %v1007_v29 = vpop.f32.mrf.mxu0  ;;  %v1120_v30 = vpop.f32.mrf.mxu1 }
 0x153   : > { %3216 = vrot.lane.b32.xlu1 %v5129_v3, %s4778_s18  ;;  %1856 = vrot.lane.b32.xlu0 %v5137_v8, %s4778_s18  ;;  %1680 = vst.msk [vmem:[%s5040_s15 + $0x30] sm:$0xf] %vm1667_vm0, %v5280_v58  ;;  %v5291_v31 = vpack.c.bf16 %v2051_v2, %v2051_v2  ;;  %v1600_v33 = vmul.f32 0.125, %v1007_v29  ;;  %v5296_v35 = vpack.c.bf16 %v2959_v28, %v2959_v28  ;;  %v2506_v36 = vmul.f32 0.125, %v1120_v30 }
 0x154   : > { %3987 = vst.msk [vmem:[%s5040_s15 + $0x130] sm:$0xf] %vm1667_vm0, %v5282_v25  ;;  %v1009_v38 = vpop.f32.mrf.mxu0  ;;  %v1122_v40 = vpop.f32.mrf.mxu1 }
 0x155   : > { %3843 = vst.msk [vmem:[%s5040_s15 + $0xb0] sm:$0xf] %vm1667_vm0, %v5291_v31  ;;  %v5301_v3 = vpack.c.bf16 %v1600_v33, %v1600_v33  ;;  %v2052_v8 = vmul.f32 0.125, %v1009_v38  ;;  %4131 = vst.msk [vmem:[%s5040_s15 + $0x1b0] sm:$0xf] %vm1667_vm0, %v5296_v35  ;;  %v5306_v42 = vpack.c.bf16 %v2506_v36, %v2506_v36  ;;  %v2960_v43 = vmul.f32 0.125, %v1122_v40 }
 0x156   : > { %v1013_v45 = vpop.f32.mrf.mxu0  ;;  %v1126_v46 = vpop.f32.mrf.mxu1 }
 0x157   : > { %2764 = vrot.lane.b32.xlu0 %v5139_v10, %s4778_s18  ;;  %1858 = vrot.lane.b32.xlu1 %v5157_v20, %s4778_s18  ;;  %1681 = vst.msk [vmem:[%s5040_s15 + $0x34] sm:$0xf] %vm1667_vm0, %v5301_v3  ;;  %v5315_v49 = vpack.c.bf16 %v2052_v8, %v2052_v8  ;;  %3988 = vst.msk [vmem:[%s5040_s15 + $0x134] sm:$0xf] %vm1667_vm0, %v5306_v42  ;;  %v5320_v50 = vpack.c.bf16 %v2960_v43, %v2960_v43  ;;  %v1601_v51 = vmul.f32 0.125, %v1013_v45 }
 0x158   : > { %v2507_v55 = vmul.f32 0.125, %v1126_v46  ;;  %v1015_v57 = vpop.f32.mrf.mxu0  ;;  %v1128_v60 = vpop.f32.mrf.mxu1 }
 0x159   : > { %3844 = vst.msk [vmem:[%s5040_s15 + $0xb4] sm:$0xf] %vm1667_vm0, %v5315_v49  ;;  %4132 = vst.msk [vmem:[%s5040_s15 + $0x1b4] sm:$0xf] %vm1667_vm0, %v5320_v50  ;;  %v5328_v10 = vpack.c.bf16 %v1601_v51, %v1601_v51  ;;  %v2053_v20 = vmul.f32 0.125, %v1015_v57  ;;  %v2961_v48 = vmul.f32 0.125, %v1128_v60 }
 0x15a   : > { %v5330_v37 = vpack.c.bf16 %v2507_v55, %v2507_v55  ;;  %v1017_v61 = vpop.f32.mrf.mxu0  ;;  %v1130_v62 = vpop.f32.mrf.mxu1 }
 0x15b   : > { %2310 = vrot.lane.b32.xlu0 %v5147_v14, %s4778_s18  ;;  %2766 = vrot.lane.b32.xlu1 %v5162_v22, %s4778_s18  ;;  %1682 = vst.msk [vmem:[%s5040_s15 + $0x38] sm:$0xf] %vm1667_vm0, %v5328_v10  ;;  %v5339_v63 = vpack.c.bf16 %v2053_v20, %v2053_v20  ;;  %v1602_v4 = vmul.f32 0.125, %v1017_v61  ;;  %v5344_v6 = vpack.c.bf16 %v2961_v48, %v2961_v48  ;;  %v2508_v7 = vmul.f32 0.125, %v1130_v62 }
 0x15c   : > { %3989 = vst.msk [vmem:[%s5040_s15 + $0x138] sm:$0xf] %vm1667_vm0, %v5330_v37  ;;  %v1019_v9 = vpop.f32.mrf.mxu0  ;;  %v1132_v14 = vpop.f32.mrf.mxu1 }
 0x15d   : > { %3845 = vst.msk [vmem:[%s5040_s15 + $0xb8] sm:$0xf] %vm1667_vm0, %v5339_v63  ;;  %v5349_v22 = vpack.c.bf16 %v1602_v4, %v1602_v4  ;;  %v2054_v0 = vmul.f32 0.125, %v1019_v9  ;;  %4133 = vst.msk [vmem:[%s5040_s15 + $0x1b8] sm:$0xf] %vm1667_vm0, %v5344_v6  ;;  %v5354_v12 = vpack.c.bf16 %v2508_v7, %v2508_v7  ;;  %v2962_v13 = vmul.f32 0.125, %v1132_v14 }
 0x15e   : > { %v1169_v15 = vpop.f32.mrf.mxu0  ;;  %v1282_v19 = vpop.f32.mrf.mxu1 }
 0x15f   : > { %3218 = vrot.lane.b32.xlu0 %v5152_v16, %s4778_s18  ;;  %2312 = vrot.lane.b32.xlu1 %v5171_v26, %s4778_s18  ;;  %1683 = vst.msk [vmem:[%s5040_s15 + $0x3c] sm:$0xf] %vm1667_vm0, %v5349_v22  ;;  %v5369_v21 = vpack.c.bf16 %v2054_v0, %v2054_v0  ;;  %3990 = vst.msk [vmem:[%s5040_s15 + $0x13c] sm:$0xf] %vm1667_vm0, %v5354_v12  ;;  %v5374_v23 = vpack.c.bf16 %v2962_v13, %v2962_v13 }
 0x160   : > { %v5376_v24 = vpack.c.bf16 %v1169_v15, %v1169_v15  ;;  %v1171_v2 = vpop.f32.mrf.mxu0  ;;  %v5378_v16 = vpack.c.bf16 %v1282_v19, %v1282_v19  ;;  %v1284_v28 = vpop.f32.mrf.mxu1 }
 0x161   : > { %3846 = vst.msk [vmem:[%s5040_s15 + $0xbc] sm:$0xf] %vm1667_vm0, %v5369_v21  ;;  %4134 = vst.msk [vmem:[%s5040_s15 + $0x1bc] sm:$0xf] %vm1667_vm0, %v5374_v23  ;;  %v5389_v26 = vpack.c.bf16 %v1171_v2, %v1171_v2  ;;  %v5391_v29 = vpack.c.bf16 %v1284_v28, %v1284_v28 }
 0x162   : > { %1748 = vst.msk [vmem:[%s5360_s26] sm:$0xf] %vm1667_vm0, %v5376_v24  ;;  %v1173_v30 = vpop.f32.mrf.mxu0  ;;  %4007 = vst.msk [vmem:[%s5360_s26 + $0x100] sm:$0xf] %vm1667_vm0, %v5378_v16  ;;  %v1286_v33 = vpop.f32.mrf.mxu1 }
 0x163   : > { %3220 = vrot.lane.b32.xlu1 %v5176_v27, %s4778_s18  ;;  %1860 = vrot.lane.b32.xlu0 %v5184_v32, %s4778_s18  ;;  %3863 = vst.msk [vmem:[%s5360_s26 + $0x80] sm:$0xf] %vm1667_vm0, %v5389_v26  ;;  %v5403_v36 = vpack.c.bf16 %v1173_v30, %v1173_v30  ;;  %4151 = vst.msk [vmem:[%s5360_s26 + $0x180] sm:$0xf] %vm1667_vm0, %v5391_v29  ;;  %v5408_v38 = vpack.c.bf16 %v1286_v33, %v1286_v33 }
 0x164   : > { %v1175_v40 = vpop.f32.mrf.mxu0  ;;  %v1288_v8 = vpop.f32.mrf.mxu1 }
 0x165   : > { %1749 = vst.msk [vmem:[%s5360_s26 + $0x4] sm:$0xf] %vm1667_vm0, %v5403_v36  ;;  %v5413_v27 = vpack.c.bf16 %v1175_v40, %v1175_v40  ;;  %4008 = vst.msk [vmem:[%s5360_s26 + $0x104] sm:$0xf] %vm1667_vm0, %v5408_v38  ;;  %v5418_v32 = vpack.c.bf16 %v1288_v8, %v1288_v8 }
 0x166   : > { %v1179_v43 = vpop.f32.mrf.mxu0  ;;  %v1292_v45 = vpop.f32.mrf.mxu1 }
 0x167   : > { %2768 = vrot.lane.b32.xlu0 %v5186_v34, %s4778_s18  ;;  %1862 = vrot.lane.b32.xlu1 %v5205_v44, %s4778_s18  ;;  %3864 = vst.msk [vmem:[%s5360_s26 + $0x84] sm:$0xf] %vm1667_vm0, %v5413_v27  ;;  %4152 = vst.msk [vmem:[%s5360_s26 + $0x184] sm:$0xf] %vm1667_vm0, %v5418_v32  ;;  %v5430_v46 = vpack.c.bf16 %v1179_v43, %v1179_v43  ;;  %v5432_v51 = vpack.c.bf16 %v1292_v45, %v1292_v45 }
 0x168   : > { %v1181_v55 = vpop.f32.mrf.mxu0  ;;  %v1294_v57 = vpop.f32.mrf.mxu1 }
 0x169   : > { %1750 = vst.msk [vmem:[%s5360_s26 + $0x8] sm:$0xf] %vm1667_vm0, %v5430_v46  ;;  %v5437_v34 = vpack.c.bf16 %v1181_v55, %v1181_v55  ;;  %4009 = vst.msk [vmem:[%s5360_s26 + $0x108] sm:$0xf] %vm1667_vm0, %v5432_v51  ;;  %v5442_v44 = vpack.c.bf16 %v1294_v57, %v1294_v57 }
 0x16a   : > { %v1183_v60 = vpop.f32.mrf.mxu0  ;;  %v1296_v20 = vpop.f32.mrf.mxu1 }
 0x16b   : > { %2314 = vrot.lane.b32.xlu0 %v5195_v39, %s4778_s18  ;;  %2770 = vrot.lane.b32.xlu1 %v5210_v47, %s4778_s18  ;;  %3865 = vst.msk [vmem:[%s5360_s26 + $0x88] sm:$0xf] %vm1667_vm0, %v5437_v34  ;;  %v5451_v48 = vpack.c.bf16 %v1183_v60, %v1183_v60  ;;  %4153 = vst.msk [vmem:[%s5360_s26 + $0x188] sm:$0xf] %vm1667_vm0, %v5442_v44  ;;  %v5456_v61 = vpack.c.bf16 %v1296_v20, %v1296_v20 }
 0x16c   : > { %v1185_v62 = vpop.f32.mrf.mxu0  ;;  %v1298_v4 = vpop.f32.mrf.mxu1 }
 0x16d   : > { %1751 = vst.msk [vmem:[%s5360_s26 + $0xc] sm:$0xf] %vm1667_vm0, %v5451_v48  ;;  %v5461_v39 = vpack.c.bf16 %v1185_v62, %v1185_v62  ;;  %4010 = vst.msk [vmem:[%s5360_s26 + $0x10c] sm:$0xf] %vm1667_vm0, %v5456_v61  ;;  %v5466_v47 = vpack.c.bf16 %v1298_v4, %v1298_v4 }
 0x16e   : > { %v1189_v7 = vpop.f32.mrf.mxu0  ;;  %v1302_v9 = vpop.f32.mrf.mxu1 }
 0x16f   : > { %3222 = vrot.lane.b32.xlu0 %v5200_v41, %s4778_s18  ;;  %2316 = vrot.lane.b32.xlu1 %v5219_v53, %s4778_s18  ;;  %3866 = vst.msk [vmem:[%s5360_s26 + $0x8c] sm:$0xf] %vm1667_vm0, %v5461_v39  ;;  %4154 = vst.msk [vmem:[%s5360_s26 + $0x18c] sm:$0xf] %vm1667_vm0, %v5466_v47  ;;  %v5478_v14 = vpack.c.bf16 %v1189_v7, %v1189_v7  ;;  %v5480_v0 = vpack.c.bf16 %v1302_v9, %v1302_v9 }
 0x170   : > { %v1191_v13 = vpop.f32.mrf.mxu0  ;;  %v1304_v15 = vpop.f32.mrf.mxu1 }
 0x171   : > { %1752 = vst.msk [vmem:[%s5360_s26 + $0x10] sm:$0xf] %vm1667_vm0, %v5478_v14  ;;  %v5485_v41 = vpack.c.bf16 %v1191_v13, %v1191_v13  ;;  %4011 = vst.msk [vmem:[%s5360_s26 + $0x110] sm:$0xf] %vm1667_vm0, %v5480_v0  ;;  %v5490_v53 = vpack.c.bf16 %v1304_v15, %v1304_v15 }
 0x172   : > { %v1193_v19 = vpop.f32.mrf.mxu0  ;;  %v1306_v2 = vpop.f32.mrf.mxu1 }
 0x173   : > { %3224 = vrot.lane.b32.xlu1 %v5224_v54, %s4778_s18  ;;  %1864 = vrot.lane.b32.xlu0 %v5232_v52, %s4778_s18  ;;  %3867 = vst.msk [vmem:[%s5360_s26 + $0x90] sm:$0xf] %vm1667_vm0, %v5485_v41  ;;  %v5499_v28 = vpack.c.bf16 %v1193_v19, %v1193_v19  ;;  %4155 = vst.msk [vmem:[%s5360_s26 + $0x190] sm:$0xf] %vm1667_vm0, %v5490_v53  ;;  %v5504_v30 = vpack.c.bf16 %v1306_v2, %v1306_v2 }
 0x174   : > { %v1195_v33 = vpop.f32.mrf.mxu0  ;;  %v1308_v40 = vpop.f32.mrf.mxu1 }
 0x175   : > { %1753 = vst.msk [vmem:[%s5360_s26 + $0x14] sm:$0xf] %vm1667_vm0, %v5499_v28  ;;  %v5509_v54 = vpack.c.bf16 %v1195_v33, %v1195_v33  ;;  %4012 = vst.msk [vmem:[%s5360_s26 + $0x114] sm:$0xf] %vm1667_vm0, %v5504_v30  ;;  %v5514_v52 = vpack.c.bf16 %v1308_v40, %v1308_v40 }
 0x176   : > { %v1199_v8 = vpop.f32.mrf.mxu0  ;;  %v1312_v43 = vpop.f32.mrf.mxu1 }
 0x177   : > { %2772 = vrot.lane.b32.xlu0 %v5234_v59, %s4778_s18  ;;  %1866 = vrot.lane.b32.xlu1 %v5253_v56, %s4778_s18  ;;  %3868 = vst.msk [vmem:[%s5360_s26 + $0x94] sm:$0xf] %vm1667_vm0, %v5509_v54  ;;  %4156 = vst.msk [vmem:[%s5360_s26 + $0x194] sm:$0xf] %vm1667_vm0, %v5514_v52  ;;  %v5526_v45 = vpack.c.bf16 %v1199_v8, %v1199_v8  ;;  %v5528_v55 = vpack.c.bf16 %v1312_v43, %v1312_v43 }
 0x178   : > { %v1201_v57 = vpop.f32.mrf.mxu0  ;;  %v1314_v60 = vpop.f32.mrf.mxu1 }
 0x179   : > { %1754 = vst.msk [vmem:[%s5360_s26 + $0x18] sm:$0xf] %vm1667_vm0, %v5526_v45  ;;  %v5533_v59 = vpack.c.bf16 %v1201_v57, %v1201_v57  ;;  %4013 = vst.msk [vmem:[%s5360_s26 + $0x118] sm:$0xf] %vm1667_vm0, %v5528_v55  ;;  %v5538_v56 = vpack.c.bf16 %v1314_v60, %v1314_v60 }
 0x17a   : > { %v1203_v20 = vpop.f32.mrf.mxu0  ;;  %v1316_v62 = vpop.f32.mrf.mxu1 }
 0x17b   : > { %2318 = vrot.lane.b32.xlu0 %v5243_v1, %s4778_s18  ;;  %2774 = vrot.lane.b32.xlu1 %v5258_v11, %s4778_s18  ;;  %3869 = vst.msk [vmem:[%s5360_s26 + $0x98] sm:$0xf] %vm1667_vm0, %v5533_v59  ;;  %v5547_v4 = vpack.c.bf16 %v1203_v20, %v1203_v20  ;;  %4157 = vst.msk [vmem:[%s5360_s26 + $0x198] sm:$0xf] %vm1667_vm0, %v5538_v56  ;;  %v5552_v7 = vpack.c.bf16 %v1316_v62, %v1316_v62 }
 0x17c   : > { %v1205_v9 = vpop.f32.mrf.mxu0  ;;  %v1318_v13 = vpop.f32.mrf.mxu1 }
 0x17d   : > { %1755 = vst.msk [vmem:[%s5360_s26 + $0x1c] sm:$0xf] %vm1667_vm0, %v5547_v4  ;;  %v5557_v1 = vpack.c.bf16 %v1205_v9, %v1205_v9  ;;  %4014 = vst.msk [vmem:[%s5360_s26 + $0x11c] sm:$0xf] %vm1667_vm0, %v5552_v7  ;;  %v5562_v11 = vpack.c.bf16 %v1318_v13, %v1318_v13 }
 0x17e   : > { %v1209_v15 = vpop.f32.mrf.mxu0  ;;  %v1322_v19 = vpop.f32.mrf.mxu1 }
 0x17f   : > { %3226 = vrot.lane.b32.xlu0 %v5248_v5, %s4778_s18  ;;  %2320 = vrot.lane.b32.xlu1 %v5267_v17, %s4778_s18  ;;  %3870 = vst.msk [vmem:[%s5360_s26 + $0x9c] sm:$0xf] %vm1667_vm0, %v5557_v1  ;;  %4158 = vst.msk [vmem:[%s5360_s26 + $0x19c] sm:$0xf] %vm1667_vm0, %v5562_v11  ;;  %v5574_v2 = vpack.c.bf16 %v1209_v15, %v1209_v15  ;;  %v5576_v33 = vpack.c.bf16 %v1322_v19, %v1322_v19 }
 0x180   : > { %v1211_v40 = vpop.f32.mrf.mxu0  ;;  %v1324_v8 = vpop.f32.mrf.mxu1 }
 0x181   : > { %1756 = vst.msk [vmem:[%s5360_s26 + $0x20] sm:$0xf] %vm1667_vm0, %v5574_v2  ;;  %v5581_v5 = vpack.c.bf16 %v1211_v40, %v1211_v40  ;;  %4015 = vst.msk [vmem:[%s5360_s26 + $0x120] sm:$0xf] %vm1667_vm0, %v5576_v33  ;;  %v5586_v17 = vpack.c.bf16 %v1324_v8, %v1324_v8 }
 0x182   : > { %v1213_v43 = vpop.f32.mrf.mxu0  ;;  %v1326_v57 = vpop.f32.mrf.mxu1 }
 0x183   : > { %3228 = vrot.lane.b32.xlu1 %v5272_v18, %s4778_s18  ;;  %1868 = vrot.lane.b32.xlu0 %v5280_v58, %s4778_s18  ;;  %3871 = vst.msk [vmem:[%s5360_s26 + $0xa0] sm:$0xf] %vm1667_vm0, %v5581_v5  ;;  %v5595_v60 = vpack.c.bf16 %v1213_v43, %v1213_v43  ;;  %4159 = vst.msk [vmem:[%s5360_s26 + $0x1a0] sm:$0xf] %vm1667_vm0, %v5586_v17  ;;  %v5600_v20 = vpack.c.bf16 %v1326_v57, %v1326_v57 }
 0x184   : > { %v1215_v62 = vpop.f32.mrf.mxu0  ;;  %v1328_v9 = vpop.f32.mrf.mxu1 }
 0x185   : > { %1757 = vst.msk [vmem:[%s5360_s26 + $0x24] sm:$0xf] %vm1667_vm0, %v5595_v60  ;;  %v5605_v18 = vpack.c.bf16 %v1215_v62, %v1215_v62  ;;  %4016 = vst.msk [vmem:[%s5360_s26 + $0x124] sm:$0xf] %vm1667_vm0, %v5600_v20  ;;  %v5610_v58 = vpack.c.bf16 %v1328_v9, %v1328_v9 }
 0x186   : > { %v1219_v13 = vpop.f32.mrf.mxu0  ;;  %v1332_v15 = vpop.f32.mrf.mxu1 }
 0x187   : > { %2776 = vrot.lane.b32.xlu0 %v5282_v25, %s4778_s18  ;;  %1870 = vrot.lane.b32.xlu1 %v5301_v3, %s4778_s18  ;;  %3872 = vst.msk [vmem:[%s5360_s26 + $0xa4] sm:$0xf] %vm1667_vm0, %v5605_v18  ;;  %4160 = vst.msk [vmem:[%s5360_s26 + $0x1a4] sm:$0xf] %vm1667_vm0, %v5610_v58  ;;  %v5622_v19 = vpack.c.bf16 %v1219_v13, %v1219_v13  ;;  %v5624_v40 = vpack.c.bf16 %v1332_v15, %v1332_v15 }
 0x188   : > { %v1221_v8 = vpop.f32.mrf.mxu0  ;;  %v1334_v43 = vpop.f32.mrf.mxu1 }
 0x189   : > { %1758 = vst.msk [vmem:[%s5360_s26 + $0x28] sm:$0xf] %vm1667_vm0, %v5622_v19  ;;  %v5629_v25 = vpack.c.bf16 %v1221_v8, %v1221_v8  ;;  %4017 = vst.msk [vmem:[%s5360_s26 + $0x128] sm:$0xf] %vm1667_vm0, %v5624_v40  ;;  %v5634_v3 = vpack.c.bf16 %v1334_v43, %v1334_v43 }
 0x18a   : > { %v1223_v57 = vpop.f32.mrf.mxu0  ;;  %v1336_v62 = vpop.f32.mrf.mxu1 }
 0x18b   : > { %6782 = vst [vmem:[#allocation8_spill] sm:$0xff] %v5634_v3  ;;  %2322 = vrot.lane.b32.xlu0 %v5291_v31, %s4778_s18  ;;  %2778 = vrot.lane.b32.xlu1 %v5306_v42, %s4778_s18  ;;  %3873 = vst.msk [vmem:[%s5360_s26 + $0xa8] sm:$0xf] %vm1667_vm0, %v5629_v25  ;;  %v5643_v9 = vpack.c.bf16 %v1223_v57, %v1223_v57  ;;  %v5648_v13 = vpack.c.bf16 %v1336_v62, %v1336_v62 }
 0x18c   : > { %4161 = vst.msk [vmem:[%s5360_s26 + $0x1a8] sm:$0xf] %vm1667_vm0, %v5634_v3  ;;  %v1225_v15 = vpop.f32.mrf.mxu0  ;;  %v1338_v8 = vpop.f32.mrf.mxu1 }
 0x18d   : > { %1759 = vst.msk [vmem:[%s5360_s26 + $0x2c] sm:$0xf] %vm1667_vm0, %v5643_v9  ;;  %v5653_v31 = vpack.c.bf16 %v1225_v15, %v1225_v15  ;;  %4018 = vst.msk [vmem:[%s5360_s26 + $0x12c] sm:$0xf] %vm1667_vm0, %v5648_v13  ;;  %v5658_v42 = vpack.c.bf16 %v1338_v8, %v1338_v8 }
 0x18e   : > { %v1229_v43 = vpop.f32.mrf.mxu0  ;;  %v1342_v57 = vpop.f32.mrf.mxu1 }
 0x18f   : > { %6783 = vst [vmem:[#allocation9_spill] sm:$0xff] %v5658_v42  ;;  %3230 = vrot.lane.b32.xlu0 %v5296_v35, %s4778_s18  ;;  %2324 = vrot.lane.b32.xlu1 %v5315_v49, %s4778_s18  ;;  %3874 = vst.msk [vmem:[%s5360_s26 + $0xac] sm:$0xf] %vm1667_vm0, %v5653_v31  ;;  %v5670_v62 = vpack.c.bf16 %v1229_v43, %v1229_v43  ;;  %v5672_v15 = vpack.c.bf16 %v1342_v57, %v1342_v57 }
 0x190   : > { %4162 = vst.msk [vmem:[%s5360_s26 + $0x1ac] sm:$0xf] %vm1667_vm0, %v5658_v42  ;;  %v1231_v8 = vpop.f32.mrf.mxu0  ;;  %v1344_v3 = vpop.f32.mrf.mxu1 }
 0x191   : > { %6784 = vst [vmem:[#allocation10_spill] sm:$0xff] %v5670_v62  ;;  %6785 = vst [vmem:[#allocation11_spill] sm:$0xff] %v5672_v15  ;;  %v5677_v35 = vpack.c.bf16 %v1231_v8, %v1231_v8  ;;  %v5682_v49 = vpack.c.bf16 %v1344_v3, %v1344_v3 }
 0x192   : > { %1760 = vst.msk [vmem:[%s5360_s26 + $0x30] sm:$0xf] %vm1667_vm0, %v5670_v62  ;;  %4019 = vst.msk [vmem:[%s5360_s26 + $0x130] sm:$0xf] %vm1667_vm0, %v5672_v15  ;;  %v1233_v42 = vpop.f32.mrf.mxu0  ;;  %v1346_v43 = vpop.f32.mrf.mxu1 }
 0x193   : > { %6786 = vst [vmem:[#allocation12_spill] sm:$0xff] %v5677_v35  ;;  %6787 = vst [vmem:[#allocation13_spill] sm:$0xff] %v5682_v49  ;;  %3232 = vrot.lane.b32.xlu1 %v5320_v50, %s4778_s18  ;;  %1872 = vrot.lane.b32.xlu0 %v5328_v10, %s4778_s18  ;;  %v5691_v57 = vpack.c.bf16 %v1233_v42, %v1233_v42  ;;  %v5696_v3 = vpack.c.bf16 %v1346_v43, %v1346_v43 }
 0x194   : > { %3875 = vst.msk [vmem:[%s5360_s26 + $0xb0] sm:$0xf] %vm1667_vm0, %v5677_v35  ;;  %4163 = vst.msk [vmem:[%s5360_s26 + $0x1b0] sm:$0xf] %vm1667_vm0, %v5682_v49  ;;  %v1235_v8 = vpop.f32.mrf.mxu0  ;;  %v1348_v15 = vpop.f32.mrf.mxu1 }
 0x195   : > { %6788 = vst [vmem:[#allocation14_spill] sm:$0xff] %v5696_v3  ;;  %v1845_v62 = vpop.permute.xlu0 %1844  ;;  %1761 = vst.msk [vmem:[%s5360_s26 + $0x34] sm:$0xf] %vm1667_vm0, %v5691_v57  ;;  %v5701_v50 = vpack.c.bf16 %v1235_v8, %v1235_v8  ;;  %v5706_v10 = vpack.c.bf16 %v1348_v15, %v1348_v15 }
 0x196   : > { %4020 = vst.msk [vmem:[%s5360_s26 + $0x134] sm:$0xf] %vm1667_vm0, %v5696_v3  ;;  %3767 = vst.msk [vmem:[%s5040_s15 + $0x40] sm:$0xf] %vm1667_vm0, %v1845_v62  ;;  %v1239_v42 = vpop.f32.mrf.mxu0  ;;  %v1352_v43 = vpop.f32.mrf.mxu1 }
 0x197   : > { %2780 = vrot.lane.b32.xlu0 %v5330_v37, %s4778_s18  ;;  %1874 = vrot.lane.b32.xlu1 %v5349_v22, %s4778_s18  ;;  %3876 = vst.msk [vmem:[%s5360_s26 + $0xb4] sm:$0xf] %vm1667_vm0, %v5701_v50  ;;  %4164 = vst.msk [vmem:[%s5360_s26 + $0x1b4] sm:$0xf] %vm1667_vm0, %v5706_v10  ;;  %v5720_v15 = vpack.c.bf16 %v1239_v42, %v1239_v42  ;;  %v5722_v62 = vpack.c.bf16 %v1352_v43, %v1352_v43 }
 0x198   : > { %v1241_v8 = vpop.f32.mrf.mxu0  ;;  %v1354_v49 = vpop.f32.mrf.mxu1 }
 0x199   : > { %6789 = vst [vmem:[#allocation15_spill] sm:$0xff] %v5722_v62  ;;  %v2755_v3 = vpop.permute.xlu1 %2754  ;;  %v2753_v35 = vpop.permute.xlu0 %2752  ;;  %1762 = vst.msk [vmem:[%s5360_s26 + $0x38] sm:$0xf] %vm1667_vm0, %v5720_v15  ;;  %v5727_v37 = vpack.c.bf16 %v1241_v8, %v1241_v8  ;;  %v5732_v22 = vpack.c.bf16 %v1354_v49, %v1354_v49 }
 0x19a   : > { %4021 = vst.msk [vmem:[%s5360_s26 + $0x138] sm:$0xf] %vm1667_vm0, %v5722_v62  ;;  %4056 = vst.msk [vmem:[%s5040_s15 + $0x144] sm:$0xf] %vm1667_vm0, %v2755_v3  ;;  %v1243_v42 = vpop.f32.mrf.mxu0  ;;  %v1356_v43 = vpop.f32.mrf.mxu1 }
 0x19b   : > { %6790 = vst [vmem:[#allocation16_spill] sm:$0xff] %v5727_v37  ;;  %6791 = vst [vmem:[#allocation17_spill] sm:$0xff] %v5732_v22  ;;  %2326 = vrot.lane.b32.xlu0 %v5339_v63, %s4778_s18  ;;  %2782 = vrot.lane.b32.xlu1 %v5354_v12, %s4778_s18  ;;  %v5745_v49 = vpack.c.bf16 %v1243_v42, %v1243_v42 }
 0x19c   : > { %4055 = vst.msk [vmem:[%s5040_s15 + $0x140] sm:$0xf] %vm1667_vm0, %v2753_v35  ;;  %3877 = vst.msk [vmem:[%s5360_s26 + $0xb8] sm:$0xf] %vm1667_vm0, %v5727_v37  ;;  %v5750_v35 = vpack.c.bf16 %v1356_v43, %v1356_v43  ;;  %v1245_v3 = vpop.f32.mrf.mxu0  ;;  %v1358_v8 = vpop.f32.mrf.mxu1 }
 0x19d   : > { %4165 = vst.msk [vmem:[%s5360_s26 + $0x1b8] sm:$0xf] %vm1667_vm0, %v5732_v22  ;;  %v2299_v62 = vpop.permute.xlu0 %2298  ;;  %v2301_v63 = vpop.permute.xlu1 %2300  ;;  %1763 = vst.msk [vmem:[%s5360_s26 + $0x3c] sm:$0xf] %vm1667_vm0, %v5745_v49  ;;  %v5755_v12 = vpack.c.bf16 %v1245_v3, %v1245_v3  ;;  %v5760_v42 = vpack.c.bf16 %v1358_v8, %v1358_v8 }
 0x19e   : > { %6792 = vst [vmem:[#allocation18_spill] sm:$0xff] %v5750_v35  ;;  %4022 = vst.msk [vmem:[%s5360_s26 + $0x13c] sm:$0xf] %vm1667_vm0, %v5750_v35  ;;  %v1395_v43 = vpop.f32.mrf.mxu0  ;;  %v1508_v3 = vpop.f32.mrf.mxu1 }
 0x19f   : > { %3911 = vst.msk [vmem:[%s5040_s15 + $0xc0] sm:$0xf] %vm1667_vm0, %v2299_v62  ;;  %3912 = vst.msk [vmem:[%s5040_s15 + $0xc4] sm:$0xf] %vm1667_vm0, %v2301_v63  ;;  %3234 = vrot.lane.b32.xlu0 %v5344_v6, %s4778_s18  ;;  %2328 = vrot.lane.b32.xlu1 %v5369_v21, %s4778_s18  ;;  %v5782_v62 = vpack.c.bf16 %v1395_v43, %v1395_v43  ;;  %v5784_v8 = vpack.c.bf16 %v1508_v3, %v1508_v3 }
 0x1a0   : > { %3878 = vst.msk [vmem:[%s5360_s26 + $0xbc] sm:$0xf] %vm1667_vm0, %v5755_v12  ;;  %4166 = vst.msk [vmem:[%s5360_s26 + $0x1bc] sm:$0xf] %vm1667_vm0, %v5760_v42  ;;  %v1397_v63 = vpop.f32.mrf.mxu0  ;;  %v1510_v22 = vpop.f32.mrf.mxu1 }
 0x1a1   : > { %6793 = vst [vmem:[#allocation19_spill] sm:$0xff] %v5784_v8  ;;  %v3207_v35 = vpop.permute.xlu0 %3206  ;;  %v3209_v37 = vpop.permute.xlu1 %3208  ;;  %1828 = vst.msk [vmem:[%s5770_s30] sm:$0xf] %vm1667_vm0, %v5782_v62  ;;  %v5789_v6 = vpack.c.bf16 %v1397_v63, %v1397_v63  ;;  %v5794_v21 = vpack.c.bf16 %v1510_v22, %v1510_v22 }
 0x1a2   : > { %4039 = vst.msk [vmem:[%s5770_s30 + $0x100] sm:$0xf] %vm1667_vm0, %v5784_v8  ;;  %4199 = vst.msk [vmem:[%s5040_s15 + $0x1c0] sm:$0xf] %vm1667_vm0, %v3207_v35  ;;  %v1399_v43 = vpop.f32.mrf.mxu0  ;;  %v1512_v3 = vpop.f32.mrf.mxu1 }
 0x1a3   : > { %4200 = vst.msk [vmem:[%s5040_s15 + $0x1c4] sm:$0xf] %vm1667_vm0, %v3209_v37  ;;  %3236 = vrot.lane.b32.xlu1 %v5374_v23, %s4778_s18  ;;  %1909 = vrot.lane.b32.xlu0 %v5376_v24, %s4778_s18  ;;  %3895 = vst.msk [vmem:[%s5770_s30 + $0x80] sm:$0xf] %vm1667_vm0, %v5789_v6  ;;  %v5807_v22 = vpack.c.bf16 %v1399_v43, %v1399_v43  ;;  %v5812_v37 = vpack.c.bf16 %v1512_v3, %v1512_v3 }
 0x1a4   : > { %4183 = vst.msk [vmem:[%s5770_s30 + $0x180] sm:$0xf] %vm1667_vm0, %v5794_v21  ;;  %v1401_v35 = vpop.f32.mrf.mxu0  ;;  %v1514_v63 = vpop.f32.mrf.mxu1 }
 0x1a5   : > { %v1847_v23 = vpop.permute.xlu0 %1846  ;;  %v1849_v8 = vpop.permute.xlu1 %1848  ;;  %1829 = vst.msk [vmem:[%s5770_s30 + $0x4] sm:$0xf] %vm1667_vm0, %v5807_v22  ;;  %v5817_v24 = vpack.c.bf16 %v1401_v35, %v1401_v35  ;;  %4040 = vst.msk [vmem:[%s5770_s30 + $0x104] sm:$0xf] %vm1667_vm0, %v5812_v37  ;;  %v5822_v43 = vpack.c.bf16 %v1514_v63, %v1514_v63 }
 0x1a6   : > { %3768 = vst.msk [vmem:[%s5040_s15 + $0x44] sm:$0xf] %vm1667_vm0, %v1847_v23  ;;  %3769 = vst.msk [vmem:[%s5040_s15 + $0x48] sm:$0xf] %vm1667_vm0, %v1849_v8  ;;  %v1405_v8 = vpop.f32.mrf.mxu0 }
 0x1a7   : > { %2817 = vrot.lane.b32.xlu0 %v5378_v16, %s4778_s18  ;;  %1911 = vrot.lane.b32.xlu1 %v5403_v36, %s4778_s18  ;;  %3896 = vst.msk [vmem:[%s5770_s30 + $0x84] sm:$0xf] %vm1667_vm0, %v5817_v24  ;;  %4184 = vst.msk [vmem:[%s5770_s30 + $0x184] sm:$0xf] %vm1667_vm0, %v5822_v43  ;;  %v5846_v16 = vpack.c.bf16 %v1405_v8, %v1405_v8 }
 0x1a8   : > { %v1407_v36 = vpop.f32.mrf.mxu0 }
 0x1a9   : > { %v2757_v3 = vpop.permute.xlu0 %2756  ;;  %v1851_v35 = vpop.permute.xlu1 %1850  ;;  %6794 = vst [vmem:[#allocation20_spill] sm:$0xff] %v5846_v16  ;;  %1830 = vst.msk [vmem:[%s5770_s30 + $0x8] sm:$0xf] %vm1667_vm0, %v5846_v16 }
 0x1aa   : > { %4057 = vst.msk [vmem:[%s5040_s15 + $0x148] sm:$0xf] %vm1667_vm0, %v2757_v3  ;;  %3770 = vst.msk [vmem:[%s5040_s15 + $0x4c] sm:$0xf] %vm1667_vm0, %v1851_v35  ;;  %v5851_v3 = vpack.c.bf16 %v1407_v36, %v1407_v36 }
 0x1ab   : > { %2363 = vrot.lane.b32.xlu0 %v5389_v26, %s4778_s18  ;;  %2819 = vrot.lane.b32.xlu1 %v5408_v38, %s4778_s18  ;;  %v1409_v26 = vpop.f32.mrf.mxu0  ;;  %v1518_v38 = vpop.f32.mrf.mxu1 }
 0x1ac   : > { %3897 = vst.msk [vmem:[%s5770_s30 + $0x88] sm:$0xf] %vm1667_vm0, %v5851_v3  ;;  %v5864_v35 = vpack.c.bf16 %v1409_v26, %v1409_v26  ;;  %v5866_v8 = vpack.c.bf16 %v1518_v38, %v1518_v38 }
 0x1ad   : > { %v2303_v63 = vpop.permute.xlu0 %2302  ;;  %v2759_v23 = vpop.permute.xlu1 %2758 }
 0x1ae   : > { %3913 = vst.msk [vmem:[%s5040_s15 + $0xc8] sm:$0xf] %vm1667_vm0, %v2303_v63  ;;  %4058 = vst.msk [vmem:[%s5040_s15 + $0x14c] sm:$0xf] %vm1667_vm0, %v2759_v23  ;;  %v1411_v36 = vpop.f32.mrf.mxu0  ;;  %v1520_v63 = vpop.f32.mrf.mxu1 }
 0x1af   : > { %3271 = vrot.lane.b32.xlu0 %v5391_v29, %s4778_s18  ;;  %2365 = vrot.lane.b32.xlu1 %v5413_v27, %s4778_s18  ;;  %1831 = vst.msk [vmem:[%s5770_s30 + $0xc] sm:$0xf] %vm1667_vm0, %v5864_v35  ;;  %4041 = vst.msk [vmem:[%s5770_s30 + $0x108] sm:$0xf] %vm1667_vm0, %v5866_v8  ;;  %v5874_v29 = vpack.c.bf16 %v1411_v36, %v1411_v36  ;;  %v5876_v27 = vpack.c.bf16 %v1520_v63, %v1520_v63 }
 0x1b0   : > { %v1522_v26 = vpop.f32.mrf.mxu1 }
 0x1b1   : > { %v3211_v23 = vpop.permute.xlu0 %3210  ;;  %v2305_v16 = vpop.permute.xlu1 %2304  ;;  %3898 = vst.msk [vmem:[%s5770_s30 + $0x8c] sm:$0xf] %vm1667_vm0, %v5874_v29  ;;  %4185 = vst.msk [vmem:[%s5770_s30 + $0x188] sm:$0xf] %vm1667_vm0, %v5876_v27  ;;  %v5892_v38 = vpack.c.bf16 %v1522_v26, %v1522_v26 }
 0x1b2   : > { %4201 = vst.msk [vmem:[%s5040_s15 + $0x1c8] sm:$0xf] %vm1667_vm0, %v3211_v23  ;;  %3914 = vst.msk [vmem:[%s5040_s15 + $0xcc] sm:$0xf] %vm1667_vm0, %v2305_v16  ;;  %v1524_v36 = vpop.f32.mrf.mxu1  ;;  %v1415_v26 = vpop.f32.mrf.mxu0 }
 0x1b3   : > { %3273 = vrot.lane.b32.xlu1 %v5418_v32, %s4778_s18  ;;  %1913 = vrot.lane.b32.xlu0 %v5430_v46, %s4778_s18  ;;  %4042 = vst.msk [vmem:[%s5770_s30 + $0x10c] sm:$0xf] %vm1667_vm0, %v5892_v38  ;;  %v5897_v32 = vpack.c.bf16 %v1524_v36, %v1524_v36 }
 0x1b5   : > { %v3213_v16 = vpop.permute.xlu1 %3212  ;;  %v1853_v63 = vpop.permute.xlu0 %1852  ;;  %4186 = vst.msk [vmem:[%s5770_s30 + $0x18c] sm:$0xf] %vm1667_vm0, %v5897_v32 }
 0x1b6   : > { %4202 = vst.msk [vmem:[%s5040_s15 + $0x1cc] sm:$0xf] %vm1667_vm0, %v3213_v16  ;;  %3771 = vst.msk [vmem:[%s5040_s15 + $0x50] sm:$0xf] %vm1667_vm0, %v1853_v63 }
 0x1b7   : > { %2821 = vrot.lane.b32.xlu0 %v5432_v51, %s4778_s18  ;;  %1915 = vrot.lane.b32.xlu1 %v5451_v48, %s4778_s18  ;;  %v5918_v51 = vpack.c.bf16 %v1415_v26, %v1415_v26  ;;  %v1417_v48 = vpop.f32.mrf.mxu0 }
 0x1b8   : > { %v5923_v63 = vpack.c.bf16 %v1417_v48, %v1417_v48 }
 0x1b9   : > { %v2761_v46 = vpop.permute.xlu0 %2760  ;;  %v1855_v23 = vpop.permute.xlu1 %1854  ;;  %1832 = vst.msk [vmem:[%s5770_s30 + $0x10] sm:$0xf] %vm1667_vm0, %v5918_v51 }
 0x1ba   : > { %4059 = vst.msk [vmem:[%s5040_s15 + $0x150] sm:$0xf] %vm1667_vm0, %v2761_v46  ;;  %3772 = vst.msk [vmem:[%s5040_s15 + $0x54] sm:$0xf] %vm1667_vm0, %v1855_v23 }
 0x1bb   : > { %2367 = vrot.lane.b32.xlu0 %v5437_v34, %s4778_s18  ;;  %2823 = vrot.lane.b32.xlu1 %v5456_v61, %s4778_s18  ;;  %v1419_v34 = vpop.f32.mrf.mxu0  ;;  %v1528_v61 = vpop.f32.mrf.mxu1  ;;  %3899 = vst.msk [vmem:[%s5770_s30 + $0x90] sm:$0xf] %vm1667_vm0, %v5923_v63 }
 0x1bc   : > { %v5936_v46 = vpack.c.bf16 %v1419_v34, %v1419_v34  ;;  %v5938_v23 = vpack.c.bf16 %v1528_v61, %v1528_v61 }
 0x1bd   : > { %v2307_v36 = vpop.permute.xlu0 %2306  ;;  %v2763_v16 = vpop.permute.xlu1 %2762 }
 0x1be   : > { %3915 = vst.msk [vmem:[%s5040_s15 + $0xd0] sm:$0xf] %vm1667_vm0, %v2307_v36  ;;  %4060 = vst.msk [vmem:[%s5040_s15 + $0x154] sm:$0xf] %vm1667_vm0, %v2763_v16  ;;  %v1421_v26 = vpop.f32.mrf.mxu0  ;;  %v1530_v48 = vpop.f32.mrf.mxu1 }
 0x1bf   : > { %3275 = vrot.lane.b32.xlu0 %v5442_v44, %s4778_s18  ;;  %2369 = vrot.lane.b32.xlu1 %v5461_v39, %s4778_s18  ;;  %1833 = vst.msk [vmem:[%s5770_s30 + $0x14] sm:$0xf] %vm1667_vm0, %v5936_v46  ;;  %4043 = vst.msk [vmem:[%s5770_s30 + $0x110] sm:$0xf] %vm1667_vm0, %v5938_v23  ;;  %v5946_v44 = vpack.c.bf16 %v1421_v26, %v1421_v26  ;;  %v5948_v39 = vpack.c.bf16 %v1530_v48, %v1530_v48 }
 0x1c0   : > { %v1532_v34 = vpop.f32.mrf.mxu1 }
 0x1c1   : > { %v3215_v36 = vpop.permute.xlu0 %3214  ;;  %v2309_v16 = vpop.permute.xlu1 %2308  ;;  %3900 = vst.msk [vmem:[%s5770_s30 + $0x94] sm:$0xf] %vm1667_vm0, %v5946_v44  ;;  %4187 = vst.msk [vmem:[%s5770_s30 + $0x190] sm:$0xf] %vm1667_vm0, %v5948_v39  ;;  %v5964_v61 = vpack.c.bf16 %v1532_v34, %v1532_v34 }
 0x1c2   : > { %4203 = vst.msk [vmem:[%s5040_s15 + $0x1d0] sm:$0xf] %vm1667_vm0, %v3215_v36  ;;  %3916 = vst.msk [vmem:[%s5040_s15 + $0xd4] sm:$0xf] %vm1667_vm0, %v2309_v16  ;;  %v1534_v26 = vpop.f32.mrf.mxu1  ;;  %v1425_v34 = vpop.f32.mrf.mxu0 }
 0x1c3   : > { %3277 = vrot.lane.b32.xlu1 %v5466_v47, %s4778_s18  ;;  %1917 = vrot.lane.b32.xlu0 %v5478_v14, %s4778_s18  ;;  %4044 = vst.msk [vmem:[%s5770_s30 + $0x114] sm:$0xf] %vm1667_vm0, %v5964_v61  ;;  %v5969_v47 = vpack.c.bf16 %v1534_v26, %v1534_v26 }
 0x1c5   : > { %v3217_v48 = vpop.permute.xlu1 %3216  ;;  %v1857_v36 = vpop.permute.xlu0 %1856  ;;  %4188 = vst.msk [vmem:[%s5770_s30 + $0x194] sm:$0xf] %vm1667_vm0, %v5969_v47 }
 0x1c6   : > { %4204 = vst.msk [vmem:[%s5040_s15 + $0x1d4] sm:$0xf] %vm1667_vm0, %v3217_v48  ;;  %3773 = vst.msk [vmem:[%s5040_s15 + $0x58] sm:$0xf] %vm1667_vm0, %v1857_v36 }
 0x1c7   : > { %2825 = vrot.lane.b32.xlu0 %v5480_v0, %s4778_s18  ;;  %1919 = vrot.lane.b32.xlu1 %v5499_v28, %s4778_s18  ;;  %v5990_v0 = vpack.c.bf16 %v1425_v34, %v1425_v34  ;;  %v1427_v28 = vpop.f32.mrf.mxu0 }
 0x1c8   : > { %v5995_v36 = vpack.c.bf16 %v1427_v28, %v1427_v28 }
 0x1c9   : > { %v2765_v14 = vpop.permute.xlu0 %2764  ;;  %v1859_v16 = vpop.permute.xlu1 %1858  ;;  %1834 = vst.msk [vmem:[%s5770_s30 + $0x18] sm:$0xf] %vm1667_vm0, %v5990_v0 }
 0x1ca   : > { %4061 = vst.msk [vmem:[%s5040_s15 + $0x158] sm:$0xf] %vm1667_vm0, %v2765_v14  ;;  %3774 = vst.msk [vmem:[%s5040_s15 + $0x5c] sm:$0xf] %vm1667_vm0, %v1859_v16 }
 0x1cb   : > { %2371 = vrot.lane.b32.xlu0 %v5485_v41, %s4778_s18  ;;  %2827 = vrot.lane.b32.xlu1 %v5504_v30, %s4778_s18  ;;  %v1429_v41 = vpop.f32.mrf.mxu0  ;;  %v1538_v30 = vpop.f32.mrf.mxu1  ;;  %3901 = vst.msk [vmem:[%s5770_s30 + $0x98] sm:$0xf] %vm1667_vm0, %v5995_v36 }
 0x1cc   : > { %v6008_v14 = vpack.c.bf16 %v1429_v41, %v1429_v41  ;;  %v6010_v16 = vpack.c.bf16 %v1538_v30, %v1538_v30 }
 0x1cd   : > { %v2311_v26 = vpop.permute.xlu0 %2310  ;;  %v2767_v48 = vpop.permute.xlu1 %2766 }
 0x1ce   : > { %3917 = vst.msk [vmem:[%s5040_s15 + $0xd8] sm:$0xf] %vm1667_vm0, %v2311_v26  ;;  %4062 = vst.msk [vmem:[%s5040_s15 + $0x15c] sm:$0xf] %vm1667_vm0, %v2767_v48  ;;  %v1431_v34 = vpop.f32.mrf.mxu0  ;;  %v1540_v28 = vpop.f32.mrf.mxu1 }
 0x1cf   : > { %3279 = vrot.lane.b32.xlu0 %v5490_v53, %s4778_s18  ;;  %2373 = vrot.lane.b32.xlu1 %v5509_v54, %s4778_s18  ;;  %1835 = vst.msk [vmem:[%s5770_s30 + $0x1c] sm:$0xf] %vm1667_vm0, %v6008_v14  ;;  %4045 = vst.msk [vmem:[%s5770_s30 + $0x118] sm:$0xf] %vm1667_vm0, %v6010_v16  ;;  %v6018_v53 = vpack.c.bf16 %v1431_v34, %v1431_v34  ;;  %v6020_v54 = vpack.c.bf16 %v1540_v28, %v1540_v28 }
 0x1d0   : > { %v1542_v41 = vpop.f32.mrf.mxu1 }
 0x1d1   : > { %v3219_v26 = vpop.permute.xlu0 %3218  ;;  %v2313_v48 = vpop.permute.xlu1 %2312  ;;  %3902 = vst.msk [vmem:[%s5770_s30 + $0x9c] sm:$0xf] %vm1667_vm0, %v6018_v53  ;;  %4189 = vst.msk [vmem:[%s5770_s30 + $0x198] sm:$0xf] %vm1667_vm0, %v6020_v54  ;;  %v6036_v30 = vpack.c.bf16 %v1542_v41, %v1542_v41 }
 0x1d2   : > { %4205 = vst.msk [vmem:[%s5040_s15 + $0x1d8] sm:$0xf] %vm1667_vm0, %v3219_v26  ;;  %3918 = vst.msk [vmem:[%s5040_s15 + $0xdc] sm:$0xf] %vm1667_vm0, %v2313_v48  ;;  %v1544_v34 = vpop.f32.mrf.mxu1  ;;  %v1435_v41 = vpop.f32.mrf.mxu0 }
 0x1d3   : > { %3281 = vrot.lane.b32.xlu1 %v5514_v52, %s4778_s18  ;;  %1921 = vrot.lane.b32.xlu0 %v5526_v45, %s4778_s18  ;;  %4046 = vst.msk [vmem:[%s5770_s30 + $0x11c] sm:$0xf] %vm1667_vm0, %v6036_v30  ;;  %v6041_v52 = vpack.c.bf16 %v1544_v34, %v1544_v34 }
 0x1d5   : > { %v3221_v28 = vpop.permute.xlu1 %3220  ;;  %v1861_v26 = vpop.permute.xlu0 %1860  ;;  %4190 = vst.msk [vmem:[%s5770_s30 + $0x19c] sm:$0xf] %vm1667_vm0, %v6041_v52 }
 0x1d6   : > { %4206 = vst.msk [vmem:[%s5040_s15 + $0x1dc] sm:$0xf] %vm1667_vm0, %v3221_v28  ;;  %3775 = vst.msk [vmem:[%s5040_s15 + $0x60] sm:$0xf] %vm1667_vm0, %v1861_v26 }
 0x1d7   : > { %2829 = vrot.lane.b32.xlu0 %v5528_v55, %s4778_s18  ;;  %1923 = vrot.lane.b32.xlu1 %v5547_v4, %s4778_s18  ;;  %v6062_v55 = vpack.c.bf16 %v1435_v41, %v1435_v41  ;;  %v1437_v4 = vpop.f32.mrf.mxu0 }
 0x1d8   : > { %v6067_v26 = vpack.c.bf16 %v1437_v4, %v1437_v4 }
 0x1d9   : > { %v2769_v45 = vpop.permute.xlu0 %2768  ;;  %v1863_v48 = vpop.permute.xlu1 %1862  ;;  %1836 = vst.msk [vmem:[%s5770_s30 + $0x20] sm:$0xf] %vm1667_vm0, %v6062_v55 }
 0x1da   : > { %4063 = vst.msk [vmem:[%s5040_s15 + $0x160] sm:$0xf] %vm1667_vm0, %v2769_v45  ;;  %3776 = vst.msk [vmem:[%s5040_s15 + $0x64] sm:$0xf] %vm1667_vm0, %v1863_v48 }
 0x1db   : > { %2375 = vrot.lane.b32.xlu0 %v5533_v59, %s4778_s18  ;;  %2831 = vrot.lane.b32.xlu1 %v5552_v7, %s4778_s18  ;;  %v1439_v59 = vpop.f32.mrf.mxu0  ;;  %v1548_v7 = vpop.f32.mrf.mxu1  ;;  %3903 = vst.msk [vmem:[%s5770_s30 + $0xa0] sm:$0xf] %vm1667_vm0, %v6067_v26 }
 0x1dc   : > { %v6080_v45 = vpack.c.bf16 %v1439_v59, %v1439_v59  ;;  %v6082_v48 = vpack.c.bf16 %v1548_v7, %v1548_v7 }
 0x1dd   : > { %v2315_v34 = vpop.permute.xlu0 %2314  ;;  %v2771_v28 = vpop.permute.xlu1 %2770 }
 0x1de   : > { %3919 = vst.msk [vmem:[%s5040_s15 + $0xe0] sm:$0xf] %vm1667_vm0, %v2315_v34  ;;  %4064 = vst.msk [vmem:[%s5040_s15 + $0x164] sm:$0xf] %vm1667_vm0, %v2771_v28  ;;  %v1441_v41 = vpop.f32.mrf.mxu0  ;;  %v1550_v4 = vpop.f32.mrf.mxu1 }
 0x1df   : > { %3283 = vrot.lane.b32.xlu0 %v5538_v56, %s4778_s18  ;;  %2377 = vrot.lane.b32.xlu1 %v5557_v1, %s4778_s18  ;;  %1837 = vst.msk [vmem:[%s5770_s30 + $0x24] sm:$0xf] %vm1667_vm0, %v6080_v45  ;;  %4047 = vst.msk [vmem:[%s5770_s30 + $0x120] sm:$0xf] %vm1667_vm0, %v6082_v48  ;;  %v6090_v56 = vpack.c.bf16 %v1441_v41, %v1441_v41  ;;  %v6092_v1 = vpack.c.bf16 %v1550_v4, %v1550_v4 }
 0x1e0   : > { %v1552_v59 = vpop.f32.mrf.mxu1 }
 0x1e1   : > { %v3223_v34 = vpop.permute.xlu0 %3222  ;;  %v2317_v28 = vpop.permute.xlu1 %2316  ;;  %3904 = vst.msk [vmem:[%s5770_s30 + $0xa4] sm:$0xf] %vm1667_vm0, %v6090_v56  ;;  %4191 = vst.msk [vmem:[%s5770_s30 + $0x1a0] sm:$0xf] %vm1667_vm0, %v6092_v1  ;;  %v6108_v7 = vpack.c.bf16 %v1552_v59, %v1552_v59 }
 0x1e2   : > { %4207 = vst.msk [vmem:[%s5040_s15 + $0x1e0] sm:$0xf] %vm1667_vm0, %v3223_v34  ;;  %3920 = vst.msk [vmem:[%s5040_s15 + $0xe4] sm:$0xf] %vm1667_vm0, %v2317_v28  ;;  %v1554_v41 = vpop.f32.mrf.mxu1  ;;  %v1445_v59 = vpop.f32.mrf.mxu0 }
 0x1e3   : > { %3285 = vrot.lane.b32.xlu1 %v5562_v11, %s4778_s18  ;;  %1925 = vrot.lane.b32.xlu0 %v5574_v2, %s4778_s18  ;;  %4048 = vst.msk [vmem:[%s5770_s30 + $0x124] sm:$0xf] %vm1667_vm0, %v6108_v7  ;;  %v6113_v11 = vpack.c.bf16 %v1554_v41, %v1554_v41 }
 0x1e5   : > { %v3225_v4 = vpop.permute.xlu1 %3224  ;;  %v1865_v34 = vpop.permute.xlu0 %1864  ;;  %4192 = vst.msk [vmem:[%s5770_s30 + $0x1a4] sm:$0xf] %vm1667_vm0, %v6113_v11 }
 0x1e6   : > { %4208 = vst.msk [vmem:[%s5040_s15 + $0x1e4] sm:$0xf] %vm1667_vm0, %v3225_v4  ;;  %3777 = vst.msk [vmem:[%s5040_s15 + $0x68] sm:$0xf] %vm1667_vm0, %v1865_v34 }
 0x1e7   : > { %2833 = vrot.lane.b32.xlu0 %v5576_v33, %s4778_s18  ;;  %1927 = vrot.lane.b32.xlu1 %v5595_v60, %s4778_s18  ;;  %v6134_v33 = vpack.c.bf16 %v1445_v59, %v1445_v59  ;;  %v1447_v60 = vpop.f32.mrf.mxu0 }
 0x1e8   : > { %v6139_v34 = vpack.c.bf16 %v1447_v60, %v1447_v60 }
 0x1e9   : > { %v2773_v2 = vpop.permute.xlu0 %2772  ;;  %v1867_v28 = vpop.permute.xlu1 %1866  ;;  %1838 = vst.msk [vmem:[%s5770_s30 + $0x28] sm:$0xf] %vm1667_vm0, %v6134_v33 }
 0x1ea   : > { %4065 = vst.msk [vmem:[%s5040_s15 + $0x168] sm:$0xf] %vm1667_vm0, %v2773_v2  ;;  %3778 = vst.msk [vmem:[%s5040_s15 + $0x6c] sm:$0xf] %vm1667_vm0, %v1867_v28 }
 0x1eb   : > { %2379 = vrot.lane.b32.xlu0 %v5581_v5, %s4778_s18  ;;  %2835 = vrot.lane.b32.xlu1 %v5600_v20, %s4778_s18  ;;  %v1449_v5 = vpop.f32.mrf.mxu0  ;;  %v1558_v20 = vpop.f32.mrf.mxu1  ;;  %3905 = vst.msk [vmem:[%s5770_s30 + $0xa8] sm:$0xf] %vm1667_vm0, %v6139_v34 }
 0x1ec   : > { %v6152_v2 = vpack.c.bf16 %v1449_v5, %v1449_v5  ;;  %v6154_v28 = vpack.c.bf16 %v1558_v20, %v1558_v20 }
 0x1ed   : > { %v2319_v41 = vpop.permute.xlu0 %2318  ;;  %v2775_v4 = vpop.permute.xlu1 %2774 }
 0x1ee   : > { %3921 = vst.msk [vmem:[%s5040_s15 + $0xe8] sm:$0xf] %vm1667_vm0, %v2319_v41  ;;  %4066 = vst.msk [vmem:[%s5040_s15 + $0x16c] sm:$0xf] %vm1667_vm0, %v2775_v4  ;;  %v1451_v59 = vpop.f32.mrf.mxu0  ;;  %v1560_v60 = vpop.f32.mrf.mxu1 }
 0x1ef   : > { %3287 = vrot.lane.b32.xlu0 %v5586_v17, %s4778_s18  ;;  %2381 = vrot.lane.b32.xlu1 %v5605_v18, %s4778_s18  ;;  %1839 = vst.msk [vmem:[%s5770_s30 + $0x2c] sm:$0xf] %vm1667_vm0, %v6152_v2  ;;  %4049 = vst.msk [vmem:[%s5770_s30 + $0x128] sm:$0xf] %vm1667_vm0, %v6154_v28  ;;  %v6162_v17 = vpack.c.bf16 %v1451_v59, %v1451_v59  ;;  %v6164_v18 = vpack.c.bf16 %v1560_v60, %v1560_v60 }
 0x1f0   : > { %v1562_v5 = vpop.f32.mrf.mxu1 }
 0x1f1   : > { %v3227_v41 = vpop.permute.xlu0 %3226  ;;  %v2321_v4 = vpop.permute.xlu1 %2320  ;;  %3906 = vst.msk [vmem:[%s5770_s30 + $0xac] sm:$0xf] %vm1667_vm0, %v6162_v17  ;;  %4193 = vst.msk [vmem:[%s5770_s30 + $0x1a8] sm:$0xf] %vm1667_vm0, %v6164_v18  ;;  %v6180_v20 = vpack.c.bf16 %v1562_v5, %v1562_v5 }
 0x1f2   : > { %4209 = vst.msk [vmem:[%s5040_s15 + $0x1e8] sm:$0xf] %vm1667_vm0, %v3227_v41  ;;  %3922 = vst.msk [vmem:[%s5040_s15 + $0xec] sm:$0xf] %vm1667_vm0, %v2321_v4  ;;  %v1564_v59 = vpop.f32.mrf.mxu1  ;;  %v1455_v5 = vpop.f32.mrf.mxu0 }
 0x1f3   : > { %3289 = vrot.lane.b32.xlu1 %v5610_v58, %s4778_s18  ;;  %1929 = vrot.lane.b32.xlu0 %v5622_v19, %s4778_s18  ;;  %4050 = vst.msk [vmem:[%s5770_s30 + $0x12c] sm:$0xf] %vm1667_vm0, %v6180_v20  ;;  %v6185_v58 = vpack.c.bf16 %v1564_v59, %v1564_v59 }
 0x1f5   : > { %v3229_v60 = vpop.permute.xlu1 %3228  ;;  %v1869_v41 = vpop.permute.xlu0 %1868  ;;  %4194 = vst.msk [vmem:[%s5770_s30 + $0x1ac] sm:$0xf] %vm1667_vm0, %v6185_v58 }
 0x1f6   : > { %4210 = vst.msk [vmem:[%s5040_s15 + $0x1ec] sm:$0xf] %vm1667_vm0, %v3229_v60  ;;  %3779 = vst.msk [vmem:[%s5040_s15 + $0x70] sm:$0xf] %vm1667_vm0, %v1869_v41 }
 0x1f7   : > { %2837 = vrot.lane.b32.xlu0 %v5624_v40, %s4778_s18  ;;  %1931 = vrot.lane.b32.xlu1 %v5643_v9, %s4778_s18  ;;  %v6206_v40 = vpack.c.bf16 %v1455_v5, %v1455_v5  ;;  %v1457_v9 = vpop.f32.mrf.mxu0 }
 0x1f8   : > { %v6211_v41 = vpack.c.bf16 %v1457_v9, %v1457_v9 }
 0x1f9   : > { %v2777_v19 = vpop.permute.xlu0 %2776  ;;  %v1871_v4 = vpop.permute.xlu1 %1870  ;;  %6795 = vst [vmem:[#allocation21_spill] sm:$0xff] %v6206_v40  ;;  %1840 = vst.msk [vmem:[%s5770_s30 + $0x30] sm:$0xf] %vm1667_vm0, %v6206_v40 }
 0x1fa   : > { %4067 = vst.msk [vmem:[%s5040_s15 + $0x170] sm:$0xf] %vm1667_vm0, %v2777_v19  ;;  %3780 = vst.msk [vmem:[%s5040_s15 + $0x74] sm:$0xf] %vm1667_vm0, %v1871_v4  ;;  %v6797_v19 = vld [vmem:[#allocation8_spill] sm:$0xff] }
 0x1fb   : > { %2383 = vrot.lane.b32.xlu0 %v5629_v25, %s4778_s18  ;;  %2839 = vrot.lane.b32.xlu1 %v5648_v13, %s4778_s18  ;;  %6796 = vst [vmem:[#allocation22_spill] sm:$0xff] %v6211_v41  ;;  %v1459_v25 = vpop.f32.mrf.mxu0  ;;  %v1568_v13 = vpop.f32.mrf.mxu1  ;;  %3907 = vst.msk [vmem:[%s5770_s30 + $0xb0] sm:$0xf] %vm1667_vm0, %v6211_v41  ;;  %v6801_v41 = vld [vmem:[#allocation10_spill] sm:$0xff] }
 0x1fc   : > { %v6224_v4 = vpack.c.bf16 %v1459_v25, %v1459_v25  ;;  %v6226_v5 = vpack.c.bf16 %v1568_v13, %v1568_v13 }
 0x1fd   : > { %v2323_v59 = vpop.permute.xlu0 %2322  ;;  %v2779_v60 = vpop.permute.xlu1 %2778 }
 0x1fe   : > { %3923 = vst.msk [vmem:[%s5040_s15 + $0xf0] sm:$0xf] %vm1667_vm0, %v2323_v59  ;;  %4068 = vst.msk [vmem:[%s5040_s15 + $0x174] sm:$0xf] %vm1667_vm0, %v2779_v60  ;;  %v1461_v9 = vpop.f32.mrf.mxu0  ;;  %v1570_v59 = vpop.f32.mrf.mxu1 }
 0x1ff   : > { %3291 = vrot.lane.b32.xlu0 %v6797_v19, %s4778_s18  ;;  %2385 = vrot.lane.b32.xlu1 %v5653_v31, %s4778_s18  ;;  %1841 = vst.msk [vmem:[%s5770_s30 + $0x34] sm:$0xf] %vm1667_vm0, %v6224_v4  ;;  %4051 = vst.msk [vmem:[%s5770_s30 + $0x130] sm:$0xf] %vm1667_vm0, %v6226_v5  ;;  %v6234_v31 = vpack.c.bf16 %v1461_v9, %v1461_v9  ;;  %v6236_v25 = vpack.c.bf16 %v1570_v59, %v1570_v59  ;;  %v6800_v19 = vld [vmem:[#allocation9_spill] sm:$0xff] }
 0x200   : > { %v1572_v13 = vpop.f32.mrf.mxu1 }
 0x201   : > { %v3231_v60 = vpop.permute.xlu0 %3230  ;;  %v2325_v40 = vpop.permute.xlu1 %2324  ;;  %6798 = vst [vmem:[#allocation8_spill] sm:$0xff] %v6234_v31  ;;  %6799 = vst [vmem:[#allocation23_spill] sm:$0xff] %v6236_v25  ;;  %v6252_v9 = vpack.c.bf16 %v1572_v13, %v1572_v13 }
 0x202   : > { %4211 = vst.msk [vmem:[%s5040_s15 + $0x1f0] sm:$0xf] %vm1667_vm0, %v3231_v60  ;;  %3924 = vst.msk [vmem:[%s5040_s15 + $0xf4] sm:$0xf] %vm1667_vm0, %v2325_v40  ;;  %v1574_v59 = vpop.f32.mrf.mxu1 }
 0x203   : > { %3293 = vrot.lane.b32.xlu1 %v6800_v19, %s4778_s18  ;;  %1933 = vrot.lane.b32.xlu0 %v6801_v41, %s4778_s18  ;;  %3908 = vst.msk [vmem:[%s5770_s30 + $0xb4] sm:$0xf] %vm1667_vm0, %v6234_v31  ;;  %4195 = vst.msk [vmem:[%s5770_s30 + $0x1b0] sm:$0xf] %vm1667_vm0, %v6236_v25  ;;  %v6257_v19 = vpack.c.bf16 %v1574_v59, %v1574_v59  ;;  %v6804_v41 = vld [vmem:[#allocation11_spill] sm:$0xff]  ;;  %v1465_v59 = vpop.f32.mrf.mxu0 }
 0x204   : > { %6802 = vst [vmem:[#allocation9_spill] sm:$0xff] %v6252_v9  ;;  %4052 = vst.msk [vmem:[%s5770_s30 + $0x134] sm:$0xf] %vm1667_vm0, %v6252_v9 }
 0x205   : > { %v3233_v40 = vpop.permute.xlu1 %3232  ;;  %v1873_v60 = vpop.permute.xlu0 %1872  ;;  %6803 = vst [vmem:[#allocation10_spill] sm:$0xff] %v6257_v19  ;;  %4196 = vst.msk [vmem:[%s5770_s30 + $0x1b4] sm:$0xf] %vm1667_vm0, %v6257_v19 }
 0x206   : > { %4212 = vst.msk [vmem:[%s5040_s15 + $0x1f4] sm:$0xf] %vm1667_vm0, %v3233_v40  ;;  %3781 = vst.msk [vmem:[%s5040_s15 + $0x78] sm:$0xf] %vm1667_vm0, %v1873_v60  ;;  %v6805_v40 = vld [vmem:[#allocation12_spill] sm:$0xff]  ;;  %v6806_v60 = vld [vmem:[#allocation14_spill] sm:$0xff] }
 0x207   : > { %2841 = vrot.lane.b32.xlu0 %v6804_v41, %s4778_s18  ;;  %1935 = vrot.lane.b32.xlu1 %v5691_v57, %s4778_s18  ;;  %v6278_v41 = vpack.c.bf16 %v1465_v59, %v1465_v59  ;;  %v1467_v57 = vpop.f32.mrf.mxu0  ;;  %v6808_v59 = vld [vmem:[#allocation13_spill] sm:$0xff] }
 0x209   : > { %v2781_v13 = vpop.permute.xlu0 %2780  ;;  %v1875_v31 = vpop.permute.xlu1 %1874  ;;  %6807 = vst [vmem:[#allocation11_spill] sm:$0xff] %v6278_v41  ;;  %1842 = vst.msk [vmem:[%s5770_s30 + $0x38] sm:$0xf] %vm1667_vm0, %v6278_v41 }
 0x20a   : > { %4069 = vst.msk [vmem:[%s5040_s15 + $0x178] sm:$0xf] %vm1667_vm0, %v2781_v13  ;;  %3782 = vst.msk [vmem:[%s5040_s15 + $0x7c] sm:$0xf] %vm1667_vm0, %v1875_v31  ;;  %v6283_v13 = vpack.c.bf16 %v1467_v57, %v1467_v57  ;;  %v1469_v31 = vpop.f32.mrf.mxu0 }
 0x20b   : > { %2387 = vrot.lane.b32.xlu0 %v6805_v40, %s4778_s18  ;;  %2843 = vrot.lane.b32.xlu1 %v6806_v60, %s4778_s18  ;;  %v1578_v40 = vpop.f32.mrf.mxu1  ;;  %v6296_v60 = vpack.c.bf16 %v1469_v31, %v1469_v31 }
 0x20c   : > { %3909 = vst.msk [vmem:[%s5770_s30 + $0xb8] sm:$0xf] %vm1667_vm0, %v6283_v13 }
 0x20d   : > { %v2327_v25 = vpop.permute.xlu0 %2326  ;;  %v2783_v9 = vpop.permute.xlu1 %2782  ;;  %1843 = vst.msk [vmem:[%s5770_s30 + $0x3c] sm:$0xf] %vm1667_vm0, %v6296_v60 }
 0x20e   : > { %3925 = vst.msk [vmem:[%s5040_s15 + $0xf8] sm:$0xf] %vm1667_vm0, %v2327_v25  ;;  %4070 = vst.msk [vmem:[%s5040_s15 + $0x17c] sm:$0xf] %vm1667_vm0, %v2783_v9  ;;  %v6298_v25 = vpack.c.bf16 %v1578_v40, %v1578_v40  ;;  %v1471_v9 = vpop.f32.mrf.mxu0  ;;  %v1580_v57 = vpop.f32.mrf.mxu1 }
 0x20f   : > { %3295 = vrot.lane.b32.xlu0 %v6808_v59, %s4778_s18  ;;  %2389 = vrot.lane.b32.xlu1 %v5701_v50, %s4778_s18  ;;  %v6306_v50 = vpack.c.bf16 %v1471_v9, %v1471_v9  ;;  %v6308_v31 = vpack.c.bf16 %v1580_v57, %v1580_v57 }
 0x210   : > { %4053 = vst.msk [vmem:[%s5770_s30 + $0x138] sm:$0xf] %vm1667_vm0, %v6298_v25  ;;  %v1582_v40 = vpop.f32.mrf.mxu1 }
 0x211   : > { %v3235_v41 = vpop.permute.xlu0 %3234  ;;  %v2329_v19 = vpop.permute.xlu1 %2328  ;;  %3910 = vst.msk [vmem:[%s5770_s30 + $0xbc] sm:$0xf] %vm1667_vm0, %v6306_v50  ;;  %4197 = vst.msk [vmem:[%s5770_s30 + $0x1b8] sm:$0xf] %vm1667_vm0, %v6308_v31  ;;  %v6324_v59 = vpack.c.bf16 %v1582_v40, %v1582_v40 }
 0x212   : > { %4213 = vst.msk [vmem:[%s5040_s15 + $0x1f8] sm:$0xf] %vm1667_vm0, %v3235_v41  ;;  %3926 = vst.msk [vmem:[%s5040_s15 + $0xfc] sm:$0xf] %vm1667_vm0, %v2329_v19  ;;  %v1584_v41 = vpop.f32.mrf.mxu1 }
 0x213   : > { %3297 = vrot.lane.b32.xlu1 %v5706_v10, %s4778_s18  ;;  %1937 = vrot.lane.b32.xlu0 %v5720_v15, %s4778_s18  ;;  %4054 = vst.msk [vmem:[%s5770_s30 + $0x13c] sm:$0xf] %vm1667_vm0, %v6324_v59  ;;  %v6329_v10 = vpack.c.bf16 %v1584_v41, %v1584_v41  ;;  %v6809_v15 = vld [vmem:[#allocation15_spill] sm:$0xff]  ;;  %v6810_v41 = vld [vmem:[#allocation16_spill] sm:$0xff] }
 0x215   : > { %v3237_v19 = vpop.permute.xlu1 %3236  ;;  %v1910_v9 = vpop.permute.xlu0 %1909  ;;  %4198 = vst.msk [vmem:[%s5770_s30 + $0x1bc] sm:$0xf] %vm1667_vm0, %v6329_v10 }
 0x216   : > { %4214 = vst.msk [vmem:[%s5040_s15 + $0x1fc] sm:$0xf] %vm1667_vm0, %v3237_v19  ;;  %3783 = vst.msk [vmem:[%s5360_s26 + $0x40] sm:$0xf] %vm1667_vm0, %v1910_v9  ;;  %v6811_v19 = vld [vmem:[#allocation18_spill] sm:$0xff] }
 0x217   : > { %2845 = vrot.lane.b32.xlu0 %v6809_v15, %s4778_s18  ;;  %1939 = vrot.lane.b32.xlu1 %v5745_v49, %s4778_s18  ;;  %v6812_v15 = vld [vmem:[#allocation17_spill] sm:$0xff] }
 0x219   : > { %v2818_v57 = vpop.permute.xlu0 %2817  ;;  %v1912_v40 = vpop.permute.xlu1 %1911 }
 0x21a   : > { %4071 = vst.msk [vmem:[%s5360_s26 + $0x140] sm:$0xf] %vm1667_vm0, %v2818_v57  ;;  %3784 = vst.msk [vmem:[%s5360_s26 + $0x44] sm:$0xf] %vm1667_vm0, %v1912_v40 }
 0x21b   : > { %2391 = vrot.lane.b32.xlu0 %v6810_v41, %s4778_s18  ;;  %2847 = vrot.lane.b32.xlu1 %v6811_v19, %s4778_s18 }
 0x21d   : > { %v2364_v49 = vpop.permute.xlu0 %2363  ;;  %v2820_v9 = vpop.permute.xlu1 %2819 }
 0x21e   : > { %3927 = vst.msk [vmem:[%s5360_s26 + $0xc0] sm:$0xf] %vm1667_vm0, %v2364_v49  ;;  %4072 = vst.msk [vmem:[%s5360_s26 + $0x144] sm:$0xf] %vm1667_vm0, %v2820_v9 }
 0x21f   : > { %3299 = vrot.lane.b32.xlu0 %v6812_v15, %s4778_s18  ;;  %2393 = vrot.lane.b32.xlu1 %v5755_v12, %s4778_s18  ;;  %v6813_v12 = vld [vmem:[#allocation19_spill] sm:$0xff] }
 0x221   : > { %v3272_v57 = vpop.permute.xlu0 %3271  ;;  %v2366_v40 = vpop.permute.xlu1 %2365 }
 0x222   : > { %4215 = vst.msk [vmem:[%s5360_s26 + $0x1c0] sm:$0xf] %vm1667_vm0, %v3272_v57  ;;  %3928 = vst.msk [vmem:[%s5360_s26 + $0xc4] sm:$0xf] %vm1667_vm0, %v2366_v40 }
 0x223   : > { %3301 = vrot.lane.b32.xlu1 %v5760_v42, %s4778_s18  ;;  %1974 = vrot.lane.b32.xlu0 %v5782_v62, %s4778_s18 }
 0x225   : > { %v3274_v41 = vpop.permute.xlu1 %3273  ;;  %v1914_v19 = vpop.permute.xlu0 %1913 }
 0x226   : > { %4216 = vst.msk [vmem:[%s5360_s26 + $0x1c4] sm:$0xf] %vm1667_vm0, %v3274_v41  ;;  %3785 = vst.msk [vmem:[%s5360_s26 + $0x48] sm:$0xf] %vm1667_vm0, %v1914_v19  ;;  %v6816_v41 = vld [vmem:[#allocation22_spill] sm:$0xff]  ;;  %v6817_v19 = vld [vmem:[#allocation9_spill] sm:$0xff] }
 0x227   : > { %2882 = vrot.lane.b32.xlu0 %v6813_v12, %s4778_s18  ;;  %1976 = vrot.lane.b32.xlu1 %v5807_v22, %s4778_s18 }
 0x229   : > { %v2822_v42 = vpop.permute.xlu0 %2821  ;;  %v1916_v49 = vpop.permute.xlu1 %1915 }
 0x22a   : > { %4073 = vst.msk [vmem:[%s5360_s26 + $0x148] sm:$0xf] %vm1667_vm0, %v2822_v42  ;;  %3786 = vst.msk [vmem:[%s5360_s26 + $0x4c] sm:$0xf] %vm1667_vm0, %v1916_v49  ;;  %v6819_v42 = vld [vmem:[#allocation8_spill] sm:$0xff] }
 0x22b   : > { %2428 = vrot.lane.b32.xlu0 %v5789_v6, %s4778_s18  ;;  %2884 = vrot.lane.b32.xlu1 %v5812_v37, %s4778_s18  ;;  %v6814_v37 = vld [vmem:[#allocation20_spill] sm:$0xff] }
 0x22d   : > { %v2368_v62 = vpop.permute.xlu0 %2367  ;;  %v2824_v9 = vpop.permute.xlu1 %2823 }
 0x22e   : > { %3929 = vst.msk [vmem:[%s5360_s26 + $0xc8] sm:$0xf] %vm1667_vm0, %v2368_v62  ;;  %4074 = vst.msk [vmem:[%s5360_s26 + $0x14c] sm:$0xf] %vm1667_vm0, %v2824_v9  ;;  %v6820_v9 = vld [vmem:[#allocation10_spill] sm:$0xff] }
 0x22f   : > { %3336 = vrot.lane.b32.xlu0 %v5794_v21, %s4778_s18  ;;  %2430 = vrot.lane.b32.xlu1 %v5817_v24, %s4778_s18 }
 0x231   : > { %v3276_v6 = vpop.permute.xlu0 %3275  ;;  %v2370_v22 = vpop.permute.xlu1 %2369 }
 0x232   : > { %4217 = vst.msk [vmem:[%s5360_s26 + $0x1c8] sm:$0xf] %vm1667_vm0, %v3276_v6  ;;  %3930 = vst.msk [vmem:[%s5360_s26 + $0xcc] sm:$0xf] %vm1667_vm0, %v2370_v22  ;;  %v6821_v6 = vld [vmem:[#allocation11_spill] sm:$0xff] }
 0x233   : > { %3338 = vrot.lane.b32.xlu1 %v5822_v43, %s4778_s18  ;;  %1978 = vrot.lane.b32.xlu0 %v6814_v37, %s4778_s18 }
 0x235   : > { %v3278_v21 = vpop.permute.xlu1 %3277  ;;  %v1918_v15 = vpop.permute.xlu0 %1917 }
 0x236   : > { %4218 = vst.msk [vmem:[%s5360_s26 + $0x1cc] sm:$0xf] %vm1667_vm0, %v3278_v21  ;;  %3787 = vst.msk [vmem:[%s5360_s26 + $0x50] sm:$0xf] %vm1667_vm0, %v1918_v15 }
 0x237   : > { %2886 = vrot.lane.b32.xlu0 %v5866_v8, %s4778_s18  ;;  %1980 = vrot.lane.b32.xlu1 %v5864_v35, %s4778_s18 }
 0x239   : > { %v2826_v24 = vpop.permute.xlu0 %2825  ;;  %v1920_v43 = vpop.permute.xlu1 %1919 }
 0x23a   : > { %4075 = vst.msk [vmem:[%s5360_s26 + $0x150] sm:$0xf] %vm1667_vm0, %v2826_v24  ;;  %3788 = vst.msk [vmem:[%s5360_s26 + $0x54] sm:$0xf] %vm1667_vm0, %v1920_v43 }
 0x23b   : > { %2432 = vrot.lane.b32.xlu0 %v5851_v3, %s4778_s18  ;;  %2888 = vrot.lane.b32.xlu1 %v5892_v38, %s4778_s18 }
 0x23d   : > { %v2372_v8 = vpop.permute.xlu0 %2371  ;;  %v2828_v57 = vpop.permute.xlu1 %2827 }
 0x23e   : > { %3931 = vst.msk [vmem:[%s5360_s26 + $0xd0] sm:$0xf] %vm1667_vm0, %v2372_v8  ;;  %4076 = vst.msk [vmem:[%s5360_s26 + $0x154] sm:$0xf] %vm1667_vm0, %v2828_v57 }
 0x23f   : > { %3340 = vrot.lane.b32.xlu0 %v5876_v27, %s4778_s18  ;;  %2434 = vrot.lane.b32.xlu1 %v5874_v29, %s4778_s18 }
 0x241   : > { %v3280_v3 = vpop.permute.xlu0 %3279  ;;  %v2374_v35 = vpop.permute.xlu1 %2373 }
 0x242   : > { %4219 = vst.msk [vmem:[%s5360_s26 + $0x1d0] sm:$0xf] %vm1667_vm0, %v3280_v3  ;;  %3932 = vst.msk [vmem:[%s5360_s26 + $0xd4] sm:$0xf] %vm1667_vm0, %v2374_v35 }
 0x243   : > { %3342 = vrot.lane.b32.xlu1 %v5897_v32, %s4778_s18  ;;  %1982 = vrot.lane.b32.xlu0 %v5918_v51, %s4778_s18 }
 0x245   : > { %v3282_v27 = vpop.permute.xlu1 %3281  ;;  %v1922_v38 = vpop.permute.xlu0 %1921 }
 0x246   : > { %4220 = vst.msk [vmem:[%s5360_s26 + $0x1d4] sm:$0xf] %vm1667_vm0, %v3282_v27  ;;  %3789 = vst.msk [vmem:[%s5360_s26 + $0x58] sm:$0xf] %vm1667_vm0, %v1922_v38 }
 0x247   : > { %2890 = vrot.lane.b32.xlu0 %v5938_v23, %s4778_s18  ;;  %1984 = vrot.lane.b32.xlu1 %v5936_v46, %s4778_s18 }
 0x249   : > { %v2830_v29 = vpop.permute.xlu0 %2829  ;;  %v1924_v32 = vpop.permute.xlu1 %1923 }
 0x24a   : > { %4077 = vst.msk [vmem:[%s5360_s26 + $0x158] sm:$0xf] %vm1667_vm0, %v2830_v29  ;;  %3790 = vst.msk [vmem:[%s5360_s26 + $0x5c] sm:$0xf] %vm1667_vm0, %v1924_v32 }
 0x24b   : > { %2436 = vrot.lane.b32.xlu0 %v5923_v63, %s4778_s18  ;;  %2892 = vrot.lane.b32.xlu1 %v5964_v61, %s4778_s18 }
 0x24d   : > { %v2376_v51 = vpop.permute.xlu0 %2375  ;;  %v2832_v23 = vpop.permute.xlu1 %2831 }
 0x24e   : > { %3933 = vst.msk [vmem:[%s5360_s26 + $0xd8] sm:$0xf] %vm1667_vm0, %v2376_v51  ;;  %4078 = vst.msk [vmem:[%s5360_s26 + $0x15c] sm:$0xf] %vm1667_vm0, %v2832_v23 }
 0x24f   : > { %3344 = vrot.lane.b32.xlu0 %v5948_v39, %s4778_s18  ;;  %2438 = vrot.lane.b32.xlu1 %v5946_v44, %s4778_s18 }
 0x251   : > { %v3284_v63 = vpop.permute.xlu0 %3283  ;;  %v2378_v46 = vpop.permute.xlu1 %2377 }
 0x252   : > { %4221 = vst.msk [vmem:[%s5360_s26 + $0x1d8] sm:$0xf] %vm1667_vm0, %v3284_v63  ;;  %3934 = vst.msk [vmem:[%s5360_s26 + $0xdc] sm:$0xf] %vm1667_vm0, %v2378_v46 }
 0x253   : > { %3346 = vrot.lane.b32.xlu1 %v5969_v47, %s4778_s18  ;;  %1986 = vrot.lane.b32.xlu0 %v5990_v0, %s4778_s18 }
 0x255   : > { %v3286_v39 = vpop.permute.xlu1 %3285  ;;  %v1926_v61 = vpop.permute.xlu0 %1925 }
 0x256   : > { %4222 = vst.msk [vmem:[%s5360_s26 + $0x1dc] sm:$0xf] %vm1667_vm0, %v3286_v39  ;;  %3791 = vst.msk [vmem:[%s5360_s26 + $0x60] sm:$0xf] %vm1667_vm0, %v1926_v61 }
 0x257   : > { %2894 = vrot.lane.b32.xlu0 %v6010_v16, %s4778_s18  ;;  %1988 = vrot.lane.b32.xlu1 %v6008_v14, %s4778_s18 }
 0x259   : > { %v2834_v44 = vpop.permute.xlu0 %2833  ;;  %v1928_v47 = vpop.permute.xlu1 %1927 }
 0x25a   : > { %4079 = vst.msk [vmem:[%s5360_s26 + $0x160] sm:$0xf] %vm1667_vm0, %v2834_v44  ;;  %3792 = vst.msk [vmem:[%s5360_s26 + $0x64] sm:$0xf] %vm1667_vm0, %v1928_v47 }
 0x25b   : > { %2440 = vrot.lane.b32.xlu0 %v5995_v36, %s4778_s18  ;;  %2896 = vrot.lane.b32.xlu1 %v6036_v30, %s4778_s18 }
 0x25d   : > { %v2380_v0 = vpop.permute.xlu0 %2379  ;;  %v2836_v16 = vpop.permute.xlu1 %2835 }
 0x25e   : > { %3935 = vst.msk [vmem:[%s5360_s26 + $0xe0] sm:$0xf] %vm1667_vm0, %v2380_v0  ;;  %4080 = vst.msk [vmem:[%s5360_s26 + $0x164] sm:$0xf] %vm1667_vm0, %v2836_v16 }
 0x25f   : > { %3348 = vrot.lane.b32.xlu0 %v6020_v54, %s4778_s18  ;;  %2442 = vrot.lane.b32.xlu1 %v6018_v53, %s4778_s18 }
 0x261   : > { %v3288_v36 = vpop.permute.xlu0 %3287  ;;  %v2382_v14 = vpop.permute.xlu1 %2381 }
 0x262   : > { %4223 = vst.msk [vmem:[%s5360_s26 + $0x1e0] sm:$0xf] %vm1667_vm0, %v3288_v36  ;;  %3936 = vst.msk [vmem:[%s5360_s26 + $0xe4] sm:$0xf] %vm1667_vm0, %v2382_v14 }
 0x263   : > { %3350 = vrot.lane.b32.xlu1 %v6041_v52, %s4778_s18  ;;  %1990 = vrot.lane.b32.xlu0 %v6062_v55, %s4778_s18 }
 0x265   : > { %v3290_v54 = vpop.permute.xlu1 %3289  ;;  %v1930_v30 = vpop.permute.xlu0 %1929 }
 0x266   : > { %4224 = vst.msk [vmem:[%s5360_s26 + $0x1e4] sm:$0xf] %vm1667_vm0, %v3290_v54  ;;  %3793 = vst.msk [vmem:[%s5360_s26 + $0x68] sm:$0xf] %vm1667_vm0, %v1930_v30 }
 0x267   : > { %2898 = vrot.lane.b32.xlu0 %v6082_v48, %s4778_s18  ;;  %1992 = vrot.lane.b32.xlu1 %v6080_v45, %s4778_s18 }
 0x269   : > { %v2838_v53 = vpop.permute.xlu0 %2837  ;;  %v1932_v52 = vpop.permute.xlu1 %1931 }
 0x26a   : > { %4081 = vst.msk [vmem:[%s5360_s26 + $0x168] sm:$0xf] %vm1667_vm0, %v2838_v53  ;;  %3794 = vst.msk [vmem:[%s5360_s26 + $0x6c] sm:$0xf] %vm1667_vm0, %v1932_v52 }
 0x26b   : > { %2444 = vrot.lane.b32.xlu0 %v6067_v26, %s4778_s18  ;;  %2900 = vrot.lane.b32.xlu1 %v6108_v7, %s4778_s18 }
 0x26d   : > { %v2384_v55 = vpop.permute.xlu0 %2383  ;;  %v2840_v48 = vpop.permute.xlu1 %2839 }
 0x26e   : > { %3937 = vst.msk [vmem:[%s5360_s26 + $0xe8] sm:$0xf] %vm1667_vm0, %v2384_v55  ;;  %4082 = vst.msk [vmem:[%s5360_s26 + $0x16c] sm:$0xf] %vm1667_vm0, %v2840_v48 }
 0x26f   : > { %3352 = vrot.lane.b32.xlu0 %v6092_v1, %s4778_s18  ;;  %2446 = vrot.lane.b32.xlu1 %v6090_v56, %s4778_s18 }
 0x271   : > { %v3292_v26 = vpop.permute.xlu0 %3291  ;;  %v2386_v45 = vpop.permute.xlu1 %2385 }
 0x272   : > { %4225 = vst.msk [vmem:[%s5360_s26 + $0x1e8] sm:$0xf] %vm1667_vm0, %v3292_v26  ;;  %3938 = vst.msk [vmem:[%s5360_s26 + $0xec] sm:$0xf] %vm1667_vm0, %v2386_v45 }
 0x273   : > { %3354 = vrot.lane.b32.xlu1 %v6113_v11, %s4778_s18  ;;  %1994 = vrot.lane.b32.xlu0 %v6134_v33, %s4778_s18 }
 0x275   : > { %v3294_v1 = vpop.permute.xlu1 %3293  ;;  %v1934_v7 = vpop.permute.xlu0 %1933 }
 0x276   : > { %4226 = vst.msk [vmem:[%s5360_s26 + $0x1ec] sm:$0xf] %vm1667_vm0, %v3294_v1  ;;  %3795 = vst.msk [vmem:[%s5360_s26 + $0x70] sm:$0xf] %vm1667_vm0, %v1934_v7 }
 0x277   : > { %2902 = vrot.lane.b32.xlu0 %v6154_v28, %s4778_s18  ;;  %1996 = vrot.lane.b32.xlu1 %v6152_v2, %s4778_s18 }
 0x279   : > { %v2842_v56 = vpop.permute.xlu0 %2841  ;;  %v1936_v11 = vpop.permute.xlu1 %1935 }
 0x27a   : > { %4083 = vst.msk [vmem:[%s5360_s26 + $0x170] sm:$0xf] %vm1667_vm0, %v2842_v56  ;;  %3796 = vst.msk [vmem:[%s5360_s26 + $0x74] sm:$0xf] %vm1667_vm0, %v1936_v11 }
 0x27b   : > { %2448 = vrot.lane.b32.xlu0 %v6139_v34, %s4778_s18  ;;  %2904 = vrot.lane.b32.xlu1 %v6180_v20, %s4778_s18  ;;  %v6815_v20 = vld [vmem:[#allocation21_spill] sm:$0xff] }
 0x27d   : > { %v2388_v33 = vpop.permute.xlu0 %2387  ;;  %v2844_v28 = vpop.permute.xlu1 %2843 }
 0x27e   : > { %3939 = vst.msk [vmem:[%s5360_s26 + $0xf0] sm:$0xf] %vm1667_vm0, %v2388_v33  ;;  %4084 = vst.msk [vmem:[%s5360_s26 + $0x174] sm:$0xf] %vm1667_vm0, %v2844_v28 }
 0x27f   : > { %3356 = vrot.lane.b32.xlu0 %v6164_v18, %s4778_s18  ;;  %2450 = vrot.lane.b32.xlu1 %v6162_v17, %s4778_s18 }
 0x281   : > { %v3296_v34 = vpop.permute.xlu0 %3295  ;;  %v2390_v2 = vpop.permute.xlu1 %2389 }
 0x282   : > { %4227 = vst.msk [vmem:[%s5360_s26 + $0x1f0] sm:$0xf] %vm1667_vm0, %v3296_v34  ;;  %3940 = vst.msk [vmem:[%s5360_s26 + $0xf4] sm:$0xf] %vm1667_vm0, %v2390_v2 }
 0x283   : > { %3358 = vrot.lane.b32.xlu1 %v6185_v58, %s4778_s18  ;;  %1998 = vrot.lane.b32.xlu0 %v6815_v20, %s4778_s18 }
 0x285   : > { %v3298_v18 = vpop.permute.xlu1 %3297  ;;  %v1938_v40 = vpop.permute.xlu0 %1937 }
 0x286   : > { %4228 = vst.msk [vmem:[%s5360_s26 + $0x1f4] sm:$0xf] %vm1667_vm0, %v3298_v18  ;;  %3797 = vst.msk [vmem:[%s5360_s26 + $0x78] sm:$0xf] %vm1667_vm0, %v1938_v40 }
 0x287   : > { %2906 = vrot.lane.b32.xlu0 %v6226_v5, %s4778_s18  ;;  %2000 = vrot.lane.b32.xlu1 %v6224_v4, %s4778_s18  ;;  %v6818_v4 = vld [vmem:[#allocation23_spill] sm:$0xff] }
 0x289   : > { %v2846_v17 = vpop.permute.xlu0 %2845  ;;  %v1940_v58 = vpop.permute.xlu1 %1939 }
 0x28a   : > { %4085 = vst.msk [vmem:[%s5360_s26 + $0x178] sm:$0xf] %vm1667_vm0, %v2846_v17  ;;  %3798 = vst.msk [vmem:[%s5360_s26 + $0x7c] sm:$0xf] %vm1667_vm0, %v1940_v58 }
 0x28b   : > { %2452 = vrot.lane.b32.xlu0 %v6816_v41, %s4778_s18  ;;  %2908 = vrot.lane.b32.xlu1 %v6817_v19, %s4778_s18 }
 0x28d   : > { %v2392_v5 = vpop.permute.xlu0 %2391  ;;  %v2848_v12 = vpop.permute.xlu1 %2847 }
 0x28e   : > { %3941 = vst.msk [vmem:[%s5360_s26 + $0xf8] sm:$0xf] %vm1667_vm0, %v2392_v5  ;;  %4086 = vst.msk [vmem:[%s5360_s26 + $0x17c] sm:$0xf] %vm1667_vm0, %v2848_v12 }
 0x28f   : > { %3360 = vrot.lane.b32.xlu0 %v6818_v4, %s4778_s18  ;;  %2454 = vrot.lane.b32.xlu1 %v6819_v42, %s4778_s18 }
 0x291   : > { %v3300_v49 = vpop.permute.xlu0 %3299  ;;  %v2394_v62 = vpop.permute.xlu1 %2393 }
 0x292   : > { %4229 = vst.msk [vmem:[%s5360_s26 + $0x1f8] sm:$0xf] %vm1667_vm0, %v3300_v49  ;;  %3942 = vst.msk [vmem:[%s5360_s26 + $0xfc] sm:$0xf] %vm1667_vm0, %v2394_v62 }
 0x293   : > { %3362 = vrot.lane.b32.xlu1 %v6820_v9, %s4778_s18  ;;  %2002 = vrot.lane.b32.xlu0 %v6821_v6, %s4778_s18 }
 0x295   : > { %v3302_v22 = vpop.permute.xlu1 %3301  ;;  %v1975_v37 = vpop.permute.xlu0 %1974 }
 0x296   : > { %4230 = vst.msk [vmem:[%s5360_s26 + $0x1fc] sm:$0xf] %vm1667_vm0, %v3302_v22  ;;  %3799 = vst.msk [vmem:[%s5770_s30 + $0x40] sm:$0xf] %vm1667_vm0, %v1975_v37 }
 0x297   : > { %2910 = vrot.lane.b32.xlu0 %v6298_v25, %s4778_s18  ;;  %2004 = vrot.lane.b32.xlu1 %v6296_v60, %s4778_s18 }
 0x299   : > { %v2883_v21 = vpop.permute.xlu0 %2882  ;;  %v1977_v15 = vpop.permute.xlu1 %1976 }
 0x29a   : > { %4087 = vst.msk [vmem:[%s5770_s30 + $0x140] sm:$0xf] %vm1667_vm0, %v2883_v21  ;;  %3800 = vst.msk [vmem:[%s5770_s30 + $0x44] sm:$0xf] %vm1667_vm0, %v1977_v15 }
 0x29b   : > { %2456 = vrot.lane.b32.xlu0 %v6283_v13, %s4778_s18  ;;  %2912 = vrot.lane.b32.xlu1 %v6324_v59, %s4778_s18 }
 0x29d   : > { %v2429_v25 = vpop.permute.xlu0 %2428  ;;  %v2885_v24 = vpop.permute.xlu1 %2884 }
 0x29e   : > { %3943 = vst.msk [vmem:[%s5770_s30 + $0xc0] sm:$0xf] %vm1667_vm0, %v2429_v25  ;;  %4088 = vst.msk [vmem:[%s5770_s30 + $0x144] sm:$0xf] %vm1667_vm0, %v2885_v24 }
 0x29f   : > { %3364 = vrot.lane.b32.xlu0 %v6308_v31, %s4778_s18  ;;  %2458 = vrot.lane.b32.xlu1 %v6306_v50, %s4778_s18 }
 0x2a1   : > { %v3337_v13 = vpop.permute.xlu0 %3336  ;;  %v2431_v60 = vpop.permute.xlu1 %2430 }
 0x2a2   : > { %4231 = vst.msk [vmem:[%s5770_s30 + $0x1c0] sm:$0xf] %vm1667_vm0, %v3337_v13  ;;  %3944 = vst.msk [vmem:[%s5770_s30 + $0xc4] sm:$0xf] %vm1667_vm0, %v2431_v60 }
 0x2a3   : > { %3366 = vrot.lane.b32.xlu1 %v6329_v10, %s4778_s18 }
 0x2a5   : > { %v3339_v59 = vpop.permute.xlu1 %3338  ;;  %v1979_v43 = vpop.permute.xlu0 %1978 }
 0x2a6   : > { %4232 = vst.msk [vmem:[%s5770_s30 + $0x1c4] sm:$0xf] %vm1667_vm0, %v3339_v59  ;;  %3801 = vst.msk [vmem:[%s5770_s30 + $0x48] sm:$0xf] %vm1667_vm0, %v1979_v43 }
 0x2a9   : > { %v2887_v50 = vpop.permute.xlu0 %2886  ;;  %v1981_v31 = vpop.permute.xlu1 %1980 }
 0x2aa   : > { %4089 = vst.msk [vmem:[%s5770_s30 + $0x148] sm:$0xf] %vm1667_vm0, %v2887_v50  ;;  %3802 = vst.msk [vmem:[%s5770_s30 + $0x4c] sm:$0xf] %vm1667_vm0, %v1981_v31 }
 0x2ad   : > { %v2433_v8 = vpop.permute.xlu0 %2432  ;;  %v2889_v57 = vpop.permute.xlu1 %2888 }
 0x2ae   : > { %3945 = vst.msk [vmem:[%s5770_s30 + $0xc8] sm:$0xf] %vm1667_vm0, %v2433_v8  ;;  %4090 = vst.msk [vmem:[%s5770_s30 + $0x14c] sm:$0xf] %vm1667_vm0, %v2889_v57 }
 0x2b1   : > { %v3341_v10 = vpop.permute.xlu0 %3340  ;;  %v2435_v3 = vpop.permute.xlu1 %2434 }
 0x2b2   : > { %4233 = vst.msk [vmem:[%s5770_s30 + $0x1c8] sm:$0xf] %vm1667_vm0, %v3341_v10  ;;  %3946 = vst.msk [vmem:[%s5770_s30 + $0xcc] sm:$0xf] %vm1667_vm0, %v2435_v3 }
 0x2b5   : > { %v3343_v35 = vpop.permute.xlu1 %3342  ;;  %v1983_v27 = vpop.permute.xlu0 %1982 }
 0x2b6   : > { %4234 = vst.msk [vmem:[%s5770_s30 + $0x1cc] sm:$0xf] %vm1667_vm0, %v3343_v35  ;;  %3803 = vst.msk [vmem:[%s5770_s30 + $0x50] sm:$0xf] %vm1667_vm0, %v1983_v27 }
 0x2b9   : > { %v2891_v38 = vpop.permute.xlu0 %2890  ;;  %v1985_v29 = vpop.permute.xlu1 %1984 }
 0x2ba   : > { %4091 = vst.msk [vmem:[%s5770_s30 + $0x150] sm:$0xf] %vm1667_vm0, %v2891_v38  ;;  %3804 = vst.msk [vmem:[%s5770_s30 + $0x54] sm:$0xf] %vm1667_vm0, %v1985_v29 }
 0x2bd   : > { %v2437_v32 = vpop.permute.xlu0 %2436  ;;  %v2893_v51 = vpop.permute.xlu1 %2892 }
 0x2be   : > { %3947 = vst.msk [vmem:[%s5770_s30 + $0xd0] sm:$0xf] %vm1667_vm0, %v2437_v32  ;;  %4092 = vst.msk [vmem:[%s5770_s30 + $0x154] sm:$0xf] %vm1667_vm0, %v2893_v51 }
 0x2c1   : > { %v3345_v23 = vpop.permute.xlu0 %3344  ;;  %v2439_v63 = vpop.permute.xlu1 %2438 }
 0x2c2   : > { %4235 = vst.msk [vmem:[%s5770_s30 + $0x1d0] sm:$0xf] %vm1667_vm0, %v3345_v23  ;;  %3948 = vst.msk [vmem:[%s5770_s30 + $0xd4] sm:$0xf] %vm1667_vm0, %v2439_v63 }
 0x2c5   : > { %v3347_v46 = vpop.permute.xlu1 %3346  ;;  %v1987_v39 = vpop.permute.xlu0 %1986 }
 0x2c6   : > { %4236 = vst.msk [vmem:[%s5770_s30 + $0x1d4] sm:$0xf] %vm1667_vm0, %v3347_v46  ;;  %3805 = vst.msk [vmem:[%s5770_s30 + $0x58] sm:$0xf] %vm1667_vm0, %v1987_v39 }
 0x2c9   : > { %v2895_v61 = vpop.permute.xlu0 %2894  ;;  %v1989_v44 = vpop.permute.xlu1 %1988 }
 0x2ca   : > { %4093 = vst.msk [vmem:[%s5770_s30 + $0x158] sm:$0xf] %vm1667_vm0, %v2895_v61  ;;  %3806 = vst.msk [vmem:[%s5770_s30 + $0x5c] sm:$0xf] %vm1667_vm0, %v1989_v44 }
 0x2cd   : > { %v2441_v47 = vpop.permute.xlu0 %2440  ;;  %v2897_v0 = vpop.permute.xlu1 %2896 }
 0x2ce   : > { %3949 = vst.msk [vmem:[%s5770_s30 + $0xd8] sm:$0xf] %vm1667_vm0, %v2441_v47  ;;  %4094 = vst.msk [vmem:[%s5770_s30 + $0x15c] sm:$0xf] %vm1667_vm0, %v2897_v0 }
 0x2d1   : > { %v3349_v16 = vpop.permute.xlu0 %3348  ;;  %v2443_v36 = vpop.permute.xlu1 %2442 }
 0x2d2   : > { %4237 = vst.msk [vmem:[%s5770_s30 + $0x1d8] sm:$0xf] %vm1667_vm0, %v3349_v16  ;;  %3950 = vst.msk [vmem:[%s5770_s30 + $0xdc] sm:$0xf] %vm1667_vm0, %v2443_v36 }
 0x2d5   : > { %v3351_v14 = vpop.permute.xlu1 %3350  ;;  %v1991_v54 = vpop.permute.xlu0 %1990 }
 0x2d6   : > { %4238 = vst.msk [vmem:[%s5770_s30 + $0x1dc] sm:$0xf] %vm1667_vm0, %v3351_v14  ;;  %3807 = vst.msk [vmem:[%s5770_s30 + $0x60] sm:$0xf] %vm1667_vm0, %v1991_v54 }
 0x2d9   : > { %v2899_v30 = vpop.permute.xlu0 %2898  ;;  %v1993_v53 = vpop.permute.xlu1 %1992 }
 0x2da   : > { %4095 = vst.msk [vmem:[%s5770_s30 + $0x160] sm:$0xf] %vm1667_vm0, %v2899_v30  ;;  %3808 = vst.msk [vmem:[%s5770_s30 + $0x64] sm:$0xf] %vm1667_vm0, %v1993_v53 }
 0x2dd   : > { %v2445_v52 = vpop.permute.xlu0 %2444  ;;  %v2901_v55 = vpop.permute.xlu1 %2900 }
 0x2de   : > { %3951 = vst.msk [vmem:[%s5770_s30 + $0xe0] sm:$0xf] %vm1667_vm0, %v2445_v52  ;;  %4096 = vst.msk [vmem:[%s5770_s30 + $0x164] sm:$0xf] %vm1667_vm0, %v2901_v55 }
 0x2e1   : > { %v3353_v48 = vpop.permute.xlu0 %3352  ;;  %v2447_v26 = vpop.permute.xlu1 %2446 }
 0x2e2   : > { %4239 = vst.msk [vmem:[%s5770_s30 + $0x1e0] sm:$0xf] %vm1667_vm0, %v3353_v48  ;;  %3952 = vst.msk [vmem:[%s5770_s30 + $0xe4] sm:$0xf] %vm1667_vm0, %v2447_v26 }
 0x2e5   : > { %v3355_v45 = vpop.permute.xlu1 %3354  ;;  %v1995_v1 = vpop.permute.xlu0 %1994 }
 0x2e6   : > { %4240 = vst.msk [vmem:[%s5770_s30 + $0x1e4] sm:$0xf] %vm1667_vm0, %v3355_v45  ;;  %3809 = vst.msk [vmem:[%s5770_s30 + $0x68] sm:$0xf] %vm1667_vm0, %v1995_v1 }
 0x2e9   : > { %v2903_v7 = vpop.permute.xlu0 %2902  ;;  %v1997_v56 = vpop.permute.xlu1 %1996 }
 0x2ea   : > { %4097 = vst.msk [vmem:[%s5770_s30 + $0x168] sm:$0xf] %vm1667_vm0, %v2903_v7  ;;  %3810 = vst.msk [vmem:[%s5770_s30 + $0x6c] sm:$0xf] %vm1667_vm0, %v1997_v56 }
 0x2ed   : > { %v2449_v11 = vpop.permute.xlu0 %2448  ;;  %v2905_v33 = vpop.permute.xlu1 %2904 }
 0x2ee   : > { %3953 = vst.msk [vmem:[%s5770_s30 + $0xe8] sm:$0xf] %vm1667_vm0, %v2449_v11  ;;  %4098 = vst.msk [vmem:[%s5770_s30 + $0x16c] sm:$0xf] %vm1667_vm0, %v2905_v33 }
 0x2f1   : > { %v3357_v28 = vpop.permute.xlu0 %3356  ;;  %v2451_v34 = vpop.permute.xlu1 %2450 }
 0x2f2   : > { %4241 = vst.msk [vmem:[%s5770_s30 + $0x1e8] sm:$0xf] %vm1667_vm0, %v3357_v28  ;;  %3954 = vst.msk [vmem:[%s5770_s30 + $0xec] sm:$0xf] %vm1667_vm0, %v2451_v34 }
 0x2f5   : > { %v3359_v2 = vpop.permute.xlu1 %3358  ;;  %v1999_v20 = vpop.permute.xlu0 %1998 }
 0x2f6   : > { %4242 = vst.msk [vmem:[%s5770_s30 + $0x1ec] sm:$0xf] %vm1667_vm0, %v3359_v2  ;;  %3811 = vst.msk [vmem:[%s5770_s30 + $0x70] sm:$0xf] %vm1667_vm0, %v1999_v20 }
 0x2f9   : > { %v2907_v18 = vpop.permute.xlu0 %2906  ;;  %v2001_v40 = vpop.permute.xlu1 %2000 }
 0x2fa   : > { %4099 = vst.msk [vmem:[%s5770_s30 + $0x170] sm:$0xf] %vm1667_vm0, %v2907_v18  ;;  %3812 = vst.msk [vmem:[%s5770_s30 + $0x74] sm:$0xf] %vm1667_vm0, %v2001_v40 }
 0x2fd   : > { %v2453_v17 = vpop.permute.xlu0 %2452  ;;  %v2909_v58 = vpop.permute.xlu1 %2908 }
 0x2fe   : > { %3955 = vst.msk [vmem:[%s5770_s30 + $0xf0] sm:$0xf] %vm1667_vm0, %v2453_v17  ;;  %4100 = vst.msk [vmem:[%s5770_s30 + $0x174] sm:$0xf] %vm1667_vm0, %v2909_v58 }
 0x301   : > { %v3361_v41 = vpop.permute.xlu0 %3360  ;;  %v2455_v19 = vpop.permute.xlu1 %2454 }
 0x302   : > { %4243 = vst.msk [vmem:[%s5770_s30 + $0x1f0] sm:$0xf] %vm1667_vm0, %v3361_v41  ;;  %3956 = vst.msk [vmem:[%s5770_s30 + $0xf4] sm:$0xf] %vm1667_vm0, %v2455_v19 }
 0x305   : > { %v3363_v5 = vpop.permute.xlu1 %3362  ;;  %v2003_v12 = vpop.permute.xlu0 %2002 }
 0x306   : > { %4244 = vst.msk [vmem:[%s5770_s30 + $0x1f4] sm:$0xf] %vm1667_vm0, %v3363_v5  ;;  %3813 = vst.msk [vmem:[%s5770_s30 + $0x78] sm:$0xf] %vm1667_vm0, %v2003_v12 }
 0x309   : > { %v2911_v4 = vpop.permute.xlu0 %2910  ;;  %v2005_v42 = vpop.permute.xlu1 %2004 }
 0x30a   : > { %4101 = vst.msk [vmem:[%s5770_s30 + $0x178] sm:$0xf] %vm1667_vm0, %v2911_v4  ;;  %3814 = vst.msk [vmem:[%s5770_s30 + $0x7c] sm:$0xf] %vm1667_vm0, %v2005_v42 }
 0x30d   : > { %v2457_v49 = vpop.permute.xlu0 %2456  ;;  %v2913_v62 = vpop.permute.xlu1 %2912 }
 0x30e   : > { %3957 = vst.msk [vmem:[%s5770_s30 + $0xf8] sm:$0xf] %vm1667_vm0, %v2457_v49  ;;  %4102 = vst.msk [vmem:[%s5770_s30 + $0x17c] sm:$0xf] %vm1667_vm0, %v2913_v62 }
 0x311   : > { %v3365_v9 = vpop.permute.xlu0 %3364  ;;  %v2459_v6 = vpop.permute.xlu1 %2458 }
 0x312   : > { %4245 = vst.msk [vmem:[%s5770_s30 + $0x1f8] sm:$0xf] %vm1667_vm0, %v3365_v9  ;;  %3958 = vst.msk [vmem:[%s5770_s30 + $0xfc] sm:$0xf] %vm1667_vm0, %v2459_v6 }
 0x315   : > { %v3367_v22 = vpop.permute.xlu1 %3366 }
 0x316   : > { %4246 = vst.msk [vmem:[%s5770_s30 + $0x1fc] sm:$0xf] %vm1667_vm0, %v3367_v22 }
 0x317 PF: > { %s19_s20 = sadd.s32 1, %s4769_s20   ;;  %s6822_s15 = smov %s4753_s16 }
 0x318   : > { %p16_p4 = scmp.ge.s32.totalorder %s19_s20, 4   ;;  %s6823_s16 = smov %s4757_s17 }
 0x319   : > { %s6824_s17 = smov %s4878_s13  ;;  %s6825_s18 = smov %s4765_s19 }
 0x31a   : > { %s6826_s19 = smov %s6828_s28  ;;  %18 = sbr.rel (!%p16_p4) target bundleno = 5 (0x5), region = 117 }
 0x31f   :  { %3481 = vsyncpa [#allocation3], 1 }
 0x320   :  { %3483 = vsyncpa [#allocation3 + $0x1], 1 }
 0x321   :  { %3484 = vsyncpa [#allocation5], 1 }

</bundles_post_ra>
